<compile_context>
chip_gen: v7x
topology: tpu7x:2x2x1
jax: 0.10.0
libtpu: 0.0.40
codegen_flags: <defaults>
</compile_context>

<pallas_src>
import functools

import jax
import jax.numpy as jnp
import numpy as np
from jax.experimental import pallas as pl
from jax.experimental.pallas import tpu as pltpu


def rmc_kernel(m_ref, x_ref, wqkv_ref,
               ln1_g_ref, ln1_b_ref, w1_ref, b1_ref, w2_ref, b2_ref,
               ln2_g_ref, ln2_b_ref, out_ref,
               *, BT, N, Nx, H, Fh, scaling, compute_dtype):
    f32 = jnp.float32
    cd = compute_dtype
    T = N + Nx
    D = H * Fh

    # ---- tokens: per-batch-element [M ; x] rows, cast to bf16 before concat ----
    m = m_ref[...]                                        # (BT*N, D) f32 (residual path)
    m_bf = m.astype(cd).reshape(BT, N, D)                 # (BT, N, D) bf16
    x_bf = x_ref[...].reshape(BT, Nx, D)                  # (BT, Nx, D) bf16 (from wrapper)
    tokens = jnp.concatenate([m_bf, x_bf], axis=1)        # (BT, T, D) sublane concat
    tokens2d = tokens.reshape(BT * T, D)                  # (BT*T, D)  tall, lane-dense

    # ---- fused QKV: one tall (BT*T, D) x (D, 3D) matmul, f32 accumulation ------
    qkv = jnp.dot(tokens2d, wqkv_ref[...], preferred_element_type=f32)   # (BT*T, 3D)

    # q only needed for the N memory rows of each batch element.
    q = (qkv[:, :D].reshape(BT, T, D)[:, :N, :] * scaling).astype(cd)    # (BT, N, D)
    k = qkv[:, D:2 * D].reshape(BT, T, D).astype(cd)                     # (BT, T, D)
    v = qkv[:, 2 * D:].reshape(BT, T, D).astype(cd)                      # (BT, T, D)

    # ---- split into heads at the scores stage: leading batch axis g = h*BT + b --
    qh = jnp.concatenate([q[..., h * Fh:(h + 1) * Fh] for h in range(H)], axis=0)  # (H*BT, N, Fh)
    kh = jnp.concatenate([k[..., h * Fh:(h + 1) * Fh] for h in range(H)], axis=0)  # (H*BT, T, Fh)
    vh = jnp.concatenate([v[..., h * Fh:(h + 1) * Fh] for h in range(H)], axis=0)  # (H*BT, T, Fh)

    s = jnp.einsum('gnf,gtf->gnt', qh, kh, preferred_element_type=f32)   # (H*BT, N, T)
    s_max = jnp.max(s, axis=-1, keepdims=True)
    e = jnp.exp(s - s_max)
    denom = jnp.sum(e, axis=-1, keepdims=True)
    p = e * pl.reciprocal(denom, approx=True)             # EUP reciprocal (free slot)

    o = jnp.einsum('gnt,gtf->gnf', p.astype(cd), vh, preferred_element_type=f32)   # (H*BT, N, Fh)

    # ---- reassemble heads in-register (no VMEM scratch, no masked stores) ------
    attn = jnp.concatenate([o[h * BT:(h + 1) * BT] for h in range(H)], axis=-1)    # (BT, N, D)
    attn = attn.reshape(BT * N, D)

    def layer_norm(z, gamma, beta):       # PyTorch LayerNorm: biased var, eps=1e-5
        mu = jnp.mean(z, axis=-1, keepdims=True)
        var = jnp.mean((z - mu) ** 2, axis=-1, keepdims=True)
        return (z - mu) * jax.lax.rsqrt(var + 1e-5) * gamma + beta

    y = layer_norm(m + attn, ln1_g_ref[...], ln1_b_ref[...])             # (BT*N, D) f32

    # ---- MLP: tall Linear -> ReLU -> Linear ------------------------------------
    h1 = jnp.maximum(
        jnp.dot(y.astype(cd), w1_ref[...], preferred_element_type=f32) + b1_ref[...],
        0.0)
    z = jnp.dot(h1.astype(cd), w2_ref[...], preferred_element_type=f32) + b2_ref[...]
    out = layer_norm(y + z, ln2_g_ref[...], ln2_b_ref[...])

    out_ref[...] = out.astype(out_ref.dtype)


def _replicated_spec(arr):
    """Full-array block, same block for every grid step (weights)."""
    nd = arr.ndim
    return pl.BlockSpec(arr.shape, lambda i, _nd=nd: (0,) * _nd)


def rmc_forward(x, M, params, *, nheads, batch_tile=8, compute_dtype=jnp.bfloat16):
    """RMC 'RNN' forward.  x: (b, Nx, D), M: (b, N, D).  Returns (out, new_M)."""
    b, N, D = M.shape
    Nx = x.shape[1]
    H = nheads
    assert D % H == 0
    Fh = D // H
    scaling = float(Fh) ** (-0.5)

    # Batch tile: as large as requested while dividing b (keeps block shapes static).
    bt = max(1, min(batch_tile, b))
    while b % bt:
        bt -= 1
    grid = (b // bt,)

    wqkv = params["W_proj"].astype(compute_dtype)                 # (D, 3D), fused
    m2d = M.reshape(b * N, D).astype(jnp.float32)                 # f32 recurrent state
    x2d = x.reshape(b * Nx, D).astype(compute_dtype)              # bf16: halves x DMA

    args = (m2d, x2d, wqkv,
            params["ln1_g"], params["ln1_b"],
            params["W_mlp1"].astype(compute_dtype), params["b_mlp1"],
            params["W_mlp2"].astype(compute_dtype), params["b_mlp2"],
            params["ln2_g"], params["ln2_b"])

    in_specs = [pl.BlockSpec((bt * N, D), lambda i: (i, 0)),      # memory rows, tile i
                pl.BlockSpec((bt * Nx, D), lambda i: (i, 0))]     # input rows,  tile i
    in_specs += [_replicated_spec(a) for a in args[2:]]           # weights: one block

    kernel = functools.partial(rmc_kernel, BT=bt, N=N, Nx=Nx, H=H, Fh=Fh,
                               scaling=scaling, compute_dtype=compute_dtype)

    new_m2d = pl.pallas_call(
        kernel,
        grid=grid,
        out_shape=jax.ShapeDtypeStruct((b * N, D), jnp.float32),
        in_specs=in_specs,
        out_specs=pl.BlockSpec((bt * N, D), lambda i: (i, 0)),
        input_output_aliases={0: 0},                              # in-place memory update
        compiler_params=pltpu.CompilerParams(
            dimension_semantics=("parallel",),
            vmem_limit_bytes=32 * 1024 * 1024),
    )(*args)

    new_M = new_m2d.reshape(b, N, D)
    return new_m2d.reshape(b, N * D), new_M


def mem_init(b, N, D):
    """RMC memory buffer: identity in the first N columns, zeros elsewhere
    (the intended semantics of the module's M buffer; the torch.cat dim there
    is a bug in the original source)."""
    eye = jnp.broadcast_to(jnp.eye(N, dtype=jnp.float32), (b, N, N))
    return jnp.concatenate([eye, jnp.zeros((b, N, D - N), jnp.float32)], axis=-1)


def rmc_reference(x, M, params, *, nheads, matmul_dtype=jnp.float32):
    """Pure-JAX reference mirroring PyTorch RMC (mode='RNN').  matmul_dtype
    optionally reproduces the kernel's bf16-operand / f32-accumulate policy."""
    f32 = jnp.float32
    md = matmul_dtype
    b, N, D = M.shape
    H = nheads
    Fh = D // H
    scaling = float(Fh) ** (-0.5)
    m_cat = jnp.concatenate([M, x], axis=1)                        # (b, T, D)
    T = m_cat.shape[1]

    w = params["W_proj"].astype(md)
    mc = m_cat.astype(md)
    q = jnp.einsum('btd,de->bte', mc, w[:, :D], preferred_element_type=f32) * scaling
    k = jnp.einsum('btd,de->bte', mc, w[:, D:2 * D], preferred_element_type=f32)
    v = jnp.einsum('btd,de->bte', mc, w[:, 2 * D:], preferred_element_type=f32)
    q = q.reshape(b, T, H, Fh).transpose(0, 2, 1, 3)
    k = k.reshape(b, T, H, Fh).transpose(0, 2, 1, 3)
    v = v.reshape(b, T, H, Fh).transpose(0, 2, 1, 3)
    aw = jnp.einsum('bhqf,bhkf->bhqk', q.astype(md), k.astype(md),
                    preferred_element_type=f32)
    aw = jax.nn.softmax(aw, axis=-1)
    attn = jnp.einsum('bhqk,bhkf->bhqf', aw.astype(md), v.astype(md),
                      preferred_element_type=f32)
    attn = attn.transpose(0, 2, 1, 3).reshape(b, T, D)

    def ln(z, g, be):
        mu = jnp.mean(z, -1, keepdims=True)
        var = jnp.mean((z - mu) ** 2, -1, keepdims=True)
        return (z - mu) * jax.lax.rsqrt(var + 1e-5) * g + be

    y = ln(m_cat + attn, params["ln1_g"], params["ln1_b"])
    h1 = jax.nn.relu(
        jnp.einsum('btd,de->bte', y.astype(md), params["W_mlp1"].astype(md),
                   preferred_element_type=f32) + params["b_mlp1"])
    z = jnp.einsum('btd,de->bte', h1.astype(md), params["W_mlp2"].astype(md),
                   preferred_element_type=f32) + params["b_mlp2"]
    z = ln(y + z, params["ln2_g"], params["ln2_b"])
    new_M = z[:, :N]
    return new_M.reshape(b, -1), new_M


if __name__ == "__main__":
    # RMC(N=8, d=32, h=4, b=32, Nx=8, mode='RNN')  ->  D = d*h = 128 (lane-dense)
    # b=32 with B_TILE=8 -> grid=(4,), 128-row QKV matmul / 64-row MLP per step.
    b, N, Nx, d_head, heads = 32, 8, 8, 32, 4
    D = d_head * heads

    key = jax.random.PRNGKey(0)
    ks = jax.random.split(key, 6)

    def init(k, shape, scale=0.1):
        return scale * jax.random.normal(k, shape, jnp.float32)

    params = dict(
        W_proj=init(ks[0], (D, 3 * D)),                 # SelfAttentionLayer.proj
        ln1_g=jnp.ones((1, D), jnp.float32),
        ln1_b=jnp.zeros((1, D), jnp.float32),
        W_mlp1=init(ks[1], (D, D)),
        b_mlp1=init(ks[2], (1, D)),
        W_mlp2=init(ks[3], (D, D)),
        b_mlp2=init(ks[4], (1, D)),
        ln2_g=jnp.ones((1, D), jnp.float32),
        ln2_b=jnp.zeros((1, D), jnp.float32),
    )
    x = jax.random.normal(ks[5], (b, Nx, D), jnp.float32)
    M0 = mem_init(b, N, D)

    # References: f32 "PyTorch-faithful" + precision-matched bf16-operand version.
    ref_out_f32, ref_M_f32 = rmc_reference(x, M0, params, nheads=heads,
                                           matmul_dtype=jnp.float32)
    ref_out_bf, ref_M_bf = rmc_reference(x, M0, params, nheads=heads,
                                         matmul_dtype=jnp.bfloat16)

    out, new_M = rmc_forward(x, M0, params, nheads=heads, batch_tile=8)
    out = jax.block_until_ready(out)

    # Check vs the reference with the same bf16-operand / f32-accumulate policy
    # (small extra slack for the EUP approx reciprocal in the softmax).
    np.testing.assert_allclose(np.asarray(out), np.asarray(ref_out_bf),
                               rtol=3e-2, atol=3e-2)
    np.testing.assert_allclose(np.asarray(new_M), np.asarray(ref_M_bf),
                               rtol=3e-2, atol=3e-2)
    # Looser check vs the plain f32 reference (bf16 matmul operands + LayerNorm
    # amplification account for the gap).
    np.testing.assert_allclose(np.asarray(out), np.asarray(ref_out_f32),
                               rtol=1e-1, atol=1e-1)

    print("KERNEL_OK")
</pallas_src>

<mosaic_0001>
module attributes {stable_mosaic.version = 11 : i64} {
  func.func @rmc_kernel(%arg0: i32, %arg1: memref<64x128xf32, #tpu.memory_space<vmem>>, %arg2: memref<64x128xbf16, #tpu.memory_space<vmem>>, %arg3: memref<128x384xbf16, #tpu.memory_space<vmem>>, %arg4: memref<1x128xf32, #tpu.memory_space<vmem>>, %arg5: memref<1x128xf32, #tpu.memory_space<vmem>>, %arg6: memref<128x128xbf16, #tpu.memory_space<vmem>>, %arg7: memref<1x128xf32, #tpu.memory_space<vmem>>, %arg8: memref<128x128xbf16, #tpu.memory_space<vmem>>, %arg9: memref<1x128xf32, #tpu.memory_space<vmem>>, %arg10: memref<1x128xf32, #tpu.memory_space<vmem>>, %arg11: memref<1x128xf32, #tpu.memory_space<vmem>>, %arg12: memref<64x128xf32, #tpu.memory_space<vmem>>) attributes {dimension_semantics = [#tpu.dimension_semantics<parallel>], iteration_bounds = array<i64: 4>, scalar_prefetch = 0 : i64, scratch_operands = 0 : i64, tpu.core_type = #tpu.core_type<tc>, window_params = [{transform_indices = @transform_0, window_bounds = array<i64: 64, 128>}, {transform_indices = @transform_1, window_bounds = array<i64: 64, 128>}, {pipeline_mode = #tpu.pipeline_mode<synchronous>, transform_indices = @transform_2, window_bounds = array<i64: 128, 384>}, {pipeline_mode = #tpu.pipeline_mode<synchronous>, transform_indices = @transform_3, window_bounds = array<i64: 1, 128>}, {pipeline_mode = #tpu.pipeline_mode<synchronous>, transform_indices = @transform_4, window_bounds = array<i64: 1, 128>}, {pipeline_mode = #tpu.pipeline_mode<synchronous>, transform_indices = @transform_5, window_bounds = array<i64: 128, 128>}, {pipeline_mode = #tpu.pipeline_mode<synchronous>, transform_indices = @transform_6, window_bounds = array<i64: 1, 128>}, {pipeline_mode = #tpu.pipeline_mode<synchronous>, transform_indices = @transform_7, window_bounds = array<i64: 128, 128>}, {pipeline_mode = #tpu.pipeline_mode<synchronous>, transform_indices = @transform_8, window_bounds = array<i64: 1, 128>}, {pipeline_mode = #tpu.pipeline_mode<synchronous>, transform_indices = @transform_9, window_bounds = array<i64: 1, 128>}, {pipeline_mode = #tpu.pipeline_mode<synchronous>, transform_indices = @transform_10, window_bounds = array<i64: 1, 128>}, {transform_indices = @transform_11, window_bounds = array<i64: 64, 128>}]} {
    %c0 = arith.constant 0 : index
    %c0_0 = arith.constant 0 : index
    %0 = vector.load %arg1[%c0, %c0_0] : memref<64x128xf32, #tpu.memory_space<vmem>>, vector<64x128xf32>
    %1 = arith.truncf %0 : vector<64x128xf32> to vector<64x128xbf16>
    %2 = vector.shape_cast %1 : vector<64x128xbf16> to vector<8x8x128xbf16>
    %c0_1 = arith.constant 0 : index
    %c0_2 = arith.constant 0 : index
    %3 = vector.load %arg2[%c0_1, %c0_2] : memref<64x128xbf16, #tpu.memory_space<vmem>>, vector<64x128xbf16>
    %4 = vector.shape_cast %3 : vector<64x128xbf16> to vector<8x8x128xbf16>
    %5 = tpu.concatenate %2, %4 in 1 : vector<8x8x128xbf16>, vector<8x8x128xbf16> -> vector<8x16x128xbf16>
    %6 = vector.shape_cast %5 : vector<8x16x128xbf16> to vector<128x128xbf16>
    %c0_3 = arith.constant 0 : index
    %c0_4 = arith.constant 0 : index
    %7 = vector.load %arg3[%c0_3, %c0_4] : memref<128x384xbf16, #tpu.memory_space<vmem>>, vector<128x384xbf16>
    %cst = arith.constant dense<0.000000e+00> : vector<128x384xf32>
    %8 = tpu.matmul %6, %7, %cst {dimension_numbers = #tpu.dot_dimension_numbers<[1], [0], [0], [1], [0, 0, 1, 1], [], []>} : vector<128x128xbf16>, vector<128x384xbf16>, vector<128x384xf32> -> vector<128x384xf32>
    %9 = vector.extract_strided_slice %8 {offsets = [0, 0], sizes = [128, 128], strides = [1, 1]} : vector<128x384xf32> to vector<128x128xf32>
    %10 = vector.shape_cast %9 : vector<128x128xf32> to vector<8x16x128xf32>
    %11 = vector.extract_strided_slice %10 {offsets = [0, 0, 0], sizes = [8, 8, 128], strides = [1, 1, 1]} : vector<8x16x128xf32> to vector<8x8x128xf32>
    %cst_5 = arith.constant 0.176776692 : f32
    %12 = vector.broadcast %cst_5 : f32 to vector<8x8x128xf32>
    %13 = arith.mulf %11, %12 : vector<8x8x128xf32>
    %14 = arith.truncf %13 : vector<8x8x128xf32> to vector<8x8x128xbf16>
    %15 = vector.extract_strided_slice %8 {offsets = [0, 128], sizes = [128, 128], strides = [1, 1]} : vector<128x384xf32> to vector<128x128xf32>
    %16 = vector.shape_cast %15 : vector<128x128xf32> to vector<8x16x128xf32>
    %17 = arith.truncf %16 : vector<8x16x128xf32> to vector<8x16x128xbf16>
    %18 = vector.extract_strided_slice %8 {offsets = [0, 256], sizes = [128, 128], strides = [1, 1]} : vector<128x384xf32> to vector<128x128xf32>
    %19 = vector.shape_cast %18 : vector<128x128xf32> to vector<8x16x128xf32>
    %20 = arith.truncf %19 : vector<8x16x128xf32> to vector<8x16x128xbf16>
    %21 = vector.extract_strided_slice %14 {offsets = [0, 0, 0], sizes = [8, 8, 32], strides = [1, 1, 1]} : vector<8x8x128xbf16> to vector<8x8x32xbf16>
    %22 = vector.extract_strided_slice %14 {offsets = [0, 0, 32], sizes = [8, 8, 32], strides = [1, 1, 1]} : vector<8x8x128xbf16> to vector<8x8x32xbf16>
    %23 = vector.extract_strided_slice %14 {offsets = [0, 0, 64], sizes = [8, 8, 32], strides = [1, 1, 1]} : vector<8x8x128xbf16> to vector<8x8x32xbf16>
    %24 = vector.extract_strided_slice %14 {offsets = [0, 0, 96], sizes = [8, 8, 32], strides = [1, 1, 1]} : vector<8x8x128xbf16> to vector<8x8x32xbf16>
    %25 = tpu.concatenate %21, %22, %23, %24 in 0 : vector<8x8x32xbf16>, vector<8x8x32xbf16>, vector<8x8x32xbf16>, vector<8x8x32xbf16> -> vector<32x8x32xbf16>
    %26 = vector.extract_strided_slice %17 {offsets = [0, 0, 0], sizes = [8, 16, 32], strides = [1, 1, 1]} : vector<8x16x128xbf16> to vector<8x16x32xbf16>
    %27 = vector.extract_strided_slice %17 {offsets = [0, 0, 32], sizes = [8, 16, 32], strides = [1, 1, 1]} : vector<8x16x128xbf16> to vector<8x16x32xbf16>
    %28 = vector.extract_strided_slice %17 {offsets = [0, 0, 64], sizes = [8, 16, 32], strides = [1, 1, 1]} : vector<8x16x128xbf16> to vector<8x16x32xbf16>
    %29 = vector.extract_strided_slice %17 {offsets = [0, 0, 96], sizes = [8, 16, 32], strides = [1, 1, 1]} : vector<8x16x128xbf16> to vector<8x16x32xbf16>
    %30 = tpu.concatenate %26, %27, %28, %29 in 0 : vector<8x16x32xbf16>, vector<8x16x32xbf16>, vector<8x16x32xbf16>, vector<8x16x32xbf16> -> vector<32x16x32xbf16>
    %31 = vector.extract_strided_slice %20 {offsets = [0, 0, 0], sizes = [8, 16, 32], strides = [1, 1, 1]} : vector<8x16x128xbf16> to vector<8x16x32xbf16>
    %32 = vector.extract_strided_slice %20 {offsets = [0, 0, 32], sizes = [8, 16, 32], strides = [1, 1, 1]} : vector<8x16x128xbf16> to vector<8x16x32xbf16>
    %33 = vector.extract_strided_slice %20 {offsets = [0, 0, 64], sizes = [8, 16, 32], strides = [1, 1, 1]} : vector<8x16x128xbf16> to vector<8x16x32xbf16>
    %34 = vector.extract_strided_slice %20 {offsets = [0, 0, 96], sizes = [8, 16, 32], strides = [1, 1, 1]} : vector<8x16x128xbf16> to vector<8x16x32xbf16>
    %35 = tpu.concatenate %31, %32, %33, %34 in 0 : vector<8x16x32xbf16>, vector<8x16x32xbf16>, vector<8x16x32xbf16>, vector<8x16x32xbf16> -> vector<32x16x32xbf16>
    "tpu.trace_start"() <{level = 10 : i32, message = "gnf,gtf->gnt"}> : () -> ()
    %cst_6 = arith.constant dense<0.000000e+00> : vector<32x8x16xf32>
    %36 = tpu.matmul %25, %30, %cst_6 {dimension_numbers = #tpu.dot_dimension_numbers<[2], [2], [1], [1], [0, 0, 0, 1, 1, 1], [0], [0]>} : vector<32x8x32xbf16>, vector<32x16x32xbf16>, vector<32x8x16xf32> -> vector<32x8x16xf32>
    "tpu.trace_stop"() : () -> ()
    %cst_7 = arith.constant dense<0xFF800000> : vector<32x8xf32>
    %37 = vector.multi_reduction <maximumf>, %36, %cst_7 [2] : vector<32x8x16xf32> to vector<32x8xf32>
    %38 = vector.shape_cast %37 : vector<32x8xf32> to vector<32x8x1xf32>
    %39 = vector.broadcast %38 : vector<32x8x1xf32> to vector<32x8x16xf32>
    %40 = arith.subf %36, %39 : vector<32x8x16xf32>
    %41 = math.exp %40 : vector<32x8x16xf32>
    %cst_8 = arith.constant dense<0.000000e+00> : vector<32x8xf32>
    %42 = vector.multi_reduction <add>, %41, %cst_8 [2] : vector<32x8x16xf32> to vector<32x8xf32>
    %43 = vector.shape_cast %42 : vector<32x8xf32> to vector<32x8x1xf32>
    %44 = tpu.reciprocal %43 {approx = true} : vector<32x8x1xf32> -> vector<32x8x1xf32>
    %45 = vector.broadcast %44 : vector<32x8x1xf32> to vector<32x8x16xf32>
    %46 = arith.mulf %41, %45 : vector<32x8x16xf32>
    %47 = arith.truncf %46 : vector<32x8x16xf32> to vector<32x8x16xbf16>
    "tpu.trace_start"() <{level = 10 : i32, message = "gnt,gtf->gnf"}> : () -> ()
    %cst_9 = arith.constant dense<0.000000e+00> : vector<32x8x32xf32>
    %48 = tpu.matmul %47, %35, %cst_9 {dimension_numbers = #tpu.dot_dimension_numbers<[2], [1], [1], [2], [0, 0, 0, 1, 1, 2], [0], [0]>} : vector<32x8x16xbf16>, vector<32x16x32xbf16>, vector<32x8x32xf32> -> vector<32x8x32xf32>
    "tpu.trace_stop"() : () -> ()
    %49 = vector.extract_strided_slice %48 {offsets = [0, 0, 0], sizes = [8, 8, 32], strides = [1, 1, 1]} : vector<32x8x32xf32> to vector<8x8x32xf32>
    %50 = vector.extract_strided_slice %48 {offsets = [8, 0, 0], sizes = [8, 8, 32], strides = [1, 1, 1]} : vector<32x8x32xf32> to vector<8x8x32xf32>
    %51 = vector.extract_strided_slice %48 {offsets = [16, 0, 0], sizes = [8, 8, 32], strides = [1, 1, 1]} : vector<32x8x32xf32> to vector<8x8x32xf32>
    %52 = vector.extract_strided_slice %48 {offsets = [24, 0, 0], sizes = [8, 8, 32], strides = [1, 1, 1]} : vector<32x8x32xf32> to vector<8x8x32xf32>
    %53 = tpu.concatenate %49, %50, %51, %52 in 2 : vector<8x8x32xf32>, vector<8x8x32xf32>, vector<8x8x32xf32>, vector<8x8x32xf32> -> vector<8x8x128xf32>
    %54 = vector.shape_cast %53 : vector<8x8x128xf32> to vector<64x128xf32>
    %55 = arith.addf %0, %54 : vector<64x128xf32>
    %c0_10 = arith.constant 0 : index
    %c0_11 = arith.constant 0 : index
    %56 = vector.load %arg4[%c0_10, %c0_11] : memref<1x128xf32, #tpu.memory_space<vmem>>, vector<1x128xf32>
    %c0_12 = arith.constant 0 : index
    %c0_13 = arith.constant 0 : index
    %57 = vector.load %arg5[%c0_12, %c0_13] : memref<1x128xf32, #tpu.memory_space<vmem>>, vector<1x128xf32>
    %cst_14 = arith.constant dense<0.000000e+00> : vector<64xf32>
    %58 = vector.multi_reduction <add>, %55, %cst_14 [1] : vector<64x128xf32> to vector<64xf32>
    %59 = vector.shape_cast %58 : vector<64xf32> to vector<64x1xf32>
    %cst_15 = arith.constant 1.280000e+02 : f32
    %60 = vector.broadcast %cst_15 : f32 to vector<64x1xf32>
    %61 = arith.divf %59, %60 : vector<64x1xf32>
    %62 = vector.broadcast %61 : vector<64x1xf32> to vector<64x128xf32>
    %63 = arith.subf %55, %62 : vector<64x128xf32>
    %64 = arith.mulf %63, %63 : vector<64x128xf32>
    %cst_16 = arith.constant dense<0.000000e+00> : vector<64xf32>
    %65 = vector.multi_reduction <add>, %64, %cst_16 [1] : vector<64x128xf32> to vector<64xf32>
    %66 = vector.shape_cast %65 : vector<64xf32> to vector<64x1xf32>
    %cst_17 = arith.constant 1.280000e+02 : f32
    %67 = vector.broadcast %cst_17 : f32 to vector<64x1xf32>
    %68 = arith.divf %66, %67 : vector<64x1xf32>
    %69 = vector.broadcast %61 : vector<64x1xf32> to vector<64x128xf32>
    %70 = arith.subf %55, %69 : vector<64x128xf32>
    %cst_18 = arith.constant 9.99999974E-6 : f32
    %71 = vector.broadcast %cst_18 : f32 to vector<64x1xf32>
    %72 = arith.addf %68, %71 : vector<64x1xf32>
    %73 = math.rsqrt %72 : vector<64x1xf32>
    %74 = vector.broadcast %73 : vector<64x1xf32> to vector<64x128xf32>
    %75 = arith.mulf %70, %74 : vector<64x128xf32>
    %76 = vector.broadcast %56 : vector<1x128xf32> to vector<64x128xf32>
    %77 = arith.mulf %75, %76 : vector<64x128xf32>
    %78 = vector.broadcast %57 : vector<1x128xf32> to vector<64x128xf32>
    %79 = arith.addf %77, %78 : vector<64x128xf32>
    %80 = arith.truncf %79 : vector<64x128xf32> to vector<64x128xbf16>
    %c0_19 = arith.constant 0 : index
    %c0_20 = arith.constant 0 : index
    %81 = vector.load %arg6[%c0_19, %c0_20] : memref<128x128xbf16, #tpu.memory_space<vmem>>, vector<128x128xbf16>
    %cst_21 = arith.constant dense<0.000000e+00> : vector<64x128xf32>
    %82 = tpu.matmul %80, %81, %cst_21 {dimension_numbers = #tpu.dot_dimension_numbers<[1], [0], [0], [1], [0, 0, 1, 1], [], []>} : vector<64x128xbf16>, vector<128x128xbf16>, vector<64x128xf32> -> vector<64x128xf32>
    %c0_22 = arith.constant 0 : index
    %c0_23 = arith.constant 0 : index
    %83 = vector.load %arg7[%c0_22, %c0_23] : memref<1x128xf32, #tpu.memory_space<vmem>>, vector<1x128xf32>
    %84 = vector.broadcast %83 : vector<1x128xf32> to vector<64x128xf32>
    %85 = arith.addf %82, %84 : vector<64x128xf32>
    %cst_24 = arith.constant 0.000000e+00 : f32
    %86 = vector.broadcast %cst_24 : f32 to vector<64x128xf32>
    %87 = arith.maximumf %85, %86 : vector<64x128xf32>
    %88 = arith.truncf %87 : vector<64x128xf32> to vector<64x128xbf16>
    %c0_25 = arith.constant 0 : index
    %c0_26 = arith.constant 0 : index
    %89 = vector.load %arg8[%c0_25, %c0_26] : memref<128x128xbf16, #tpu.memory_space<vmem>>, vector<128x128xbf16>
    %cst_27 = arith.constant dense<0.000000e+00> : vector<64x128xf32>
    %90 = tpu.matmul %88, %89, %cst_27 {dimension_numbers = #tpu.dot_dimension_numbers<[1], [0], [0], [1], [0, 0, 1, 1], [], []>} : vector<64x128xbf16>, vector<128x128xbf16>, vector<64x128xf32> -> vector<64x128xf32>
    %c0_28 = arith.constant 0 : index
    %c0_29 = arith.constant 0 : index
    %91 = vector.load %arg9[%c0_28, %c0_29] : memref<1x128xf32, #tpu.memory_space<vmem>>, vector<1x128xf32>
    %92 = vector.broadcast %91 : vector<1x128xf32> to vector<64x128xf32>
    %93 = arith.addf %90, %92 : vector<64x128xf32>
    %94 = arith.addf %79, %93 : vector<64x128xf32>
    %c0_30 = arith.constant 0 : index
    %c0_31 = arith.constant 0 : index
    %95 = vector.load %arg10[%c0_30, %c0_31] : memref<1x128xf32, #tpu.memory_space<vmem>>, vector<1x128xf32>
    %c0_32 = arith.constant 0 : index
    %c0_33 = arith.constant 0 : index
    %96 = vector.load %arg11[%c0_32, %c0_33] : memref<1x128xf32, #tpu.memory_space<vmem>>, vector<1x128xf32>
    %cst_34 = arith.constant dense<0.000000e+00> : vector<64xf32>
    %97 = vector.multi_reduction <add>, %94, %cst_34 [1] : vector<64x128xf32> to vector<64xf32>
    %98 = vector.shape_cast %97 : vector<64xf32> to vector<64x1xf32>
    %cst_35 = arith.constant 1.280000e+02 : f32
    %99 = vector.broadcast %cst_35 : f32 to vector<64x1xf32>
    %100 = arith.divf %98, %99 : vector<64x1xf32>
    %101 = vector.broadcast %100 : vector<64x1xf32> to vector<64x128xf32>
    %102 = arith.subf %94, %101 : vector<64x128xf32>
    %103 = arith.mulf %102, %102 : vector<64x128xf32>
    %cst_36 = arith.constant dense<0.000000e+00> : vector<64xf32>
    %104 = vector.multi_reduction <add>, %103, %cst_36 [1] : vector<64x128xf32> to vector<64xf32>
    %105 = vector.shape_cast %104 : vector<64xf32> to vector<64x1xf32>
    %cst_37 = arith.constant 1.280000e+02 : f32
    %106 = vector.broadcast %cst_37 : f32 to vector<64x1xf32>
    %107 = arith.divf %105, %106 : vector<64x1xf32>
    %108 = vector.broadcast %100 : vector<64x1xf32> to vector<64x128xf32>
    %109 = arith.subf %94, %108 : vector<64x128xf32>
    %cst_38 = arith.constant 9.99999974E-6 : f32
    %110 = vector.broadcast %cst_38 : f32 to vector<64x1xf32>
    %111 = arith.addf %107, %110 : vector<64x1xf32>
    %112 = math.rsqrt %111 : vector<64x1xf32>
    %113 = vector.broadcast %112 : vector<64x1xf32> to vector<64x128xf32>
    %114 = arith.mulf %109, %113 : vector<64x128xf32>
    %115 = vector.broadcast %95 : vector<1x128xf32> to vector<64x128xf32>
    %116 = arith.mulf %114, %115 : vector<64x128xf32>
    %117 = vector.broadcast %96 : vector<1x128xf32> to vector<64x128xf32>
    %118 = arith.addf %116, %117 : vector<64x128xf32>
    %c0_39 = arith.constant 0 : index
    %c0_40 = arith.constant 0 : index
    %119 = vector.load %arg12[%c0_39, %c0_40] : memref<64x128xf32, #tpu.memory_space<vmem>>, vector<64x128xf32>
    tpu.vector_store %arg12[%c0_39, %c0_40], %118 {strides = array<i32>} : memref<64x128xf32, #tpu.memory_space<vmem>>, vector<64x128xf32>,
    return
  }
  func.func @transform_0(%arg0: i32) -> (i32, i32) {
    %c0_i32 = arith.constant 0 : i32
    %c0_i32_0 = arith.constant 0 : i32
    return %arg0, %c0_i32 : i32, i32
  }
  func.func @transform_1(%arg0: i32) -> (i32, i32) {
    %c0_i32 = arith.constant 0 : i32
    %c0_i32_0 = arith.constant 0 : i32
    return %arg0, %c0_i32 : i32, i32
  }
  func.func @transform_2(%arg0: i32) -> (i32, i32) {
    %c0_i32 = arith.constant 0 : i32
    %c0_i32_0 = arith.constant 0 : i32
    %c0_i32_1 = arith.constant 0 : i32
    return %c0_i32, %c0_i32_0 : i32, i32
  }
  func.func @transform_3(%arg0: i32) -> (i32, i32) {
    %c0_i32 = arith.constant 0 : i32
    %c0_i32_0 = arith.constant 0 : i32
    %c0_i32_1 = arith.constant 0 : i32
    return %c0_i32, %c0_i32_0 : i32, i32
  }
  func.func @transform_4(%arg0: i32) -> (i32, i32) {
    %c0_i32 = arith.constant 0 : i32
    %c0_i32_0 = arith.constant 0 : i32
    %c0_i32_1 = arith.constant 0 : i32
    return %c0_i32, %c0_i32_0 : i32, i32
  }
  func.func @transform_5(%arg0: i32) -> (i32, i32) {
    %c0_i32 = arith.constant 0 : i32
    %c0_i32_0 = arith.constant 0 : i32
    %c0_i32_1 = arith.constant 0 : i32
    return %c0_i32, %c0_i32_0 : i32, i32
  }
  func.func @transform_6(%arg0: i32) -> (i32, i32) {
    %c0_i32 = arith.constant 0 : i32
    %c0_i32_0 = arith.constant 0 : i32
    %c0_i32_1 = arith.constant 0 : i32
    return %c0_i32, %c0_i32_0 : i32, i32
  }
  func.func @transform_7(%arg0: i32) -> (i32, i32) {
    %c0_i32 = arith.constant 0 : i32
    %c0_i32_0 = arith.constant 0 : i32
    %c0_i32_1 = arith.constant 0 : i32
    return %c0_i32, %c0_i32_0 : i32, i32
  }
  func.func @transform_8(%arg0: i32) -> (i32, i32) {
    %c0_i32 = arith.constant 0 : i32
    %c0_i32_0 = arith.constant 0 : i32
    %c0_i32_1 = arith.constant 0 : i32
    return %c0_i32, %c0_i32_0 : i32, i32
  }
  func.func @transform_9(%arg0: i32) -> (i32, i32) {
    %c0_i32 = arith.constant 0 : i32
    %c0_i32_0 = arith.constant 0 : i32
    %c0_i32_1 = arith.constant 0 : i32
    return %c0_i32, %c0_i32_0 : i32, i32
  }
  func.func @transform_10(%arg0: i32) -> (i32, i32) {
    %c0_i32 = arith.constant 0 : i32
    %c0_i32_0 = arith.constant 0 : i32
    %c0_i32_1 = arith.constant 0 : i32
    return %c0_i32, %c0_i32_0 : i32, i32
  }
  func.func @transform_11(%arg0: i32) -> (i32, i32) {
    %c0_i32 = arith.constant 0 : i32
    %c0_i32_0 = arith.constant 0 : i32
    return %arg0, %c0_i32 : i32, i32
  }
}

</mosaic_0001>

<bundles_post_ra>
// kernel: tpu_custom_call.1
= control target key start
LH: loop header
LB: loop body
LE: loop exit
PB: predicated region body
PF: predicated region fallthrough
CT: control target
= control target key end

     0   :  { %s7760_s0 = inlined_call_operand.hbm [shape: f32[256,128], index: 0, kind: input, shape index: {}, may-alias: {0,11}]   ;;  %s7761_s1 = inlined_call_operand.vmem [shape: bf16[256,128], index: 1, kind: input, shape index: {}]   ;;  %s7762_s2 = inlined_call_operand.vmem [shape: bf16[128,384], index: 2, kind: input, shape index: {}]   ;;  %s7763_s3 = inlined_call_operand.vmem [shape: f32[1,128], index: 3, kind: input, shape index: {}]   ;;  %s7764_s4 = inlined_call_operand.vmem [shape: f32[1,128], index: 4, kind: input, shape index: {}]   ;;  %s7765_s5 = inlined_call_operand.vmem [shape: bf16[128,128], index: 5, kind: input, shape index: {}]   ;;  %s7766_s6 = inlined_call_operand.vmem [shape: f32[1,128], index: 6, kind: input, shape index: {}]   ;;  %s7767_s7 = inlined_call_operand.vmem [shape: bf16[128,128], index: 7, kind: input, shape index: {}]   ;;  %s7768_s8 = inlined_call_operand.vmem [shape: f32[1,128], index: 8, kind: input, shape index: {}]   ;;  %s7769_s9 = inlined_call_operand.vmem [shape: f32[1,128], index: 9, kind: input, shape index: {}]   ;;  %s7770_s10 = inlined_call_operand.vmem [shape: f32[1,128], index: 10, kind: input, shape index: {}]   ;;  %s7771_s11 = inlined_call_operand.hbm [shape: f32[256,128], index: 11, kind: output, shape index: {}, may-alias: {0,11}]  }
   0x1   :  { %7778 = sst [smem:[#allocation16_spill]] %s7760_s0 }
   0x2   :  { %16 = vsyncpa [#allocation3], 0 }
   0x3   :  { %18 = vsyncpa [#allocation3 + $0x1], 0 }
   0x4   :  { %19 = vsyncpa [#allocation4], 0 }
   0x5   :  { %21 = vsyncpa [#allocation4 + $0x1], 0  ;;  %s6351_s17 = smov 0   ;;  %s6353_s18 = smov 0  }
   0x6   :  { %s6355_s19 = smov 0   ;;  %s6357_s20 = smov 0  }
   0x7 LB: > { %7779 = sst [smem:[#allocation8_spill]] %s6269_s18  ;;  %s6372_s21 = sadd.s32 4294967295, %s6277_s20   ;;  %s6277_s20 = sphi %s6357_s20, %s7805_s20   ;;  %s6273_s19 = sphi %s6355_s19, %s7804_s19   ;;  %s6269_s18 = sphi %s6353_s18, %s7803_s18   ;;  %s6265_s17 = sphi %s6351_s17, %s7802_s17  }
   0x8   : > { %7780 = sst [smem:[#allocation9_spill]] %s6273_s19  ;;  %s5117_s22 = sadd.s32 4294967294, %s6277_s20  }
   0x9   : > { %s6376_s23 = sadd.s32 1, %s6277_s20   ;;  %s34_s24 = sadd.s32 1, %s6273_s19 }
   0xa   : > { %s31_s25 = ssub.s32 %s6277_s20, %s6376_s23  ;;  %p41_p0 = scmp.ne.s32.totalorder %s6273_s19, %s6269_s18 }
   0xb   : > { %p32_p1 = scmp.eq.s32.totalorder %s31_s25, 0  ;;  %p42_p2 = scmp.eq.s32.totalorder %s6277_s20, 0 }
   0xc   : > { %p47_p3 = scmp.ne.s32.totalorder %s6269_s18, %s6265_s17  ;;  %p48_p4 = scmp.eq.s32.totalorder %s6372_s21, 0 }
   0xd   : > { %s6388_s26 = scalar_select %p32_p1, %s6273_s19, %s34_s24  }
   0xe   : > { %p6390_p5 = por %p42_p2, %p41_p0  ;;  %p6394_p6 = por %p48_p4, %p47_p3 }
   0xf   : > { %7781 = sst [smem:[#allocation10_spill]] %s6388_s26  ;;  %p286_p7 = scmp.eq.s32.totalorder %s6372_s21, 3 }
  0x10   : > { %p292_p8 = scmp.eq.s32.totalorder %s5117_s22, 3  ;;  %p5913_p9 = scmp.lt.s32.totalorder %s6277_s20, 4 }
  0x11   : > { %p6400_p10 = por %p286_p7, %p41_p0  ;;  %s339_s12 = sand.u32 1, %s6273_s19  }
  0x12   : > { %p6404_p11 = por %p292_p8, %p47_p3  ;;  %s5259_s13 = sshll.u32 %s6277_s20, 10 }
  0x13   : > { %s7784_s29 = scalar_select %p6400_p10, 1, 0 }
  0x14   : > { %s7785_s30 = scalar_select %p6404_p11, 1, 0 }
  0x15   : > { %s5120_s14 = sshll.u32 %s339_s12, 6  ;;  %s7786_s0 = sld [smem:[#allocation16_spill]] }
  0x16   : > { %s343_s22 = scalar_lea.vmem [#allocation2], %s5120_s14  ;;  %p6417_p12 = pnand %p5913_p9, %p6390_p5 }
  0x17   : > { %s350_s25 = sshll.u32 %s343_s22, 4  ;;  %s6423_s19 = scalar_lea.sflag [#allocation3], %s339_s12  ;;  %s6421_s25 = int_to_ptr.vmem [resolvable:$true] %s350_s25 }
  0x18   : > { %p6183_p0 = pneg %p6417_p12 }
  0x1b   : > { %s6413_s24 = scalar_lea.hbm %s7786_s0, %s5259_s13  ;;  %s6186_s14 = scalar_lea.hbm %s7786_s0, 4096 }
  0x1c   : > { %s6181_s15 = scalar_lea.hbm %s6413_s24, 1024  ;;  %p6187_p3 = scmp.lt.u32.totalorder %s6413_s24, %s7786_s0 }
  0x1d   : > { %p6182_p13 = scmp.ne.s32.totalorder %s6413_s24, %s6181_s15  ;;  %p6188_p4 = scmp.lt.u32.totalorder %s6186_s14, %s6181_s15 }
  0x1e   : > { %p6190_p7 = scmp.lt.u32.totalorder %s6181_s15, %s6413_s24 }
  0x1f   : > { %p6184_p1 = pnand %p6183_p0, %p6182_p13  ;;  %p6189_p5 = por %p6188_p4, %p6187_p3 }
  0x21   : > { %p6185_p2 = pneg %p6184_p1  ;;  %p6191_p8 = por %p6190_p7, %p6189_p5 }
  0x23   : > { %p6192_p9 = pnand %p6191_p8, %p6185_p2 }
  0x25   : > { %6195 = shalt.err (!%p6192_p9)
}
  0x26   : > { %s6196_s12 = scalar_lea.vmem %s6421_s25, 1024  ;;  %s6279_s13 = smov [#allocation2]  }
  0x27   : > { %p6197_p13 = scmp.ne.s32.totalorder %s6421_s25, %s6196_s12  ;;  %s6201_s27 = sshll.u32 %s6279_s13, 4  ;;  %s6202_s27 = int_to_ptr.vmem [resolvable:$false] %s6201_s27 }
  0x28   : > { %s6203_s16 = scalar_lea.vmem %s6202_s27, 2048  ;;  %p6204_p10 = scmp.lt.s32.totalorder %s6421_s25, %s6202_s27 }
  0x29   : > { %p6199_p1 = pnand %p6197_p13, %p6183_p0  ;;  %p6205_p3 = scmp.lt.s32.totalorder %s6203_s16, %s6196_s12 }
  0x2b   : > { %p6200_p11 = pneg %p6199_p1  ;;  %p6206_p4 = por %p6205_p3, %p6204_p10 }
  0x2d   : > { %p6207_p5 = pnand %p6206_p4, %p6200_p11 }
  0x2f   : > { %6210 = shalt.err (!%p6207_p5)
}
  0x30   : > { %s6280_s15 = smov 128   ;;  %s6281_s14 = smov 8  }
  0x31   : > { %5908 = dma.hbm_to_vmem [thread:$0]  (!%p6417_p12), %s6413_s24, 1024, %s6421_s25, %s6423_s19, %s6280_s15, %s6280_s15, %s6281_s14  }
  0x32   : > { %p5123_p0 = scmp.ge.s32.totalorder %s6277_s20, 1  ;;  %p367_p2 = scmp.lt.s32.totalorder %s6277_s20, 5 }
  0x34   : > { %p368_p7 = pnand %p5123_p0, %p367_p2 }
  0x36   : > { %371 = sbr.rel (%p368_p7) target bundleno = 2587 (0xa1b), region = 64 }
  0x3d   : > { %s6454_s22 = sand.u32 1, %s6269_s18  }
  0x3e   : > { %s7774_s12 = sshll.u32 %s6454_s22, 6  ;;  %s374_s13 = scalar_lea.sflag [#allocation3], %s6454_s22 }
  0x3f   : > { %s6460_s27 = scalar_lea.vmem [#allocation2], %s7774_s12 }
  0x40   : > { %6256 = dma.done.wait (%p6394_p6), %s374_s13, 1024  }
  0x41   : > { %6258 = vsyncadd (%p6394_p6), %s374_s13, 4294966272  ;;  %v6282_v0 = vmov 0   ;;  %s5126_s19 = sshll.u32 %s6372_s21, 3  ;;  %v5957_v1 = vld [vmem:[%s7762_s2 + $0x4] ss:$12 sps:$4 sm:$0xff]   ;;  %vm494_vm0 = vcmask 1043456  }
  0x42   : > { %719 = vmatprep.mubr.bf16.mxu0 %v6282_v0  ;;  %p423_p10 = scmp.lt.s32.totalorder %s5126_s19, 31  ;;  %v5959_v2 = vld [vmem:[%s7762_s2] ss:$12 sps:$4 sm:$0xff]   ;;  %687 = vmatprep.subr.bf16.mxu0 %v5957_v1  ;;  %v5960_v3 = vld [vmem:[%s7762_s2 + $0x1c] ss:$12 sps:$4 sm:$0xff]   ;;  %v432_v32 = vld [vmem:[%s6460_s27 + $0x10] sm:$0xff] }
  0x43   : > { %688 = vmatpush1.bf16.msra.mxu0 %v5959_v2  ;;  %v5962_v4 = vld [vmem:[%s7762_s2 + $0x18] ss:$12 sps:$4 sm:$0xff]   ;;  %v5963_v5 = vld [vmem:[%s7762_s2 + $0x34] ss:$12 sps:$4 sm:$0xff]   ;;  %v5965_v6 = vld [vmem:[%s7762_s2 + $0x30] ss:$12 sps:$4 sm:$0xff]   ;;  %v5262_v33 = vpack.c.bf16 %v432_v32, %v432_v32 }
  0x44   : > { %s7807_s19 = smov (!%p423_p10, %s5126_s19), 31  ;;  %689 = vmatprep.subr.bf16.mxu0 %v5960_v3  ;;  %v5966_v7 = vld [vmem:[%s7762_s2 + $0x4c] ss:$12 sps:$4 sm:$0xff]   ;;  %v430_v8 = vld [vmem:[%s6460_s27] sm:$0xff]  ;;  %v5968_v9 = vld [vmem:[%s7762_s2 + $0x48] ss:$12 sps:$4 sm:$0xff]  }
  0x45   : > { %s5127_s24 = sshll.u32 %s7807_s19, 2  ;;  %v5260_v10 = vpack.c.bf16 %v430_v8, %v430_v8  ;;  %v5969_v12 = vld [vmem:[%s7762_s2 + $0x64] ss:$12 sps:$4 sm:$0xff]   ;;  %v5971_v14 = vld [vmem:[%s7762_s2 + $0x60] ss:$12 sps:$4 sm:$0xff]   ;;  %v433_v37 = vld [vmem:[%s6460_s27 + $0x18] sm:$0xff] }
  0x46   : > { %s6492_s14 = scalar_lea.vmem %s7761_s1, %s5127_s24  ;;  %v5972_v15 = vld [vmem:[%s7762_s2 + $0x7c] ss:$12 sps:$4 sm:$0xff]   ;;  %v5974_v16 = vld [vmem:[%s7762_s2 + $0x78] ss:$12 sps:$4 sm:$0xff]   ;;  %v5975_v17 = vld [vmem:[%s7762_s2 + $0x94] ss:$12 sps:$4 sm:$0xff]   ;;  %v5263_v38 = vpack.c.bf16 %v433_v37, %v433_v37 }
  0x47   : > { %690 = vmatpush1.bf16.msra.mxu0 %v5962_v4  ;;  %v5981_v11 = vld [vmem:[%s6492_s14] ss:$0 sps:$4 sm:$0xff]   ;;  %v5989_v18 = vld [vmem:[%s7762_s2 + $0x8] ss:$12 sps:$4 sm:$0xff]   ;;  %v5977_v20 = vld [vmem:[%s7762_s2 + $0x90] ss:$12 sps:$4 sm:$0xff]  }
  0x48   : > { %691 = vmatprep.subr.bf16.mxu0 %v5963_v5  ;;  %v497_v13 = vsel %vm494_vm0, %v5260_v10, %v5981_v11  ;;  %v5990_v19 = vld [vmem:[%s7762_s2 + $0x20] ss:$12 sps:$4 sm:$0xff]   ;;  %5437 = vmatprep.subr.bf16.mxu1 %v5989_v18  ;;  %v5991_v21 = vld [vmem:[%s7762_s2 + $0x38] ss:$12 sps:$4 sm:$0xff]   ;;  %v5980_v23 = vld [vmem:[%s7762_s2 + $0xa8] ss:$12 sps:$4 sm:$0xff]  }
  0x49   : > { %5453 = vmatprep.mubr.bf16.mxu1 %v497_v13  ;;  %5438 = vmatpush3.bf16.msra.mxu1 %v5989_v18  ;;  %v5978_v22 = vld [vmem:[%s7762_s2 + $0xac] ss:$12 sps:$4 sm:$0xff]   ;;  %v5992_v24 = vld [vmem:[%s7762_s2 + $0x50] ss:$12 sps:$4 sm:$0xff]   ;;  %v5993_v25 = vld [vmem:[%s7762_s2 + $0x68] ss:$12 sps:$4 sm:$0xff]  }
  0x4a   : > { %5439 = vmatprep.subr.bf16.mxu1 %v5990_v19  ;;  %v431_v26 = vld [vmem:[%s6460_s27 + $0x8] sm:$0xff]  ;;  %v5982_v27 = vld [vmem:[%s6492_s14 + $0x4] ss:$0 sps:$4 sm:$0xff]   ;;  %v5996_v35 = vld [vmem:[%s7762_s2 + $0xb0] ss:$12 sps:$4 sm:$0xff]   ;;  %v7776_v57 = vmov 0.0  }
  0x4b   : > { %692 = vmatpush1.bf16.msra.mxu0 %v5965_v6  ;;  %v5994_v28 = vld [vmem:[%s7762_s2 + $0x80] ss:$12 sps:$4 sm:$0xff]   ;;  %v5261_v29 = vpack.c.bf16 %v431_v26, %v431_v26  ;;  %v5995_v31 = vld [vmem:[%s7762_s2 + $0x98] ss:$12 sps:$4 sm:$0xff]   ;;  %v5983_v34 = vld [vmem:[%s6492_s14 + $0x8] ss:$0 sps:$4 sm:$0xff]  }
  0x4c   : > { %693 = vmatprep.subr.bf16.mxu0 %v5966_v7  ;;  %v505_v36 = vsel %vm494_vm0, %v5262_v33, %v5983_v34  ;;  %v5984_v39 = vld [vmem:[%s6492_s14 + $0xc] ss:$0 sps:$4 sm:$0xff]   ;;  %v434_v40 = vld [vmem:[%s6460_s27 + $0x20] sm:$0xff]  ;;  %v5985_v43 = vld [vmem:[%s6492_s14 + $0x10] ss:$0 sps:$4 sm:$0xff]   ;;  %vm6284_vm1 = vmmov 0  }
  0x4d   : > { %5440 = vmatpush3.bf16.msra.mxu1 %v5990_v19  ;;  %v501_v30 = vsel %vm494_vm0, %v5261_v29, %v5982_v27  ;;  %v509_v41 = vsel %vm494_vm0, %v5263_v38, %v5984_v39  ;;  %v5264_v42 = vpack.c.bf16 %v434_v40, %v434_v40  ;;  %v435_v45 = vld [vmem:[%s6460_s27 + $0x28] sm:$0xff]  ;;  %v436_v46 = vld [vmem:[%s6460_s27 + $0x30] sm:$0xff]  ;;  %v5987_v50 = vld [vmem:[%s6492_s14 + $0x18] ss:$0 sps:$4 sm:$0xff]   ;;  %vm1113_vm2 = vcmask 261120   ;;  %s6286_s19 = smov 64  }
  0x4e   : > { %5441 = vmatprep.subr.bf16.mxu1 %v5991_v21  ;;  %v5265_v47 = vpack.c.bf16 %v435_v45, %v435_v45  ;;  %v5986_v48 = vld [vmem:[%s6492_s14 + $0x14] ss:$0 sps:$4 sm:$0xff]   ;;  %v5266_v49 = vpack.c.bf16 %v436_v46, %v436_v46  ;;  %v437_v53 = vld [vmem:[%s6460_s27 + $0x38] sm:$0xff]  ;;  %s6287_s13 = smov 32   ;;  %vm2586_vm3 = vcmask 130048   ;;  %vm4451_vm4 = vcmask 523264  }
  0x4f   : > { %694 = vmatpush1.bf16.msra.mxu0 %v5968_v9  ;;  %v513_v44 = vsel %vm494_vm0, %v5264_v42, %v5985_v43  ;;  %v5267_v54 = vpack.c.bf16 %v437_v53, %v437_v53  ;;  %v5988_v55 = vld [vmem:[%s6492_s14 + $0x1c] ss:$0 sps:$4 sm:$0xff]   ;;  %s6285_s14 = smov 96   ;;  %vm4460_vm5 = vcmask 785408   ;;  %s7799_s25 = sshll.u32 %s6454_s22, 6 }
  0x50   : > { %695 = vmatprep.subr.bf16.mxu0 %v5969_v12  ;;  %v517_v51 = vsel %vm494_vm0, %v5265_v47, %v5986_v48  ;;  %v521_v52 = vsel %vm494_vm0, %v5266_v49, %v5987_v50  ;;  %s7696_s16 = scalar_lea.vmem [#allocation5], %s7799_s25  ;;  %s5268_s15 = sshll.u32 %s6372_s21, 10 }
  0x51   : > { %5442 = vmatpush3.bf16.msra.mxu1 %v5991_v21  ;;  %v525_v56 = vsel %vm494_vm0, %v5267_v54, %v5988_v55  ;;  %s5032_s28 = sshll.u32 %s7696_s16, 4  ;;  %p7800_p11 = scmp.ne.s32.totalorder %s7784_s29, 0  ;;  %s7715_s28 = int_to_ptr.vmem [resolvable:$true] %s5032_s28 }
  0x52   : > { %5443 = vmatprep.subr.bf16.mxu1 %v5992_v24  ;;  %s6288_s21 = smov [#allocation5]  }
  0x53   : > { %696 = vmatpush1.bf16.msra.mxu0 %v5971_v14  ;;  %s6215_s26 = sshll.u32 %s6288_s21, 4  ;;  %s6216_s26 = int_to_ptr.vmem [resolvable:$false] %s6215_s26 }
  0x54   : > { %697 = vmatprep.subr.bf16.mxu0 %v5972_v15  ;;  %s6217_s0 = scalar_lea.vmem %s6216_s26, 2048  ;;  %p6218_p9 = scmp.lt.s32.totalorder %s7715_s28, %s6216_s26 }
  0x55   : > { %5444 = vmatpush3.bf16.msra.mxu1 %v5992_v24 }
  0x56   : > { %5445 = vmatprep.subr.bf16.mxu1 %v5993_v25 }
  0x57   : > { %698 = vmatpush1.bf16.msra.mxu0 %v5974_v16 }
  0x58   : > { %699 = vmatprep.subr.bf16.mxu0 %v5975_v17 }
  0x59   : > { %5446 = vmatpush3.bf16.msra.mxu1 %v5993_v25 }
  0x5a   : > { %5447 = vmatprep.subr.bf16.mxu1 %v5994_v28 }
  0x5b   : > { %700 = vmatpush1.bf16.msra.mxu0 %v5977_v20 }
  0x5c   : > { %701 = vmatprep.subr.bf16.mxu0 %v5978_v22 }
  0x5d   : > { %5448 = vmatpush3.bf16.msra.mxu1 %v5994_v28 }
  0x5e   : > { %5449 = vmatprep.subr.bf16.mxu1 %v5995_v31 }
  0x5f   : > { %702 = vmatpush1.bf16.msra.mxu0 %v5980_v23 }
  0x60   : > { %5493 = vmatprep.subr.bf16.mxu0 %v7776_v57 }
  0x61   : > { %5450 = vmatpush3.bf16.msra.mxu1 %v5995_v31 }
  0x62   : > { %720 = vmatmul.mubr.bf16.vlgmr.msra.gmra.mrb[0].mxu0 %v497_v13  ;;  %5451 = vmatprep.subr.bf16.mxu1 %v5996_v35 }
  0x63   : > { %728 = vmatprep.mubr.bf16.mxu0 %v6282_v0 }
  0x65   : > { %5452 = vmatpush3.bf16.msra.mxu1 %v5996_v35 }
  0x66   : > { %5469 = vmatprep.subr.bf16.mxu1 %v7776_v57 }
  0x68   : > { %5454 = vmatmul.mubr.bf16.vlgmr.msra.gmra.mrb[0].mxu1 %v501_v30 }
  0x69   : > { %5457 = vmatprep.mubr.bf16.mxu1 %v505_v36 }
  0x6a   : > { %729 = vmatmul.mubr.bf16.gmra.mrb[4].mxu0 %v501_v30 }
  0x6b   : > { %737 = vmatprep.mubr.bf16.mxu0 %v6282_v0 }
  0x70   : > { %5458 = vmatmul.mubr.bf16.gmra.mrb[4].mxu1 %v509_v41 }
  0x71   : > { %5461 = vmatprep.mubr.bf16.mxu1 %v513_v44 }
  0x72   : > { %738 = vmatmul.mubr.bf16.gmra.mrb[8].mxu0 %v505_v36 }
  0x73   : > { %746 = vmatprep.mubr.bf16.mxu0 %v6282_v0 }
  0x78   : > { %5462 = vmatmul.mubr.bf16.gmra.mrb[8].mxu1 %v517_v51 }
  0x79   : > { %5465 = vmatprep.mubr.bf16.mxu1 %v521_v52 }
  0x7a   : > { %747 = vmatmul.mubr.bf16.gmra.mrb[12].mxu0 %v509_v41 }
  0x7b   : > { %755 = vmatprep.mubr.bf16.mxu0 %v6282_v0 }
  0x80   : > { %5466 = vmatmul.mubr.bf16.gmra.mrb[12].mxu1 %v525_v56 }
  0x81   : > { %5471 = vmatprep.mubr.msk.bf16.mxu1 %vm6284_vm1, %v7776_v57 }
  0x82   : > { %756 = vmatmul.mubr.bf16.gmra.mrb[16].mxu0 %v513_v44 }
  0x83   : > { %764 = vmatprep.mubr.bf16.mxu0 %v6282_v0 }
  0x8a   : > { %765 = vmatmul.mubr.bf16.gmra.mrb[20].mxu0 %v517_v51 }
  0x8b   : > { %773 = vmatprep.mubr.bf16.mxu0 %v6282_v0 }
  0x92   : > { %774 = vmatmul.mubr.bf16.gmra.mrb[24].mxu0 %v521_v52 }
  0x93   : > { %782 = vmatprep.mubr.bf16.mxu0 %v6282_v0 }
  0x9a   : > { %783 = vmatmul.mubr.bf16.gmra.mrb[28].mxu0 %v525_v56 }
  0x9b   : > { %5495 = vmatprep.mubr.msk.bf16.mxu0 %vm6284_vm1, %v7776_v57 }
 0x135   : > { %v721_v58 = vpop.f32.mrb[0].mxu0 }
 0x136   : > { %v889_v59 = vmul.f32 0.17677669, %v721_v58  ;;  %v723_v60 = vpop.f32.mrb[1].mxu0 }
 0x137   : > { %v725_v61 = vpop.f32.mrb[2].mxu0 }
 0x138   : > { %v6582_v62 = vpack.c.bf16 %v889_v59, %v889_v59  ;;  %v726_v63 = vpop.f32.mrb[3].mxu0 }
 0x139   : > { %v6584_v0 = vpack.c.bf16 %v726_v63, %v723_v60 }
 0x13a   : > { %929 = vrot.lane.b32.xlu1 %v6582_v62, %s6285_s14 }
 0x13b   : > { %985 = vrot.lane.b32.xlu0 %v6584_v0, %s6285_s14  ;;  %v1118_v1 = vsel %vm1113_vm2, %v6584_v0, 0  ;;  %v5455_v14 = vpop.f32.mrb[0].mxu1 }
 0x13c   : > { %5470 = vmatpush3.bf16.xpose.msra.mxu1 %v1118_v1  ;;  %v826_v17 = vpop.f32.mrb[1].mxu1 }
 0x13d   : > { %v730_v2 = vpop.f32.mrb[4].mxu0  ;;  %5475 = vmatprep.subr.bf16.mxu1 %v7776_v57  ;;  %v5456_v18 = vpop.f32.mrb[2].mxu1 }
 0x13e   : > { %v890_v3 = vmul.f32 0.17677669, %v730_v2  ;;  %v732_v4 = vpop.f32.mrb[5].mxu0  ;;  %v6616_v20 = vpack.c.bf16 %v5456_v18, %v5455_v14  ;;  %v829_v21 = vpop.f32.mrb[3].mxu1 }
 0x13f   : > { %v734_v5 = vpop.f32.mrb[6].mxu0  ;;  %v6620_v22 = vpack.c.bf16 %v829_v21, %v826_v17 }
 0x140   : > { %v6593_v6 = vpack.c.bf16 %v890_v3, %v890_v3  ;;  %v735_v7 = vpop.f32.mrb[7].mxu0 }
 0x141   : > { %v6595_v8 = vpack.c.bf16 %v735_v7, %v732_v4 }
 0x142   : > { %931 = vrot.lane.b32.xlu1 %v6593_v6, %s6285_s14 }
 0x143   : > { %5472 = vmatmul.mubr.msk.bf16.vlgmr.msra.gmra.mrb[16].mxu1 %vm1113_vm2, %v6582_v62  ;;  %987 = vrot.lane.b32.xlu0 %v6595_v8, %s6285_s14  ;;  %v1164_v9 = vsel %vm1113_vm2, %v6595_v8, 0  ;;  %v5459_v28 = vpop.f32.mrb[4].mxu1 }
 0x144   : > { %5476 = vmatpush3.bf16.xpose.msra.mxu1 %v1164_v9  ;;  %5477 = vmatprep.mubr.msk.bf16.mxu1 %vm6284_vm1, %v7776_v57  ;;  %v842_v31 = vpop.f32.mrb[5].mxu1 }
 0x145   : > { %v739_v10 = vpop.f32.mrb[8].mxu0  ;;  %5481 = vmatprep.subr.bf16.mxu1 %v7776_v57  ;;  %v5460_v32 = vpop.f32.mrb[6].mxu1 }
 0x146   : > { %v741_v11 = vpop.f32.mrb[9].mxu0  ;;  %v891_v15 = vmul.f32 0.17677669, %v739_v10  ;;  %v6635_v34 = vpack.c.bf16 %v5460_v32, %v5459_v28  ;;  %v845_v35 = vpop.f32.mrb[7].mxu1 }
 0x147   : > { %v743_v12 = vpop.f32.mrb[10].mxu0  ;;  %v6639_v36 = vpack.c.bf16 %v845_v35, %v842_v31 }
 0x148   : > { %v744_v13 = vpop.f32.mrb[11].mxu0  ;;  %v6622_v23 = vpack.c.bf16 %v891_v15, %v891_v15 }
 0x149   : > { %v6608_v16 = vpack.c.bf16 %v744_v13, %v741_v11 }
 0x14b   : > { %5478 = vmatmul.mubr.msk.bf16.vlgmr.msra.gmra.mrb[20].mxu1 %vm1113_vm2, %v6593_v6  ;;  %989 = vrot.lane.b32.xlu0 %v6608_v16, %s6285_s14  ;;  %v1210_v19 = vsel %vm1113_vm2, %v6608_v16, 0  ;;  %v5463_v42 = vpop.f32.mrb[8].mxu1 }
 0x14c   : > { %5482 = vmatpush3.bf16.xpose.msra.mxu1 %v1210_v19  ;;  %5483 = vmatprep.mubr.msk.bf16.mxu1 %vm6284_vm1, %v7776_v57  ;;  %v858_v45 = vpop.f32.mrb[9].mxu1 }
 0x14d   : > { %v748_v24 = vpop.f32.mrb[12].mxu0  ;;  %5487 = vmatprep.subr.bf16.mxu1 %v7776_v57  ;;  %v5464_v46 = vpop.f32.mrb[10].mxu1 }
 0x14e   : > { %v750_v25 = vpop.f32.mrb[13].mxu0  ;;  %v892_v29 = vmul.f32 0.17677669, %v748_v24  ;;  %v6654_v48 = vpack.c.bf16 %v5464_v46, %v5463_v42  ;;  %v861_v49 = vpop.f32.mrb[11].mxu1 }
 0x14f   : > { %v752_v26 = vpop.f32.mrb[14].mxu0  ;;  %933 = vrot.lane.b32.xlu0 %v6622_v23, %s6285_s14  ;;  %v6658_v50 = vpack.c.bf16 %v861_v49, %v858_v45 }
 0x150   : > { %v753_v27 = vpop.f32.mrb[15].mxu0  ;;  %v6641_v37 = vpack.c.bf16 %v892_v29, %v892_v29 }
 0x151   : > { %v6627_v30 = vpack.c.bf16 %v753_v27, %v750_v25 }
 0x153   : > { %5484 = vmatmul.mubr.msk.bf16.vlgmr.msra.gmra.mrb[24].mxu1 %vm1113_vm2, %v6622_v23  ;;  %991 = vrot.lane.b32.xlu1 %v6627_v30, %s6285_s14  ;;  %v1256_v33 = vsel %vm1113_vm2, %v6627_v30, 0  ;;  %v5467_v56 = vpop.f32.mrb[12].mxu1 }
 0x154   : > { %5488 = vmatpush3.bf16.xpose.msra.mxu1 %v1256_v33  ;;  %5489 = vmatprep.mubr.msk.bf16.mxu1 %vm6284_vm1, %v7776_v57  ;;  %v874_v60 = vpop.f32.mrb[13].mxu1 }
 0x155   : > { %v757_v38 = vpop.f32.mrb[16].mxu0  ;;  %5499 = vmatprep.subr.bf16.mxu1 %v7776_v57  ;;  %v5468_v61 = vpop.f32.mrb[14].mxu1 }
 0x156   : > { %v759_v39 = vpop.f32.mrb[17].mxu0  ;;  %v893_v43 = vmul.f32 0.17677669, %v757_v38  ;;  %v6673_v1 = vpack.c.bf16 %v5468_v61, %v5467_v56  ;;  %v877_v2 = vpop.f32.mrb[15].mxu1 }
 0x157   : > { %v761_v40 = vpop.f32.mrb[18].mxu0  ;;  %935 = vrot.lane.b32.xlu1 %v6641_v37, %s6285_s14  ;;  %v6677_v3 = vpack.c.bf16 %v877_v2, %v874_v60 }
 0x158   : > { %v762_v41 = vpop.f32.mrb[19].mxu0  ;;  %v6660_v51 = vpack.c.bf16 %v893_v43, %v893_v43 }
 0x159   : > { %v6646_v44 = vpack.c.bf16 %v762_v41, %v759_v39 }
 0x15b   : > { %5490 = vmatmul.mubr.msk.bf16.vlgmr.msra.gmra.mrb[28].mxu1 %vm1113_vm2, %v6641_v37  ;;  %993 = vrot.lane.b32.xlu0 %v6646_v44, %s6285_s14  ;;  %v1302_v47 = vsel %vm1113_vm2, %v6646_v44, 0 }
 0x15c   : > { %5494 = vmatpush3.bf16.xpose.msra.mxu0 %v1302_v47  ;;  %5501 = vmatprep.mubr.msk.bf16.mxu1 %vm6284_vm1, %v7776_v57 }
 0x15d   : > { %v766_v52 = vpop.f32.mrb[20].mxu0  ;;  %5505 = vmatprep.subr.bf16.mxu0 %v7776_v57 }
 0x15e   : > { %v768_v53 = vpop.f32.mrb[21].mxu0  ;;  %v894_v58 = vmul.f32 0.17677669, %v766_v52 }
 0x15f   : > { %v770_v54 = vpop.f32.mrb[22].mxu0  ;;  %937 = vrot.lane.b32.xlu0 %v6660_v51, %s6285_s14 }
 0x160   : > { %v771_v55 = vpop.f32.mrb[23].mxu0  ;;  %v6679_v4 = vpack.c.bf16 %v894_v58, %v894_v58 }
 0x161   : > { %v6665_v59 = vpack.c.bf16 %v771_v55, %v768_v53 }
 0x163   : > { %5496 = vmatmul.mubr.msk.bf16.vlgmr.msra.gmra.mrb[32].mxu0 %vm1113_vm2, %v6660_v51  ;;  %995 = vrot.lane.b32.xlu1 %v6665_v59, %s6285_s14  ;;  %v1348_v63 = vsel %vm1113_vm2, %v6665_v59, 0 }
 0x164   : > { %5500 = vmatpush3.bf16.xpose.msra.mxu1 %v1348_v63  ;;  %5507 = vmatprep.mubr.msk.bf16.mxu0 %vm6284_vm1, %v7776_v57 }
 0x165   : > { %v775_v5 = vpop.f32.mrb[24].mxu0  ;;  %5511 = vmatprep.subr.bf16.mxu1 %v7776_v57 }
 0x166   : > { %v777_v7 = vpop.f32.mrb[25].mxu0  ;;  %v895_v11 = vmul.f32 0.17677669, %v775_v5 }
 0x167   : > { %v779_v9 = vpop.f32.mrb[26].mxu0  ;;  %939 = vrot.lane.b32.xlu1 %v6679_v4, %s6285_s14 }
 0x168   : > { %v780_v10 = vpop.f32.mrb[27].mxu0  ;;  %v903_v14 = vpack.c.bf16 %v895_v11, %v895_v11 }
 0x169   : > { %v911_v12 = vpack.c.bf16 %v780_v10, %v777_v7 }
 0x16b   : > { %5502 = vmatmul.mubr.msk.bf16.vlgmr.msra.gmra.mrb[32].mxu1 %vm1113_vm2, %v6679_v4  ;;  %997 = vrot.lane.b32.xlu0 %v911_v12, %s6285_s14  ;;  %v1394_v13 = vsel %vm1113_vm2, %v911_v12, 0 }
 0x16c   : > { %5506 = vmatpush3.bf16.xpose.msra.mxu0 %v1394_v13  ;;  %5513 = vmatprep.mubr.msk.bf16.mxu1 %vm6284_vm1, %v7776_v57 }
 0x16d   : > { %v784_v15 = vpop.f32.mrb[28].mxu0  ;;  %5517 = vmatprep.subr.bf16.mxu0 %v7776_v57 }
 0x16e   : > { %v786_v17 = vpop.f32.mrb[29].mxu0  ;;  %v896_v24 = vmul.f32 0.17677669, %v784_v15 }
 0x16f   : > { %941 = vrot.lane.b32.xlu0 %v903_v14, %s6285_s14  ;;  %v788_v18 = vpop.f32.mrb[30].mxu0 }
 0x170   : > { %v789_v19 = vpop.f32.mrb[31].mxu0  ;;  %v904_v26 = vpack.c.bf16 %v896_v24, %v896_v24 }
 0x171   : > { %v912_v21 = vpack.c.bf16 %v789_v19, %v786_v17 }
 0x173   : > { %1001 = vrot.lane.b32.xlu0 %v6584_v0, %s6286_s19  ;;  %5508 = vmatmul.mubr.msk.bf16.vlgmr.msra.gmra.mrb[36].mxu0 %vm1113_vm2, %v903_v14  ;;  %v1440_v25 = vsel %vm1113_vm2, %v912_v21, 0 }
 0x174   : > { %999 = vrot.lane.b32.xlu1 %v912_v21, %s6285_s14  ;;  %5512 = vmatpush3.bf16.xpose.msra.mxu1 %v1440_v25 }
 0x175   : > { %5519 = vmatprep.mubr.msk.bf16.mxu0 %vm6284_vm1, %v7776_v57  ;;  %5523 = vmatprep.subr.bf16.mxu1 %v7776_v57 }
 0x177   : > { %945 = vrot.lane.b32.xlu0 %v6582_v62, %s6286_s19 }
 0x178   : > { %943 = vrot.lane.b32.xlu1 %v904_v26, %s6285_s14 }
 0x17b   : > { %1005 = vrot.lane.b32.xlu0 %v6608_v16, %s6286_s19  ;;  %5514 = vmatmul.mubr.msk.bf16.vlgmr.msra.gmra.mrb[36].mxu1 %vm1113_vm2, %v904_v26 }
 0x17c   : > { %1003 = vrot.lane.b32.xlu1 %v6595_v8, %s6286_s19  ;;  %5525 = vmatprep.mubr.msk.bf16.mxu1 %vm6284_vm1, %v7776_v57 }
 0x17f   : > { %949 = vrot.lane.b32.xlu0 %v6622_v23, %s6286_s19 }
 0x180   : > { %947 = vrot.lane.b32.xlu1 %v6593_v6, %s6286_s19 }
 0x183   : > { %1009 = vrot.lane.b32.xlu0 %v6646_v44, %s6286_s19 }
 0x184   : > { %1007 = vrot.lane.b32.xlu1 %v6627_v30, %s6286_s19 }
 0x187   : > { %953 = vrot.lane.b32.xlu0 %v6660_v51, %s6286_s19 }
 0x188   : > { %951 = vrot.lane.b32.xlu1 %v6641_v37, %s6286_s19 }
 0x18b   : > { %1013 = vrot.lane.b32.xlu0 %v911_v12, %s6286_s19 }
 0x18c   : > { %1011 = vrot.lane.b32.xlu1 %v6665_v59, %s6286_s19 }
 0x18f   : > { %957 = vrot.lane.b32.xlu0 %v903_v14, %s6286_s19 }
 0x190   : > { %955 = vrot.lane.b32.xlu1 %v6679_v4, %s6286_s19 }
 0x193   : > { %1017 = vrot.lane.b32.xlu0 %v6584_v0, %s6287_s13 }
 0x194   : > { %1015 = vrot.lane.b32.xlu1 %v912_v21, %s6286_s19 }
 0x197   : > { %961 = vrot.lane.b32.xlu0 %v6582_v62, %s6287_s13 }
 0x198   : > { %959 = vrot.lane.b32.xlu1 %v904_v26, %s6286_s19 }
 0x19b   : > { %1021 = vrot.lane.b32.xlu0 %v6608_v16, %s6287_s13 }
 0x19c   : > { %1019 = vrot.lane.b32.xlu1 %v6595_v8, %s6287_s13 }
 0x19f   : > { %965 = vrot.lane.b32.xlu0 %v6622_v23, %s6287_s13 }
 0x1a0   : > { %963 = vrot.lane.b32.xlu1 %v6593_v6, %s6287_s13 }
 0x1a3   : > { %1025 = vrot.lane.b32.xlu0 %v6646_v44, %s6287_s13 }
 0x1a4   : > { %1023 = vrot.lane.b32.xlu1 %v6627_v30, %s6287_s13 }
 0x1a7   : > { %969 = vrot.lane.b32.xlu0 %v6660_v51, %s6287_s13 }
 0x1a8   : > { %967 = vrot.lane.b32.xlu1 %v6641_v37, %s6287_s13 }
 0x1ab   : > { %1029 = vrot.lane.b32.xlu0 %v911_v12, %s6287_s13 }
 0x1ac   : > { %1027 = vrot.lane.b32.xlu1 %v6665_v59, %s6287_s13  ;;  %v930_v6 = vpop.permute.xlu1 %929 }
 0x1ad   : > { %v986_v62 = vpop.permute.xlu0 %985 }
 0x1ae   : > { %v1486_v0 = vsel %vm1113_vm2, %v986_v62, 0 }
 0x1af   : > { %973 = vrot.lane.b32.xlu0 %v903_v14, %s6287_s13  ;;  %5518 = vmatpush3.bf16.xpose.msra.mxu0 %v1486_v0 }
 0x1b0   : > { %971 = vrot.lane.b32.xlu1 %v6679_v4, %s6287_s13  ;;  %5529 = vmatprep.subr.bf16.mxu0 %v7776_v57 }
 0x1b3   : > { %1043 = vrot.lane.b32.xlu0 %v6616_v20, %s6285_s14 }
 0x1b4   : > { %1031 = vrot.lane.b32.xlu1 %v912_v21, %s6287_s13  ;;  %v932_v23 = vpop.permute.xlu1 %931 }
 0x1b5   : > { %v988_v8 = vpop.permute.xlu0 %987 }
 0x1b6   : > { %v1532_v16 = vsel %vm1113_vm2, %v988_v8, 0  ;;  %5520 = vmatmul.mubr.msk.bf16.vlgmr.msra.gmra.mrb[40].mxu0 %vm1113_vm2, %v930_v6 }
 0x1b7   : > { %5524 = vmatpush3.bf16.xpose.msra.mxu1 %v1532_v16  ;;  %5531 = vmatprep.mubr.msk.bf16.mxu0 %vm6284_vm1, %v7776_v57 }
 0x1b8   : > { %975 = vrot.lane.b32.xlu1 %v904_v26, %s6287_s13  ;;  %5535 = vmatprep.subr.bf16.mxu1 %v7776_v57 }
 0x1b9   : > { %1047 = vrot.lane.b32.xlu0 %v6635_v34, %s6285_s14 }
 0x1bc   : > { %1041 = vrot.lane.b32.xlu1 %v6620_v22, %s6285_s14 }
 0x1bd   : > { %v990_v27 = vpop.permute.xlu0 %989  ;;  %1051 = vrot.lane.b32.xlu0 %v6654_v48, %s6285_s14 }
 0x1be   : > { %v1578_v28 = vsel %vm1113_vm2, %v990_v27, 0  ;;  %5526 = vmatmul.mubr.msk.bf16.vlgmr.msra.gmra.mrb[40].mxu1 %vm1113_vm2, %v932_v23 }
 0x1bf   : > { %5530 = vmatpush3.bf16.xpose.msra.mxu0 %v1578_v28  ;;  %5537 = vmatprep.mubr.msk.bf16.mxu1 %vm6284_vm1, %v7776_v57 }
 0x1c0   : > { %5541 = vmatprep.subr.bf16.mxu0 %v7776_v57  ;;  %1045 = vrot.lane.b32.xlu1 %v6639_v36, %s6285_s14 }
 0x1c1   : > { %1055 = vrot.lane.b32.xlu0 %v6673_v1, %s6285_s14  ;;  %v934_v29 = vpop.permute.xlu0 %933 }
 0x1c4   : > { %1049 = vrot.lane.b32.xlu1 %v6658_v50, %s6285_s14 }
 0x1c5   : > { %v992_v30 = vpop.permute.xlu1 %991  ;;  %1067 = vrot.lane.b32.xlu0 %v6616_v20, %s6286_s19 }
 0x1c6   : > { %v1624_v31 = vsel %vm1113_vm2, %v992_v30, 0  ;;  %5532 = vmatmul.mubr.msk.bf16.vlgmr.msra.gmra.mrb[44].mxu0 %vm1113_vm2, %v934_v29 }
 0x1c7   : > { %5536 = vmatpush3.bf16.xpose.msra.mxu1 %v1624_v31  ;;  %5543 = vmatprep.mubr.msk.bf16.mxu0 %vm6284_vm1, %v7776_v57 }
 0x1c8   : > { %1053 = vrot.lane.b32.xlu1 %v6677_v3, %s6285_s14  ;;  %5547 = vmatprep.subr.bf16.mxu1 %v7776_v57 }
 0x1c9   : > { %1071 = vrot.lane.b32.xlu0 %v6635_v34, %s6286_s19  ;;  %v936_v32 = vpop.permute.xlu1 %935 }
 0x1cc   : > { %1065 = vrot.lane.b32.xlu1 %v6620_v22, %s6286_s19 }
 0x1cd   : > { %v994_v33 = vpop.permute.xlu0 %993  ;;  %1075 = vrot.lane.b32.xlu0 %v6654_v48, %s6286_s19 }
 0x1ce   : > { %v1670_v35 = vsel %vm1113_vm2, %v994_v33, 0  ;;  %5538 = vmatmul.mubr.msk.bf16.vlgmr.msra.gmra.mrb[44].mxu1 %vm1113_vm2, %v936_v32 }
 0x1cf   : > { %5542 = vmatpush3.bf16.xpose.msra.mxu0 %v1670_v35  ;;  %5549 = vmatprep.mubr.msk.bf16.mxu1 %vm6284_vm1, %v7776_v57 }
 0x1d0   : > { %5553 = vmatprep.subr.bf16.mxu0 %v7776_v57  ;;  %1069 = vrot.lane.b32.xlu1 %v6639_v36, %s6286_s19 }
 0x1d1   : > { %1079 = vrot.lane.b32.xlu0 %v6673_v1, %s6286_s19  ;;  %v938_v37 = vpop.permute.xlu0 %937 }
 0x1d4   : > { %1073 = vrot.lane.b32.xlu1 %v6658_v50, %s6286_s19 }
 0x1d5   : > { %v996_v38 = vpop.permute.xlu1 %995 }
 0x1d6   : > { %v1716_v39 = vsel %vm1113_vm2, %v996_v38, 0  ;;  %5544 = vmatmul.mubr.msk.bf16.vlgmr.msra.gmra.mrb[48].mxu0 %vm1113_vm2, %v938_v37 }
 0x1d7   : > { %5548 = vmatpush3.bf16.xpose.msra.mxu1 %v1716_v39  ;;  %5555 = vmatprep.mubr.msk.bf16.mxu0 %vm6284_vm1, %v7776_v57 }
 0x1d8   : > { %1077 = vrot.lane.b32.xlu1 %v6677_v3, %s6286_s19  ;;  %5559 = vmatprep.subr.bf16.mxu1 %v7776_v57 }
 0x1d9   : > { %v940_v40 = vpop.permute.xlu1 %939 }
 0x1dc   : > { %1089 = vrot.lane.b32.xlu1 %v6620_v22, %s6287_s13 }
 0x1dd   : > { %v998_v41 = vpop.permute.xlu0 %997 }
 0x1de   : > { %v1762_v42 = vsel %vm1113_vm2, %v998_v41, 0  ;;  %5550 = vmatmul.mubr.msk.bf16.vlgmr.msra.gmra.mrb[48].mxu1 %vm1113_vm2, %v940_v40 }
 0x1df   : > { %5554 = vmatpush3.bf16.xpose.msra.mxu0 %v1762_v42  ;;  %5561 = vmatprep.mubr.msk.bf16.mxu1 %vm6284_vm1, %v7776_v57 }
 0x1e0   : > { %5565 = vmatprep.subr.bf16.mxu0 %v7776_v57 }
 0x1e1   : > { %v942_v43 = vpop.permute.xlu0 %941 }
 0x1e5   : > { %v1002_v44 = vpop.permute.xlu0 %1001 }
 0x1e6   : > { %v1854_v45 = vsel %vm1113_vm2, %v1002_v44, 0  ;;  %v1000_v46 = vpop.permute.xlu1 %999  ;;  %5556 = vmatmul.mubr.msk.bf16.vlgmr.msra.gmra.mrb[52].mxu0 %vm1113_vm2, %v942_v43 }
 0x1e7   : > { %v1808_v47 = vsel %vm1113_vm2, %v1000_v46, 0  ;;  %5566 = vmatpush3.bf16.xpose.msra.mxu0 %v1854_v45  ;;  %5567 = vmatprep.mubr.msk.bf16.mxu0 %vm6284_vm1, %v7776_v57 }
 0x1e8   : > { %5560 = vmatpush3.bf16.xpose.msra.mxu1 %v1808_v47  ;;  %5577 = vmatprep.subr.bf16.mxu0 %v7776_v57 }
 0x1e9   : > { %v946_v49 = vpop.permute.xlu0 %945  ;;  %5571 = vmatprep.subr.bf16.mxu1 %v7776_v57 }
 0x1ea   : > { %v944_v51 = vpop.permute.xlu1 %943 }
 0x1ed   : > { %v1006_v52 = vpop.permute.xlu0 %1005 }
 0x1ee   : > { %v1946_v53 = vsel %vm1113_vm2, %v1006_v52, 0  ;;  %v1004_v54 = vpop.permute.xlu1 %1003  ;;  %5568 = vmatmul.mubr.msk.bf16.vlgmr.msra.gmra.mrb[56].mxu0 %vm1113_vm2, %v946_v49 }
 0x1ef   : > { %v1900_v55 = vsel %vm1113_vm2, %v1004_v54, 0  ;;  %5562 = vmatmul.mubr.msk.bf16.vlgmr.msra.gmra.mrb[52].mxu1 %vm1113_vm2, %v944_v51  ;;  %5578 = vmatpush3.bf16.xpose.msra.mxu0 %v1946_v53 }
 0x1f0   : > { %5572 = vmatpush3.bf16.xpose.msra.mxu1 %v1900_v55  ;;  %5579 = vmatprep.mubr.msk.bf16.mxu0 %vm6284_vm1, %v7776_v57 }
 0x1f1   : > { %v950_v56 = vpop.permute.xlu0 %949  ;;  %5573 = vmatprep.mubr.msk.bf16.mxu1 %vm6284_vm1, %v7776_v57  ;;  %5583 = vmatprep.subr.bf16.mxu1 %v7776_v57 }
 0x1f2   : > { %v948_v58 = vpop.permute.xlu1 %947  ;;  %5589 = vmatprep.subr.bf16.mxu0 %v7776_v57 }
 0x1f5   : > { %v1010_v59 = vpop.permute.xlu0 %1009 }
 0x1f6   : > { %v2038_v60 = vsel %vm1113_vm2, %v1010_v59, 0  ;;  %v1008_v61 = vpop.permute.xlu1 %1007  ;;  %5580 = vmatmul.mubr.msk.bf16.vlgmr.msra.gmra.mrb[60].mxu0 %vm1113_vm2, %v950_v56 }
 0x1f7   : > { %v1992_v63 = vsel %vm1113_vm2, %v1008_v61, 0  ;;  %5574 = vmatmul.mubr.msk.bf16.vlgmr.msra.gmra.mrb[56].mxu1 %vm1113_vm2, %v948_v58  ;;  %5590 = vmatpush3.bf16.xpose.msra.mxu0 %v2038_v60 }
 0x1f8   : > { %5584 = vmatpush3.bf16.xpose.msra.mxu1 %v1992_v63  ;;  %5591 = vmatprep.mubr.msk.bf16.mxu0 %vm6284_vm1, %v7776_v57 }
 0x1f9   : > { %v954_v2 = vpop.permute.xlu0 %953  ;;  %5585 = vmatprep.mubr.msk.bf16.mxu1 %vm6284_vm1, %v7776_v57  ;;  %5595 = vmatprep.subr.bf16.mxu1 %v7776_v57 }
 0x1fa   : > { %v952_v4 = vpop.permute.xlu1 %951  ;;  %5601 = vmatprep.subr.bf16.mxu0 %v7776_v57 }
 0x1fd   : > { %v1014_v5 = vpop.permute.xlu0 %1013 }
 0x1fe   : > { %v2130_v7 = vsel %vm1113_vm2, %v1014_v5, 0  ;;  %v1012_v9 = vpop.permute.xlu1 %1011  ;;  %5592 = vmatmul.mubr.msk.bf16.vlgmr.msra.gmra.mrb[64].mxu0 %vm1113_vm2, %v954_v2 }
 0x1ff   : > { %v2084_v10 = vsel %vm1113_vm2, %v1012_v9, 0  ;;  %5586 = vmatmul.mubr.msk.bf16.vlgmr.msra.gmra.mrb[60].mxu1 %vm1113_vm2, %v952_v4  ;;  %5602 = vmatpush3.bf16.xpose.msra.mxu0 %v2130_v7 }
 0x200   : > { %5596 = vmatpush3.bf16.xpose.msra.mxu1 %v2084_v10  ;;  %5603 = vmatprep.mubr.msk.bf16.mxu0 %vm6284_vm1, %v7776_v57 }
 0x201   : > { %v958_v11 = vpop.permute.xlu0 %957  ;;  %5597 = vmatprep.mubr.msk.bf16.mxu1 %vm6284_vm1, %v7776_v57  ;;  %5607 = vmatprep.subr.bf16.mxu1 %v7776_v57 }
 0x202   : > { %v956_v12 = vpop.permute.xlu1 %955  ;;  %5613 = vmatprep.subr.bf16.mxu0 %v7776_v57 }
 0x205   : > { %v1018_v13 = vpop.permute.xlu0 %1017 }
 0x206   : > { %v2222_v14 = vsel %vm1113_vm2, %v1018_v13, 0  ;;  %v1016_v15 = vpop.permute.xlu1 %1015  ;;  %5604 = vmatmul.mubr.msk.bf16.vlgmr.msra.gmra.mrb[68].mxu0 %vm1113_vm2, %v958_v11 }
 0x207   : > { %v2176_v17 = vsel %vm1113_vm2, %v1016_v15, 0  ;;  %5598 = vmatmul.mubr.msk.bf16.vlgmr.msra.gmra.mrb[64].mxu1 %vm1113_vm2, %v956_v12  ;;  %5614 = vmatpush3.bf16.xpose.msra.mxu0 %v2222_v14 }
 0x208   : > { %5608 = vmatpush3.bf16.xpose.msra.mxu1 %v2176_v17  ;;  %5615 = vmatprep.mubr.msk.bf16.mxu0 %vm6284_vm1, %v7776_v57 }
 0x209   : > { %v962_v18 = vpop.permute.xlu0 %961  ;;  %5609 = vmatprep.mubr.msk.bf16.mxu1 %vm6284_vm1, %v7776_v57  ;;  %5619 = vmatprep.subr.bf16.mxu1 %v7776_v57 }
 0x20a   : > { %v960_v19 = vpop.permute.xlu1 %959  ;;  %5625 = vmatprep.subr.bf16.mxu0 %v7776_v57 }
 0x20d   : > { %v1022_v21 = vpop.permute.xlu0 %1021 }
 0x20e   : > { %v2314_v24 = vsel %vm1113_vm2, %v1022_v21, 0  ;;  %v1020_v25 = vpop.permute.xlu1 %1019  ;;  %5616 = vmatmul.mubr.msk.bf16.vlgmr.msra.gmra.mrb[72].mxu0 %vm1113_vm2, %v962_v18 }
 0x20f   : > { %v2268_v26 = vsel %vm1113_vm2, %v1020_v25, 0  ;;  %5610 = vmatmul.mubr.msk.bf16.vlgmr.msra.gmra.mrb[68].mxu1 %vm1113_vm2, %v960_v19  ;;  %5626 = vmatpush3.bf16.xpose.msra.mxu0 %v2314_v24 }
 0x210   : > { %5620 = vmatpush3.bf16.xpose.msra.mxu1 %v2268_v26  ;;  %5627 = vmatprep.mubr.msk.bf16.mxu0 %vm6284_vm1, %v7776_v57 }
 0x211   : > { %v966_v62 = vpop.permute.xlu0 %965  ;;  %5621 = vmatprep.mubr.msk.bf16.mxu1 %vm6284_vm1, %v7776_v57  ;;  %5631 = vmatprep.subr.bf16.mxu1 %v7776_v57 }
 0x212   : > { %v964_v0 = vpop.permute.xlu1 %963  ;;  %5637 = vmatprep.subr.bf16.mxu0 %v7776_v57 }
 0x215   : > { %v1026_v6 = vpop.permute.xlu0 %1025 }
 0x216   : > { %v2406_v8 = vsel %vm1113_vm2, %v1026_v6, 0  ;;  %v1024_v16 = vpop.permute.xlu1 %1023  ;;  %v6882_v23 = vpop.f32.mrb[16].mxu1  ;;  %5628 = vmatmul.mubr.msk.bf16.vlgmr.msra.gmra.mrb[76].mxu0 %vm1113_vm2, %v966_v62 }
 0x217   : > { %v2360_v27 = vsel %vm1113_vm2, %v1024_v16, 0  ;;  %5622 = vmatmul.mubr.msk.bf16.vlgmr.msra.gmra.mrb[72].mxu1 %vm1113_vm2, %v964_v0  ;;  %v5473_v28 = vpop.f32.mrb[17].mxu1  ;;  %5638 = vmatpush3.bf16.xpose.msra.mxu0 %v2406_v8  ;;  %v2587_v29 = vsel %vm2586_vm3, %v6882_v23, -inf }
 0x218   : > { %5632 = vmatpush3.bf16.xpose.msra.mxu1 %v2360_v27  ;;  %v1157_v30 = vpop.f32.mrb[18].mxu1  ;;  %2588 = vmax.xlane.f32.xlu0 %v2587_v29 }
 0x219   : > { %v5474_v31 = vpop.f32.mrb[19].mxu1  ;;  %v970_v32 = vpop.permute.xlu0 %969  ;;  %5639 = vmatprep.mubr.msk.bf16.mxu0 %vm6284_vm1, %v7776_v57  ;;  %5633 = vmatprep.mubr.msk.bf16.mxu1 %vm6284_vm1, %v7776_v57 }
 0x21a   : > { %v968_v33 = vpop.permute.xlu1 %967  ;;  %5643 = vmatprep.subr.bf16.mxu1 %v7776_v57  ;;  %5649 = vmatprep.subr.bf16.mxu0 %v7776_v57 }
 0x21d   : > { %v1030_v35 = vpop.permute.xlu0 %1029 }
 0x21e   : > { %v2498_v37 = vsel %vm1113_vm2, %v1030_v35, 0  ;;  %v1028_v38 = vpop.permute.xlu1 %1027  ;;  %v6896_v39 = vpop.f32.mrb[20].mxu1  ;;  %5640 = vmatmul.mubr.msk.bf16.vlgmr.msra.gmra.mrb[80].mxu0 %vm1113_vm2, %v970_v32 }
 0x21f   : > { %v2452_v40 = vsel %vm1113_vm2, %v1028_v38, 0  ;;  %5634 = vmatmul.mubr.msk.bf16.vlgmr.msra.gmra.mrb[76].mxu1 %vm1113_vm2, %v968_v33  ;;  %5650 = vmatpush3.bf16.xpose.msra.mxu0 %v2498_v37  ;;  %v2590_v41 = vsel %vm2586_vm3, %v6896_v39, -inf  ;;  %v5479_v42 = vpop.f32.mrb[21].mxu1 }
 0x220   : > { %5644 = vmatpush3.bf16.xpose.msra.mxu1 %v2452_v40  ;;  %2591 = vmax.xlane.f32.xlu1 %v2590_v41  ;;  %v1203_v43 = vpop.f32.mrb[22].mxu1 }
 0x221   : > { %v5480_v44 = vpop.f32.mrb[23].mxu1  ;;  %5651 = vmatprep.mubr.msk.bf16.mxu0 %vm6284_vm1, %v7776_v57  ;;  %5645 = vmatprep.mubr.msk.bf16.mxu1 %vm6284_vm1, %v7776_v57  ;;  %v974_v46 = vpop.permute.xlu0 %973 }
 0x222   : > { %v972_v45 = vpop.permute.xlu1 %971  ;;  %5655 = vmatprep.subr.bf16.mxu1 %v7776_v57  ;;  %5661 = vmatprep.subr.bf16.mxu0 %v7776_v57 }
 0x225   : > { %v6950_v6 = vpop.permute.xlu0 %1043 }
 0x226   : > { %v1032_v47 = vpop.permute.xlu1 %1031  ;;  %v6909_v49 = vpop.f32.mrb[24].mxu1  ;;  %5652 = vmatmul.mubr.msk.bf16.vlgmr.msra.gmra.mrb[84].mxu0 %vm1113_vm2, %v974_v46 }
 0x227   : > { %v2544_v51 = vsel %vm1113_vm2, %v1032_v47, 0  ;;  %5646 = vmatmul.mubr.msk.bf16.vlgmr.msra.gmra.mrb[80].mxu1 %vm1113_vm2, %v972_v45  ;;  %5662 = vmatpush3.bf16.msra.mxu0 %v6620_v22  ;;  %v2593_v52 = vsel %vm2586_vm3, %v6909_v49, -inf  ;;  %v5485_v53 = vpop.f32.mrb[25].mxu1 }
 0x228   : > { %5656 = vmatpush3.bf16.xpose.msra.mxu1 %v2544_v51  ;;  %2594 = vmax.xlane.f32.xlu0 %v2593_v52  ;;  %v1249_v54 = vpop.f32.mrb[26].mxu1 }
 0x229   : > { %v5486_v55 = vpop.f32.mrb[27].mxu1  ;;  %5657 = vmatprep.mubr.msk.bf16.mxu1 %vm6284_vm1, %v7776_v57  ;;  %5667 = vmatprep.subr.bf16.mxu1 %v7776_v57 }
 0x22a   : > { %5663 = vmatprep.mubr.msk.bf16.mxu0 %vm6284_vm1, %v7776_v57  ;;  %5673 = vmatprep.subr.bf16.mxu0 %v7776_v57  ;;  %v976_v56 = vpop.permute.xlu1 %975 }
 0x22b   : > { %v6954_v16 = vpop.permute.xlu0 %1047 }
 0x22e   : > { %v6923_v22 = vpop.f32.mrb[28].mxu1  ;;  %v6948_v0 = vpop.permute.xlu1 %1041 }
 0x22f   : > { %5658 = vmatmul.mubr.msk.bf16.vlgmr.msra.gmra.mrb[84].mxu1 %vm1113_vm2, %v976_v56  ;;  %v2596_v58 = vsel %vm2586_vm3, %v6923_v22, -inf  ;;  %v5491_v59 = vpop.f32.mrb[29].mxu1  ;;  %v6958_v28 = vpop.permute.xlu0 %1051 }
 0x230   : > { %5668 = vmatpush3.bf16.msra.mxu1 %v6616_v20  ;;  %2597 = vmax.xlane.f32.xlu0 %v2596_v58  ;;  %v1295_v60 = vpop.f32.mrb[30].mxu1 }
 0x231   : > { %v5492_v61 = vpop.f32.mrb[31].mxu1  ;;  %5669 = vmatprep.mubr.msk.bf16.mxu1 %vm6284_vm1, %v7776_v57  ;;  %5679 = vmatprep.subr.bf16.mxu1 %v7776_v57 }
 0x232   : > { %v6952_v8 = vpop.permute.xlu1 %1045 }
 0x233   : > { %v6966_v37 = vpop.permute.xlu0 %1055 }
 0x236   : > { %v6932_v63 = vpop.f32.mrb[32].mxu0  ;;  %v6956_v27 = vpop.permute.xlu1 %1049 }
 0x237   : > { %v2599_v2 = vsel %vm2586_vm3, %v6932_v63, -inf  ;;  %v5497_v4 = vpop.f32.mrb[33].mxu0  ;;  %v6974_v45 = vpop.permute.xlu0 %1067 }
 0x238   : > { %2600 = vmax.xlane.f32.xlu1 %v2599_v2  ;;  %v1341_v5 = vpop.f32.mrb[34].mxu0 }
 0x239   : > { %v5498_v7 = vpop.f32.mrb[35].mxu0 }
 0x23a   : > { %v6964_v32 = vpop.permute.xlu1 %1053 }
 0x23b   : > { %v6978_v47 = vpop.permute.xlu0 %1071 }
 0x23c   : > { %7788 = vst [vmem:[#allocation11_spill] sm:$0xff] %v6978_v47 }
 0x23e   : > { %v6936_v9 = vpop.f32.mrb[32].mxu1  ;;  %v6968_v38 = vpop.permute.xlu1 %1065 }
 0x23f   : > { %v2602_v10 = vsel %vm2586_vm3, %v6936_v9, -inf  ;;  %v5503_v11 = vpop.f32.mrb[33].mxu1  ;;  %v6986_v58 = vpop.permute.xlu0 %1075 }
 0x240   : > { %2603 = vmax.xlane.f32.xlu0 %v2602_v10  ;;  %v1387_v12 = vpop.f32.mrb[34].mxu1  ;;  %7789 = vst [vmem:[#allocation12_spill] sm:$0xff] %v6986_v58 }
 0x241   : > { %v5504_v13 = vpop.f32.mrb[35].mxu1 }
 0x242   : > { %v6976_v46 = vpop.permute.xlu1 %1069 }
 0x243   : > { %v6988_v59 = vpop.permute.xlu0 %1079 }
 0x244   : > { %7790 = vst [vmem:[#allocation13_spill] sm:$0xff] %v6988_v59 }
 0x246   : > { %v6940_v14 = vpop.f32.mrb[36].mxu0  ;;  %v6984_v56 = vpop.permute.xlu1 %1073 }
 0x247   : > { %v2605_v15 = vsel %vm2586_vm3, %v6940_v14, -inf  ;;  %v5509_v17 = vpop.f32.mrb[37].mxu0 }
 0x248   : > { %2606 = vmax.xlane.f32.xlu1 %v2605_v15  ;;  %v1433_v18 = vpop.f32.mrb[38].mxu0 }
 0x249   : > { %v5510_v19 = vpop.f32.mrb[39].mxu0 }
 0x24a   : > { %v6994_v4 = vpop.permute.xlu1 %1077 }
 0x24b   : > { %7791 = vst [vmem:[#allocation14_spill] sm:$0xff] %v6994_v4 }
 0x24e   : > { %v6944_v21 = vpop.f32.mrb[36].mxu1  ;;  %v6997_v13 = vpop.permute.xlu1 %1089 }
 0x24f   : > { %v2608_v24 = vsel %vm2586_vm3, %v6944_v21, -inf  ;;  %v5515_v25 = vpop.f32.mrb[37].mxu1  ;;  %7792 = vst [vmem:[#allocation15_spill] sm:$0xff] %v6997_v13 }
 0x250   : > { %2609 = vmax.xlane.f32.xlu0 %v2608_v24  ;;  %v1479_v26 = vpop.f32.mrb[38].mxu1 }
 0x251   : > { %v5516_v62 = vpop.f32.mrb[39].mxu1 }
 0x289   : > { %v6960_v29 = vpop.f32.mrb[40].mxu0 }
 0x28a   : > { %v5521_v30 = vpop.f32.mrb[41].mxu0  ;;  %v2611_v31 = vsel %vm2586_vm3, %v6960_v29, -inf }
 0x28b   : > { %v1525_v33 = vpop.f32.mrb[42].mxu0  ;;  %2612 = vmax.xlane.f32.xlu1 %v2611_v31 }
 0x28c   : > { %v5522_v35 = vpop.f32.mrb[43].mxu0 }
 0x291   : > { %v6970_v40 = vpop.f32.mrb[40].mxu1 }
 0x292   : > { %v2614_v41 = vsel %vm2586_vm3, %v6970_v40, -inf  ;;  %v5527_v42 = vpop.f32.mrb[41].mxu1 }
 0x293   : > { %2615 = vmax.xlane.f32.xlu0 %v2614_v41  ;;  %v1571_v43 = vpop.f32.mrb[42].mxu1 }
 0x294   : > { %v5528_v44 = vpop.f32.mrb[43].mxu1 }
 0x299   : > { %v6980_v51 = vpop.f32.mrb[44].mxu0 }
 0x29a   : > { %v2617_v52 = vsel %vm2586_vm3, %v6980_v51, -inf  ;;  %v5533_v53 = vpop.f32.mrb[45].mxu0 }
 0x29b   : > { %2618 = vmax.xlane.f32.xlu1 %v2617_v52  ;;  %v1617_v54 = vpop.f32.mrb[46].mxu0 }
 0x29c   : > { %v5534_v55 = vpop.f32.mrb[47].mxu0 }
 0x2a1   : > { %v6990_v60 = vpop.f32.mrb[44].mxu1 }
 0x2a2   : > { %v2620_v61 = vsel %vm2586_vm3, %v6990_v60, -inf  ;;  %v5539_v2 = vpop.f32.mrb[45].mxu1 }
 0x2a3   : > { %2621 = vmax.xlane.f32.xlu0 %v2620_v61  ;;  %v1663_v5 = vpop.f32.mrb[46].mxu1 }
 0x2a4   : > { %v5540_v7 = vpop.f32.mrb[47].mxu1 }
 0x2a5   : > { %v2589_v10 = vpop.xlane.xlu0 %2588 }
 0x2a6   : > { %v2683_v11 = vsub.f32 %v6882_v23, %v2589_v10 }
 0x2a8   : > { %v2715_v12 = vmul.f32 1.442695, %v2683_v11 }
 0x2a9   : > { %v6999_v15 = vpop.f32.mrb[48].mxu0 }
 0x2aa   : > { %6013 = vpow2.f32 %v2715_v12  ;;  %v2623_v17 = vsel %vm2586_vm3, %v6999_v15, -inf  ;;  %v5545_v18 = vpop.f32.mrb[49].mxu0 }
 0x2ab   : > { %2624 = vmax.xlane.f32.xlu1 %v2623_v17  ;;  %v1709_v19 = vpop.f32.mrb[50].mxu0 }
 0x2ac   : > { %v5546_v24 = vpop.f32.mrb[51].mxu0 }
 0x2ad   : > { %v2592_v25 = vpop.xlane.xlu1 %2591 }
 0x2ae   : > { %v2684_v26 = vsub.f32 %v6896_v39, %v2592_v25 }
 0x2b0   : > { %v2717_v62 = vmul.f32 1.442695, %v2684_v26 }
 0x2b1   : > { %v7004_v30 = vpop.f32.mrb[48].mxu1 }
 0x2b2   : > { %6015 = vpow2.f32 %v2717_v62  ;;  %v2626_v23 = vsel %vm2586_vm3, %v7004_v30, -inf  ;;  %v5551_v31 = vpop.f32.mrb[49].mxu1 }
 0x2b3   : > { %2627 = vmax.xlane.f32.xlu0 %v2626_v23  ;;  %v1755_v33 = vpop.f32.mrb[50].mxu1 }
 0x2b4   : > { %v7008_v35 = vpop.eup %6013  ;;  %v5552_v41 = vpop.f32.mrb[51].mxu1 }
 0x2b5   : > { %v2595_v42 = vpop.xlane.xlu0 %2594  ;;  %v2779_v43 = vsel %vm2586_vm3, %v7008_v35, 0.0 }
 0x2b6   : > { %v2685_v44 = vsub.f32 %v6909_v49, %v2595_v42  ;;  %2780 = vadd.xlane.f32.xlu1 %v2779_v43 }
 0x2b8   : > { %v2719_v39 = vmul.f32 1.442695, %v2685_v44 }
 0x2b9   : > { %v7013_v52 = vpop.f32.mrb[52].mxu0 }
 0x2ba   : > { %6017 = vpow2.f32 %v2719_v39  ;;  %v2629_v53 = vsel %vm2586_vm3, %v7013_v52, -inf  ;;  %v5557_v54 = vpop.f32.mrb[53].mxu0 }
 0x2bb   : > { %2630 = vmax.xlane.f32.xlu1 %v2629_v53  ;;  %v1801_v55 = vpop.f32.mrb[54].mxu0 }
 0x2bc   : > { %v7017_v61 = vpop.eup %6015  ;;  %v5558_v2 = vpop.f32.mrb[55].mxu0 }
 0x2bd   : > { %v2598_v5 = vpop.xlane.xlu0 %2597  ;;  %v2782_v7 = vsel %vm2586_vm3, %v7017_v61, 0.0 }
 0x2be   : > { %v2686_v49 = vsub.f32 %v6923_v22, %v2598_v5  ;;  %2783 = vadd.xlane.f32.xlu0 %v2782_v7 }
 0x2c0   : > { %v2721_v10 = vmul.f32 1.442695, %v2686_v49 }
 0x2c1   : > { %v7022_v11 = vpop.f32.mrb[56].mxu0 }
 0x2c2   : > { %6019 = vpow2.f32 %v2721_v10  ;;  %v7024_v12 = vpop.f32.mrb[52].mxu1  ;;  %v5569_v17 = vpop.f32.mrb[57].mxu0  ;;  %v2635_v18 = vsel %vm2586_vm3, %v7022_v11, -inf }
 0x2c3   : > { %v1893_v19 = vpop.f32.mrb[58].mxu0  ;;  %2636 = vmax.xlane.f32.xlu1 %v2635_v18  ;;  %v2632_v24 = vsel %vm2586_vm3, %v7024_v12, -inf  ;;  %v5563_v25 = vpop.f32.mrb[53].mxu1 }
 0x2c4   : > { %v7030_v26 = vpop.eup %6017  ;;  %2633 = vmax.xlane.f32.xlu0 %v2632_v24  ;;  %v5570_v22 = vpop.f32.mrb[59].mxu0 }
 0x2c5   : > { %v1847_v62 = vpop.f32.mrb[54].mxu1  ;;  %v2785_v23 = vsel %vm2586_vm3, %v7030_v26, 0.0  ;;  %v2601_v57 = vpop.xlane.xlu1 %2600 }
 0x2c6   : > { %v5564_v31 = vpop.f32.mrb[55].mxu1 }
 0x2c7   : > { %2786 = vadd.xlane.f32.xlu1 %v2785_v23 }
 0x2c9   : > { %v7034_v33 = vpop.f32.mrb[60].mxu0 }
 0x2ca   : > { %v7036_v41 = vpop.f32.mrb[56].mxu1  ;;  %v5581_v42 = vpop.f32.mrb[61].mxu0  ;;  %v2641_v43 = vsel %vm2586_vm3, %v7034_v33, -inf }
 0x2cb   : > { %v5575_v44 = vpop.f32.mrb[57].mxu1  ;;  %v1985_v39 = vpop.f32.mrb[62].mxu0  ;;  %2642 = vmax.xlane.f32.xlu1 %v2641_v43  ;;  %v2638_v53 = vsel %vm2586_vm3, %v7036_v41, -inf }
 0x2cc   : > { %v7042_v54 = vpop.eup %6019  ;;  %2639 = vmax.xlane.f32.xlu0 %v2638_v53  ;;  %v1939_v55 = vpop.f32.mrb[58].mxu1 }
 0x2cd   : > { %v5582_v2 = vpop.f32.mrb[63].mxu0  ;;  %v5576_v5 = vpop.f32.mrb[59].mxu1  ;;  %v2788_v7 = vsel %vm2586_vm3, %v7042_v54, 0.0 }
 0x2d0   : > { %2789 = vadd.xlane.f32.xlu0 %v2788_v7 }
 0x2d1   : > { %v7046_v49 = vpop.f32.mrb[64].mxu0 }
 0x2d2   : > { %v7048_v10 = vpop.f32.mrb[60].mxu1  ;;  %v5593_v17 = vpop.f32.mrb[65].mxu0 }
 0x2d3   : > { %v5587_v18 = vpop.f32.mrb[61].mxu1  ;;  %v2077_v19 = vpop.f32.mrb[66].mxu0  ;;  %v2644_v24 = vsel %vm2586_vm3, %v7048_v10, -inf }
 0x2d4   : > { %2645 = vmax.xlane.f32.xlu0 %v2644_v24  ;;  %v2031_v25 = vpop.f32.mrb[62].mxu1  ;;  %v5594_v22 = vpop.f32.mrb[67].mxu0 }
 0x2d5   : > { %v5588_v62 = vpop.f32.mrb[63].mxu1 }
 0x2d9   : > { %v7052_v23 = vpop.f32.mrb[68].mxu0 }
 0x2da   : > { %v7054_v31 = vpop.f32.mrb[64].mxu1  ;;  %v5605_v42 = vpop.f32.mrb[69].mxu0 }
 0x2db   : > { %v5599_v43 = vpop.f32.mrb[65].mxu1  ;;  %v2169_v44 = vpop.f32.mrb[70].mxu0 }
 0x2dc   : > { %v2123_v39 = vpop.f32.mrb[66].mxu1  ;;  %v5606_v53 = vpop.f32.mrb[71].mxu0  ;;  %1093 = vrot.lane.b32.xlu1 %v6639_v36, %s6287_s13 }
 0x2dd   : > { %v5600_v55 = vpop.f32.mrb[67].mxu1 }
 0x2e0   : > { %1095 = vrot.lane.b32.xlu1 %v6635_v34, %s6287_s13 }
 0x2e1   : > { %v7060_v2 = vpop.f32.mrb[72].mxu0 }
 0x2e2   : > { %v7062_v5 = vpop.f32.mrb[68].mxu1  ;;  %v5617_v7 = vpop.f32.mrb[73].mxu0 }
 0x2e3   : > { %v5611_v17 = vpop.f32.mrb[69].mxu1  ;;  %v2261_v18 = vpop.f32.mrb[74].mxu0 }
 0x2e4   : > { %v2215_v19 = vpop.f32.mrb[70].mxu1  ;;  %v5618_v24 = vpop.f32.mrb[75].mxu0  ;;  %v2687_v18 = vsub.f32 %v6932_v63, %v2601_v57 }
 0x2e5   : > { %v5612_v25 = vpop.f32.mrb[71].mxu1  ;;  %v2604_v7 = vpop.xlane.xlu0 %2603 }
 0x2e9   : > { %v7064_v22 = vpop.f32.mrb[76].mxu0 }
 0x2ea   : > { %1091 = vrot.lane.b32.xlu0 %v6616_v20, %s6287_s13  ;;  %v7068_v62 = vpop.f32.mrb[72].mxu1  ;;  %v5629_v42 = vpop.f32.mrb[77].mxu0 }
 0x2eb   : > { %v5623_v43 = vpop.f32.mrb[73].mxu1  ;;  %v2353_v44 = vpop.f32.mrb[78].mxu0  ;;  %v2723_v42 = vmul.f32 1.442695, %v2687_v18 }
 0x2ec   : > { %v2307_v39 = vpop.f32.mrb[74].mxu1  ;;  %v5630_v53 = vpop.f32.mrb[79].mxu0  ;;  %v2688_v43 = vsub.f32 %v6936_v9, %v2604_v7 }
 0x2ed   : > { %v5624_v55 = vpop.f32.mrb[75].mxu1  ;;  %v2607_v44 = vpop.xlane.xlu1 %2606  ;;  %6021 = vpow2.f32 %v2723_v42 }
 0x2ee   : > { %v2725_v58 = vmul.f32 1.442695, %v2688_v43 }
 0x2f0   : > { %6023 = vpow2.f32 %v2725_v58  ;;  %v2650_v58 = vsel %vm2586_vm3, %v7054_v31, -inf }
 0x2f1   : > { %v7070_v17 = vpop.f32.mrb[80].mxu0 }
 0x2f2   : > { %v7073_v19 = vpop.f32.mrb[76].mxu1  ;;  %v5641_v24 = vpop.f32.mrb[81].mxu0 }
 0x2f3   : > { %v5635_v25 = vpop.f32.mrb[77].mxu1  ;;  %v2445_v13 = vpop.f32.mrb[82].mxu0 }
 0x2f4   : > { %v2399_v20 = vpop.f32.mrb[78].mxu1  ;;  %v5642_v59 = vpop.f32.mrb[83].mxu0  ;;  %v2689_v13 = vsub.f32 %v6940_v14, %v2607_v44 }
 0x2f5   : > { %v5636_v4 = vpop.f32.mrb[79].mxu1  ;;  %v2610_v59 = vpop.xlane.xlu0 %2609  ;;  %v2647_v20 = vsel %vm2586_vm3, %v7046_v49, -inf }
 0x2f6   : > { %v2727_v4 = vmul.f32 1.442695, %v2689_v13  ;;  %v2690_v9 = vsub.f32 %v6944_v21, %v2610_v59  ;;  %v2653_v21 = vsel %vm2586_vm3, %v7052_v23, -inf  ;;  %v2662_v59 = vsel %vm2586_vm3, %v7068_v62, -inf }
 0x2f7   : > { %v7086_v42 = vpop.eup %6021 }
 0x2f8   : > { %6025 = vpow2.f32 %v2727_v4  ;;  %v2791_v14 = vsel %vm2586_vm3, %v7086_v42, 0.0 }
 0x2f9   : > { %v7076_v39 = vpop.f32.mrb[84].mxu0 }
 0x2fa   : > { %v7078_v53 = vpop.f32.mrb[80].mxu1  ;;  %v5653_v55 = vpop.f32.mrb[85].mxu0 }
 0x2fb   : > { %v5647_v57 = vpop.f32.mrb[81].mxu1  ;;  %v2537_v63 = vpop.f32.mrb[86].mxu0  ;;  %v2729_v55 = vmul.f32 1.442695, %v2690_v9  ;;  %v2665_v9 = vsel %vm2586_vm3, %v7064_v22, -inf }
 0x2fc   : > { %v2491_v47 = vpop.f32.mrb[82].mxu1  ;;  %v5654_v24 = vpop.f32.mrb[87].mxu0  ;;  %v2659_v63 = vsel %vm2586_vm3, %v7060_v2, -inf }
 0x2fd   : > { %v5648_v25 = vpop.f32.mrb[83].mxu1  ;;  %v7092_v44 = vpop.eup %6023  ;;  %6027 = vpow2.f32 %v2729_v55  ;;  %v2671_v55 = vsel %vm2586_vm3, %v7070_v17, -inf }
 0x2fe   : > { %v2794_v57 = vsel %vm2586_vm3, %v7092_v44, 0.0  ;;  %v2656_v25 = vsel %vm2586_vm3, %v7062_v5, -inf }
 0x302   : > { %v7081_v18 = vpop.f32.mrb[84].mxu1  ;;  %v7100_v24 = vpop.eup %6025 }
 0x303   : > { %v5659_v7 = vpop.f32.mrb[85].mxu1  ;;  %v2797_v13 = vsel %vm2586_vm3, %v7100_v24, 0.0 }
 0x304   : > { %v2583_v43 = vpop.f32.mrb[86].mxu1  ;;  %2648 = vmax.xlane.f32.xlu1 %v2647_v20 }
 0x305   : > { %v5660_v47 = vpop.f32.mrb[87].mxu1 }
 0x307   : > { %v7108_v4 = vpop.eup %6027 }
 0x308   : > { %2792 = vadd.xlane.f32.xlu1 %v2791_v14  ;;  %v2800_v20 = vsel %vm2586_vm3, %v7108_v4, 0.0  ;;  %v2668_v14 = vsel %vm2586_vm3, %v7073_v19, -inf }
 0x309   : > { %2651 = vmax.xlane.f32.xlu0 %v2650_v58  ;;  %v2677_v58 = vsel %vm2586_vm3, %v7076_v39, -inf }
 0x30c   : > { %2654 = vmax.xlane.f32.xlu1 %v2653_v21 }
 0x30d   : > { %2795 = vadd.xlane.f32.xlu0 %v2794_v57  ;;  %v2674_v57 = vsel %vm2586_vm3, %v7078_v53, -inf }
 0x310   : > { %2660 = vmax.xlane.f32.xlu1 %v2659_v63 }
 0x311   : > { %2657 = vmax.xlane.f32.xlu0 %v2656_v25  ;;  %v2680_v25 = vsel %vm2586_vm3, %v7081_v18, -inf }
 0x314   : > { %2798 = vadd.xlane.f32.xlu1 %v2797_v13 }
 0x315   : > { %2663 = vmax.xlane.f32.xlu0 %v2662_v59 }
 0x318   : > { %2666 = vmax.xlane.f32.xlu1 %v2665_v9  ;;  %v2613_v7 = vpop.xlane.xlu1 %2612 }
 0x319   : > { %v2691_v43 = vsub.f32 %v6960_v29, %v2613_v7  ;;  %2801 = vadd.xlane.f32.xlu0 %v2800_v20 }
 0x31b   : > { %v2731_v47 = vmul.f32 1.442695, %v2691_v43 }
 0x31c   : > { %2672 = vmax.xlane.f32.xlu1 %v2671_v55 }
 0x31d   : > { %6029 = vpow2.f32 %v2731_v47  ;;  %2669 = vmax.xlane.f32.xlu0 %v2668_v14 }
 0x320   : > { %2678 = vmax.xlane.f32.xlu1 %v2677_v58  ;;  %v2616_v21 = vpop.xlane.xlu0 %2615 }
 0x321   : > { %v2692_v29 = vsub.f32 %v6970_v40, %v2616_v21  ;;  %2675 = vmax.xlane.f32.xlu0 %v2674_v57 }
 0x323   : > { %v2733_v63 = vmul.f32 1.442695, %v2692_v29 }
 0x325   : > { %6031 = vpow2.f32 %v2733_v63  ;;  %2681 = vmax.xlane.f32.xlu0 %v2680_v25 }
 0x327   : > { %v7126_v13 = vpop.eup %6029 }
 0x328   : > { %v2619_v59 = vpop.xlane.xlu1 %2618  ;;  %v2803_v9 = vsel %vm2586_vm3, %v7126_v13, 0.0 }
 0x329   : > { %v2693_v7 = vsub.f32 %v6980_v51, %v2619_v59  ;;  %2804 = vadd.xlane.f32.xlu1 %v2803_v9 }
 0x32b   : > { %v2735_v20 = vmul.f32 1.442695, %v2693_v7 }
 0x32d   : > { %6033 = vpow2.f32 %v2735_v20 }
 0x32f   : > { %v7131_v43 = vpop.eup %6031 }
 0x330   : > { %v2622_v40 = vpop.xlane.xlu0 %2621  ;;  %v2806_v47 = vsel %vm2586_vm3, %v7131_v43, 0.0 }
 0x331   : > { %v2694_v55 = vsub.f32 %v6990_v60, %v2622_v40  ;;  %2807 = vadd.xlane.f32.xlu0 %v2806_v47 }
 0x333   : > { %v2737_v14 = vmul.f32 1.442695, %v2694_v55 }
 0x335   : > { %6035 = vpow2.f32 %v2737_v14 }
 0x337   : > { %v7136_v58 = vpop.eup %6033 }
 0x338   : > { %v2625_v21 = vpop.xlane.xlu1 %2624  ;;  %v2809_v51 = vsel %vm2586_vm3, %v7136_v58, 0.0 }
 0x339   : > { %v2695_v57 = vsub.f32 %v6999_v15, %v2625_v21  ;;  %2810 = vadd.xlane.f32.xlu1 %v2809_v51 }
 0x33b   : > { %v2739_v29 = vmul.f32 1.442695, %v2695_v57 }
 0x33d   : > { %6037 = vpow2.f32 %v2739_v29 }
 0x33f   : > { %v7141_v63 = vpop.eup %6035 }
 0x340   : > { %v2628_v25 = vpop.xlane.xlu0 %2627  ;;  %v2812_v60 = vsel %vm2586_vm3, %v7141_v63, 0.0 }
 0x341   : > { %v2696_v59 = vsub.f32 %v7004_v30, %v2628_v25  ;;  %2813 = vadd.xlane.f32.xlu0 %v2812_v60 }
 0x343   : > { %v2741_v9 = vmul.f32 1.442695, %v2696_v59  ;;  %v2781_v7 = vpop.xlane.xlu1 %2780 }
 0x344   : > { %6039 = vrcp.f32 %v2781_v7 }
 0x345   : > { %6041 = vpow2.f32 %v2741_v9 }
 0x347   : > { %v7146_v20 = vpop.eup %6037 }
 0x348   : > { %v2631_v40 = vpop.xlane.xlu1 %2630  ;;  %v2815_v15 = vsel %vm2586_vm3, %v7146_v20, 0.0 }
 0x349   : > { %v2697_v47 = vsub.f32 %v7013_v52, %v2631_v40  ;;  %2816 = vadd.xlane.f32.xlu1 %v2815_v15  ;;  %v7793_v15 = vmov 0.0  }
 0x34b   : > { %v2743_v55 = vmul.f32 1.442695, %v2697_v47  ;;  %v2784_v14 = vpop.xlane.xlu0 %2783 }
 0x34c   : > { %6043 = vrcp.f32 %v2784_v14 }
 0x34d   : > { %6045 = vpow2.f32 %v2743_v55 }
 0x34e   : > { %v6040_v21 = vpop.eup %6039 }
 0x34f   : > { %v7151_v30 = vpop.eup %6041  ;;  %v2907_v51 = vmul.f32 %v6040_v21, %v7008_v35 }
 0x350   : > { %v2637_v57 = vpop.xlane.xlu1 %2636  ;;  %v2818_v29 = vsel %vm2586_vm3, %v7151_v30, 0.0 }
 0x351   : > { %v2699_v25 = vsub.f32 %v7022_v11, %v2637_v57  ;;  %v2634_v60 = vpop.xlane.xlu0 %2633  ;;  %2819 = vadd.xlane.f32.xlu0 %v2818_v29  ;;  %v2939_v59 = vpack.c.bf16 %v2907_v51, %v2907_v51 }
 0x352   : > { %v2698_v52 = vsub.f32 %v7024_v12, %v2634_v60 }
 0x353   : > { %v2747_v9 = vmul.f32 1.442695, %v2699_v25  ;;  %5664 = vmatmul.mubr.msk.bf16.vlgmr.msra.gmra.mrb[88].mxu0 %vm2586_vm3, %v2939_v59 }
 0x354   : > { %v2745_v7 = vmul.f32 1.442695, %v2698_v52  ;;  %5674 = vmatpush3.bf16.msra.mxu0 %v6639_v36  ;;  %v2787_v40 = vpop.xlane.xlu1 %2786  ;;  %5675 = vmatprep.mubr.msk.bf16.mxu0 %vm6284_vm1, %v7793_v15 }
 0x355   : > { %6047 = vpow2.f32 %v2747_v9  ;;  %5685 = vmatprep.subr.bf16.mxu0 %v7793_v15 }
 0x356   : > { %v6044_v35 = vpop.eup %6043  ;;  %6049 = vpow2.f32 %v2745_v7 }
 0x357   : > { %v7163_v11 = vpop.eup %6045  ;;  %6051 = vrcp.f32 %v2787_v40  ;;  %v2908_v12 = vmul.f32 %v6044_v35, %v7017_v61 }
 0x358   : > { %v2643_v47 = vpop.xlane.xlu1 %2642  ;;  %v2821_v55 = vsel %vm2586_vm3, %v7163_v11, 0.0 }
 0x359   : > { %v2701_v36 = vsub.f32 %v7034_v33, %v2643_v47  ;;  %v2640_v14 = vpop.xlane.xlu0 %2639  ;;  %2822 = vadd.xlane.f32.xlu1 %v2821_v55  ;;  %v2940_v21 = vpack.c.bf16 %v2908_v12, %v2908_v12 }
 0x35a   : > { %v2700_v51 = vsub.f32 %v7036_v41, %v2640_v14 }
 0x35b   : > { %v2751_v57 = vmul.f32 1.442695, %v2701_v36  ;;  %5670 = vmatmul.mubr.msk.bf16.vlgmr.msra.gmra.mrb[88].mxu1 %vm2586_vm3, %v2940_v21 }
 0x35c   : > { %v2749_v29 = vmul.f32 1.442695, %v2700_v51  ;;  %5680 = vmatpush3.bf16.msra.mxu1 %v6635_v34  ;;  %5681 = vmatprep.mubr.msk.bf16.mxu1 %vm6284_vm1, %v7793_v15  ;;  %v7208_v51 = vpop.permute.xlu1 %1093 }
 0x35d   : > { %6053 = vpow2.f32 %v2751_v57  ;;  %v2790_v61 = vpop.xlane.xlu0 %2789  ;;  %5691 = vmatprep.subr.bf16.mxu1 %v7793_v15 }
 0x35e   : > { %6055 = vpow2.f32 %v2749_v29 }
 0x35f   : > { %v7175_v33 = vpop.eup %6047  ;;  %6057 = vrcp.f32 %v2790_v61 }
 0x360   : > { %v7177_v25 = vpop.eup %6049  ;;  %v2827_v41 = vsel %vm2586_vm3, %v7175_v33, 0.0  ;;  %v7210_v57 = vpop.permute.xlu1 %1095 }
 0x361   : > { %v6052_v60 = vpop.eup %6051  ;;  %v2646_v59 = vpop.xlane.xlu0 %2645  ;;  %2828 = vadd.xlane.f32.xlu1 %v2827_v41  ;;  %v2824_v34 = vsel %vm2586_vm3, %v7177_v25, 0.0 }
 0x362   : > { %v2702_v52 = vsub.f32 %v7048_v10, %v2646_v59  ;;  %2825 = vadd.xlane.f32.xlu0 %v2824_v34  ;;  %v2909_v9 = vmul.f32 %v6052_v60, %v7030_v26 }
 0x364   : > { %v2753_v7 = vmul.f32 1.442695, %v2702_v52  ;;  %v2941_v40 = vpack.c.bf16 %v2909_v9, %v2909_v9 }
 0x365   : > { %v7212_v29 = vpop.permute.xlu0 %1091 }
 0x366   : > { %6059 = vpow2.f32 %v2753_v7  ;;  %5676 = vmatmul.mubr.msk.bf16.vlgmr.msra.gmra.mrb[92].mxu0 %vm2586_vm3, %v2941_v40 }
 0x367   : > { %v7186_v35 = vpop.eup %6053  ;;  %5686 = vmatpush3.bf16.msra.mxu0 %v6658_v50  ;;  %5687 = vmatprep.mubr.msk.bf16.mxu0 %vm6284_vm1, %v7793_v15 }
 0x368   : > { %v7191_v12 = vpop.eup %6055  ;;  %v2833_v10 = vsel %vm2586_vm3, %v7186_v35, 0.0  ;;  %5697 = vmatprep.subr.bf16.mxu0 %v7793_v15 }
 0x369   : > { %v6058_v26 = vpop.eup %6057  ;;  %2834 = vadd.xlane.f32.xlu1 %v2833_v10  ;;  %v2830_v47 = vsel %vm2586_vm3, %v7191_v12, 0.0 }
 0x36a   : > { %2831 = vadd.xlane.f32.xlu0 %v2830_v47  ;;  %v2910_v55 = vmul.f32 %v6058_v26, %v7042_v54 }
 0x36c   : > { %v2942_v36 = vpack.c.bf16 %v2910_v55, %v2910_v55 }
 0x36e   : > { %5682 = vmatmul.mubr.msk.bf16.vlgmr.msra.gmra.mrb[92].mxu1 %vm2586_vm3, %v2942_v36 }
 0x36f   : > { %5692 = vmatpush3.bf16.msra.mxu1 %v6654_v48  ;;  %5693 = vmatprep.mubr.msk.bf16.mxu1 %vm6284_vm1, %v7793_v15 }
 0x370   : > { %v7203_v14 = vpop.eup %6059  ;;  %5703 = vmatprep.subr.bf16.mxu1 %v7793_v15 }
 0x371   : > { %v2836_v21 = vsel %vm2586_vm3, %v7203_v14, 0.0 }
 0x372   : > { %2837 = vadd.xlane.f32.xlu0 %v2836_v21 }
 0x391   : > { %v2649_v54 = vpop.xlane.xlu1 %2648 }
 0x392   : > { %v2703_v61 = vsub.f32 %v7046_v49, %v2649_v54 }
 0x394   : > { %v2755_v41 = vmul.f32 1.442695, %v2703_v61 }
 0x395   : > { %v2793_v60 = vpop.xlane.xlu1 %2792 }
 0x396   : > { %6061 = vpow2.f32 %v2755_v41  ;;  %v2652_v59 = vpop.xlane.xlu0 %2651 }
 0x397   : > { %6063 = vrcp.f32 %v2793_v60  ;;  %v2704_v34 = vsub.f32 %v7054_v31, %v2652_v59 }
 0x399   : > { %v2757_v52 = vmul.f32 1.442695, %v2704_v34  ;;  %v2655_v9 = vpop.xlane.xlu1 %2654 }
 0x39a   : > { %v2705_v7 = vsub.f32 %v7052_v23, %v2655_v9  ;;  %v2796_v40 = vpop.xlane.xlu0 %2795 }
 0x39b   : > { %6065 = vpow2.f32 %v2757_v52 }
 0x39c   : > { %v2759_v10 = vmul.f32 1.442695, %v2705_v7  ;;  %6067 = vrcp.f32 %v2796_v40 }
 0x39d   : > { %v2661_v26 = vpop.xlane.xlu1 %2660 }
 0x39e   : > { %6069 = vpow2.f32 %v2759_v10  ;;  %v2707_v47 = vsub.f32 %v7060_v2, %v2661_v26  ;;  %v2658_v49 = vpop.xlane.xlu0 %2657 }
 0x39f   : > { %v2706_v55 = vsub.f32 %v7062_v5, %v2658_v49 }
 0x3a0   : > { %v7219_v36 = vpop.eup %6061  ;;  %v2763_v21 = vmul.f32 1.442695, %v2707_v47 }
 0x3a1   : > { %v6064_v54 = vpop.eup %6063  ;;  %v2761_v31 = vmul.f32 1.442695, %v2706_v55  ;;  %v2799_v61 = vpop.xlane.xlu1 %2798  ;;  %v2839_v23 = vsel %vm2586_vm3, %v7219_v36, 0.0 }
 0x3a2   : > { %v2911_v41 = vmul.f32 %v6064_v54, %v7086_v42  ;;  %6071 = vpow2.f32 %v2763_v21  ;;  %v2664_v60 = vpop.xlane.xlu0 %2663  ;;  %2840 = vadd.xlane.f32.xlu1 %v2839_v23 }
 0x3a3   : > { %6073 = vpow2.f32 %v2761_v31  ;;  %v2708_v2 = vsub.f32 %v7068_v62, %v2664_v60 }
 0x3a4   : > { %6075 = vrcp.f32 %v2799_v61  ;;  %v2943_v59 = vpack.c.bf16 %v2911_v41, %v2911_v41 }
 0x3a5   : > { %v7225_v5 = vpop.eup %6065  ;;  %v2765_v34 = vmul.f32 1.442695, %v2708_v2  ;;  %v2667_v52 = vpop.xlane.xlu1 %2666 }
 0x3a6   : > { %v6068_v9 = vpop.eup %6067  ;;  %5688 = vmatmul.mubr.msk.bf16.vlgmr.msra.gmra.mrb[96].mxu0 %vm2586_vm3, %v2943_v59  ;;  %v2709_v7 = vsub.f32 %v7064_v22, %v2667_v52  ;;  %v2802_v40 = vpop.xlane.xlu0 %2801  ;;  %v2842_v42 = vsel %vm2586_vm3, %v7225_v5, 0.0 }
 0x3a7   : > { %6077 = vpow2.f32 %v2765_v34  ;;  %5698 = vmatpush3.bf16.msra.mxu0 %v6677_v3  ;;  %2843 = vadd.xlane.f32.xlu0 %v2842_v42  ;;  %v2912_v62 = vmul.f32 %v6068_v9, %v7092_v44 }
 0x3a8   : > { %v7233_v10 = vpop.eup %6069  ;;  %v2767_v26 = vmul.f32 1.442695, %v2709_v7  ;;  %6079 = vrcp.f32 %v2802_v40  ;;  %5699 = vmatprep.mubr.msk.bf16.mxu0 %vm6284_vm1, %v7793_v15  ;;  %5709 = vmatprep.subr.bf16.mxu0 %v7793_v15 }
 0x3a9   : > { %v2944_v22 = vpack.c.bf16 %v2912_v62, %v2912_v62  ;;  %v2845_v47 = vsel %vm2586_vm3, %v7233_v10, 0.0  ;;  %v7244_v21 = vpop.xlane.xlu1 %2672 }
 0x3aa   : > { %6081 = vpow2.f32 %v2767_v26  ;;  %v2670_v49 = vpop.xlane.xlu0 %2669  ;;  %2846 = vadd.xlane.f32.xlu1 %v2845_v47 }
 0x3ab   : > { %5694 = vmatmul.mubr.msk.bf16.vlgmr.msra.gmra.mrb[96].mxu1 %vm2586_vm3, %v2944_v22  ;;  %v2710_v44 = vsub.f32 %v7073_v19, %v2670_v49 }
 0x3ac   : > { %v7242_v55 = vpop.eup %6071  ;;  %5704 = vmatpush3.bf16.msra.mxu1 %v6673_v1  ;;  %5705 = vmatprep.mubr.msk.bf16.mxu1 %vm6284_vm1, %v7793_v15 }
 0x3ad   : > { %v7249_v54 = vpop.eup %6073  ;;  %v2769_v31 = vmul.f32 1.442695, %v2710_v44  ;;  %v2851_v61 = vsel %vm2586_vm3, %v7242_v55, 0.0  ;;  %5715 = vmatprep.subr.bf16.mxu1 %v7793_v15  ;;  %v2679_v34 = vpop.xlane.xlu1 %2678 }
 0x3ae   : > { %v6076_v23 = vpop.eup %6075  ;;  %2852 = vadd.xlane.f32.xlu1 %v2851_v61  ;;  %v2848_v19 = vsel %vm2586_vm3, %v7249_v54, 0.0  ;;  %v2676_v40 = vpop.xlane.xlu0 %2675 }
 0x3af   : > { %v2913_v41 = vmul.f32 %v6076_v23, %v7100_v24  ;;  %6083 = vpow2.f32 %v2769_v31  ;;  %2849 = vadd.xlane.f32.xlu0 %v2848_v19 }
 0x3b1   : > { %v7257_v60 = vpop.eup %6077  ;;  %v2945_v2 = vpack.c.bf16 %v2913_v41, %v2913_v41 }
 0x3b2   : > { %v6080_v59 = vpop.eup %6079  ;;  %v2854_v52 = vsel %vm2586_vm3, %v7257_v60, 0.0 }
 0x3b3   : > { %v2914_v9 = vmul.f32 %v6080_v59, %v7108_v4  ;;  %5700 = vmatmul.mubr.msk.bf16.vlgmr.msra.gmra.mrb[100].mxu0 %vm2586_vm3, %v2945_v2  ;;  %2855 = vadd.xlane.f32.xlu0 %v2854_v52  ;;  %v2682_v4 = vpop.xlane.xlu0 %2681 }
 0x3b4   : > { %v7263_v7 = vpop.eup %6081  ;;  %5710 = vmatpush3.bf16.msra.mxu0 %v6948_v0  ;;  %5711 = vmatprep.mubr.msk.bf16.mxu0 %vm6284_vm1, %v7793_v15 }
 0x3b5   : > { %v2946_v24 = vpack.c.bf16 %v2914_v9, %v2914_v9  ;;  %v2857_v42 = vsel %vm2586_vm3, %v7263_v7, 0.0  ;;  %5721 = vmatprep.subr.bf16.mxu0 %v7793_v15 }
 0x3b6   : > { %2858 = vadd.xlane.f32.xlu1 %v2857_v42  ;;  %v2805_v62 = vpop.xlane.xlu1 %2804 }
 0x3b7   : > { %5706 = vmatmul.mubr.msk.bf16.vlgmr.msra.gmra.mrb[100].mxu1 %vm2586_vm3, %v2946_v24  ;;  %6085 = vrcp.f32 %v2805_v62 }
 0x3b8   : > { %5716 = vmatpush3.bf16.msra.mxu1 %v6950_v6  ;;  %5717 = vmatprep.mubr.msk.bf16.mxu1 %vm6284_vm1, %v7793_v15 }
 0x3b9   : > { %v7275_v0 = vpop.eup %6083  ;;  %5727 = vmatprep.subr.bf16.mxu1 %v7793_v15 }
 0x3ba   : > { %v2860_v26 = vsel %vm2586_vm3, %v7275_v0, 0.0 }
 0x3bb   : > { %2861 = vadd.xlane.f32.xlu0 %v2860_v26 }
 0x3be   : > { %v2808_v22 = vpop.xlane.xlu0 %2807 }
 0x3bf   : > { %6087 = vrcp.f32 %v2808_v22 }
 0x3c1   : > { %v6086_v47 = vpop.eup %6085 }
 0x3c2   : > { %v2915_v49 = vmul.f32 %v6086_v47, %v7126_v13 }
 0x3c4   : > { %v2947_v44 = vpack.c.bf16 %v2915_v49, %v2915_v49 }
 0x3c6   : > { %v2811_v6 = vpop.xlane.xlu1 %2810  ;;  %5712 = vmatmul.mubr.msk.bf16.vlgmr.msra.gmra.mrb[104].mxu0 %vm2586_vm3, %v2947_v44 }
 0x3c7   : > { %6089 = vrcp.f32 %v2811_v6  ;;  %1099 = vrot.lane.b32.xlu1 %v6654_v48, %s6287_s13  ;;  %5722 = vmatpush3.bf16.msra.mxu0 %v6952_v8 }
 0x3c8   : > { %5723 = vmatprep.mubr.msk.bf16.mxu0 %vm6284_vm1, %v7793_v15  ;;  %5733 = vmatprep.subr.bf16.mxu0 %v7793_v15 }
 0x3c9   : > { %v6088_v31 = vpop.eup %6087 }
 0x3ca   : > { %v2916_v61 = vmul.f32 %v6088_v31, %v7131_v43  ;;  %v2711_v43 = vsub.f32 %v7070_v17, %v7244_v21 }
 0x3cc   : > { %v2948_v23 = vpack.c.bf16 %v2916_v61, %v2916_v61  ;;  %v2771_v2 = vmul.f32 1.442695, %v2711_v43 }
 0x3ce   : > { %5718 = vmatmul.mubr.msk.bf16.vlgmr.msra.gmra.mrb[104].mxu1 %vm2586_vm3, %v2948_v23  ;;  %v2814_v13 = vpop.xlane.xlu0 %2813 }
 0x3cf   : > { %5728 = vmatpush3.bf16.msra.mxu1 %v6954_v16  ;;  %6091 = vrcp.f32 %v2814_v13  ;;  %5729 = vmatprep.mubr.msk.bf16.mxu1 %vm6284_vm1, %v7793_v15 }
 0x3d0   : > { %5739 = vmatprep.subr.bf16.mxu1 %v7793_v15 }
 0x3d1   : > { %v6090_v48 = vpop.eup %6089  ;;  %1097 = vrot.lane.b32.xlu0 %v6658_v50, %s6287_s13  ;;  %v2713_v50 = vsub.f32 %v7076_v39, %v2679_v34 }
 0x3d2   : > { %v2917_v8 = vmul.f32 %v6090_v48, %v7136_v58  ;;  %v2712_v58 = vsub.f32 %v7078_v53, %v2676_v40 }
 0x3d3   : > { %v2775_v21 = vmul.f32 1.442695, %v2713_v50 }
 0x3d4   : > { %v2949_v19 = vpack.c.bf16 %v2917_v8, %v2917_v8  ;;  %v2773_v52 = vmul.f32 1.442695, %v2712_v58 }
 0x3d6   : > { %5724 = vmatmul.mubr.msk.bf16.vlgmr.msra.gmra.mrb[108].mxu0 %vm2586_vm3, %v2949_v19  ;;  %v2817_v41 = vpop.xlane.xlu1 %2816 }
 0x3d7   : > { %5734 = vmatpush3.bf16.msra.mxu0 %v6956_v27  ;;  %6093 = vrcp.f32 %v2817_v41  ;;  %5735 = vmatprep.mubr.msk.bf16.mxu0 %vm6284_vm1, %v7793_v15  ;;  %v2714_v27 = vsub.f32 %v7081_v18, %v2682_v4 }
 0x3d8   : > { %5745 = vmatprep.subr.bf16.mxu0 %v7793_v15  ;;  %6095 = vpow2.f32 %v2771_v2 }
 0x3d9   : > { %v6092_v16 = vpop.eup %6091  ;;  %v2777_v53 = vmul.f32 1.442695, %v2714_v27 }
 0x3da   : > { %v2918_v59 = vmul.f32 %v6092_v16, %v7141_v63 }
 0x3dc   : > { %v2950_v17 = vpack.c.bf16 %v2918_v59, %v2918_v59 }
 0x3de   : > { %5730 = vmatmul.mubr.msk.bf16.vlgmr.msra.gmra.mrb[108].mxu1 %vm2586_vm3, %v2950_v17  ;;  %v2820_v9 = vpop.xlane.xlu0 %2819 }
 0x3df   : > { %5740 = vmatpush3.bf16.msra.mxu1 %v6958_v28  ;;  %6097 = vrcp.f32 %v2820_v9  ;;  %5741 = vmatprep.mubr.msk.bf16.mxu1 %vm6284_vm1, %v7793_v15 }
 0x3e0   : > { %5751 = vmatprep.subr.bf16.mxu1 %v7793_v15  ;;  %6099 = vpow2.f32 %v2775_v21 }
 0x3e1   : > { %v6094_v39 = vpop.eup %6093  ;;  %6101 = vpow2.f32 %v2773_v52 }
 0x3e2   : > { %v2919_v63 = vmul.f32 %v6094_v39, %v7146_v20  ;;  %6103 = vpow2.f32 %v2777_v53  ;;  %v7315_v40 = vpop.eup %6095 }
 0x3e3   : > { %v2863_v20 = vsel %vm2586_vm3, %v7315_v40, 0.0 }
 0x3e4   : > { %v2951_v34 = vpack.c.bf16 %v2919_v63, %v2919_v63 }
 0x3e6   : > { %5736 = vmatmul.mubr.msk.bf16.vlgmr.msra.gmra.mrb[112].mxu0 %vm2586_vm3, %v2951_v34  ;;  %v2823_v18 = vpop.xlane.xlu1 %2822 }
 0x3e7   : > { %5746 = vmatpush3.bf16.msra.mxu0 %v6964_v32  ;;  %6105 = vrcp.f32 %v2823_v18  ;;  %5747 = vmatprep.mubr.msk.bf16.mxu0 %vm6284_vm1, %v7793_v15 }
 0x3e8   : > { %5757 = vmatprep.subr.bf16.mxu0 %v7793_v15 }
 0x3e9   : > { %v6098_v28 = vpop.eup %6097 }
 0x3ea   : > { %v2920_v24 = vmul.f32 %v6098_v28, %v7151_v30  ;;  %v7324_v42 = vpop.eup %6099 }
 0x3eb   : > { %2864 = vadd.xlane.f32.xlu1 %v2863_v20  ;;  %v7326_v62 = vpop.eup %6101  ;;  %v2869_v32 = vsel %vm2586_vm3, %v7324_v42, 0.0 }
 0x3ec   : > { %v2952_v4 = vpack.c.bf16 %v2920_v24, %v2920_v24  ;;  %v2866_v30 = vsel %vm2586_vm3, %v7326_v62, 0.0  ;;  %v7334_v47 = vpop.eup %6103 }
 0x3ee   : > { %v2829_v26 = vpop.xlane.xlu1 %2828  ;;  %5742 = vmatmul.mubr.msk.bf16.vlgmr.msra.gmra.mrb[112].mxu1 %vm2586_vm3, %v2952_v4 }
 0x3ef   : > { %6107 = vrcp.f32 %v2829_v26  ;;  %5752 = vmatpush3.bf16.msra.mxu1 %v6966_v37  ;;  %v2826_v22 = vpop.xlane.xlu0 %2825  ;;  %2870 = vadd.xlane.f32.xlu1 %v2869_v32  ;;  %v2872_v37 = vsel %vm2586_vm3, %v7334_v47, 0.0 }
 0x3f0   : > { %6109 = vrcp.f32 %v2826_v22  ;;  %2867 = vadd.xlane.f32.xlu0 %v2866_v30  ;;  %5753 = vmatprep.mubr.msk.bf16.mxu1 %vm6284_vm1, %v7793_v15  ;;  %v7796_v22 = vld [vmem:[#allocation14_spill] sm:$0xff] }
 0x3f1   : > { %v6106_v49 = vpop.eup %6105  ;;  %5763 = vmatprep.subr.bf16.mxu1 %v7793_v15 }
 0x3f2   : > { %v2921_v44 = vmul.f32 %v6106_v49, %v7163_v11 }
 0x3f4   : > { %2873 = vadd.xlane.f32.xlu0 %v2872_v37  ;;  %v2953_v6 = vpack.c.bf16 %v2921_v44, %v2921_v44 }
 0x3f6   : > { %5748 = vmatmul.mubr.msk.bf16.vlgmr.msra.gmra.mrb[116].mxu0 %vm2586_vm3, %v2953_v6  ;;  %v2835_v31 = vpop.xlane.xlu1 %2834 }
 0x3f7   : > { %5758 = vmatpush3.bf16.msra.mxu0 %v6968_v38  ;;  %6111 = vrcp.f32 %v2835_v31  ;;  %v2832_v61 = vpop.xlane.xlu0 %2831  ;;  %5759 = vmatprep.mubr.msk.bf16.mxu0 %vm6284_vm1, %v7793_v15 }
 0x3f8   : > { %6113 = vrcp.f32 %v2832_v61  ;;  %5769 = vmatprep.subr.bf16.mxu0 %v7793_v15 }
 0x3f9   : > { %v6108_v23 = vpop.eup %6107 }
 0x3fa   : > { %v6110_v11 = vpop.eup %6109  ;;  %v2923_v13 = vmul.f32 %v6108_v23, %v7175_v33 }
 0x3fb   : > { %v2922_v48 = vmul.f32 %v6110_v11, %v7177_v25 }
 0x3fc   : > { %v2955_v8 = vpack.c.bf16 %v2923_v13, %v2923_v13 }
 0x3fd   : > { %v2954_v19 = vpack.c.bf16 %v2922_v48, %v2922_v48 }
 0x3fe   : > { %5760 = vmatmul.mubr.msk.bf16.vlgmr.msra.gmra.mrb[120].mxu0 %vm2586_vm3, %v2955_v8  ;;  %v7798_v8 = vld [vmem:[#allocation15_spill] sm:$0xff] }
 0x3ff   : > { %5754 = vmatmul.mubr.msk.bf16.vlgmr.msra.gmra.mrb[116].mxu1 %vm2586_vm3, %v2954_v19  ;;  %5770 = vmatpush3.bf16.msra.mxu0 %v6976_v46  ;;  %v2838_v38 = vpop.xlane.xlu0 %2837 }
 0x400   : > { %5764 = vmatpush3.bf16.msra.mxu1 %v6974_v45  ;;  %6115 = vrcp.f32 %v2838_v38  ;;  %1103 = vrot.lane.b32.xlu1 %v6673_v1, %s6287_s13  ;;  %v7794_v1 = vld [vmem:[#allocation11_spill] sm:$0xff] }
 0x401   : > { %v6112_v43 = vpop.eup %6111  ;;  %5765 = vmatprep.mubr.msk.bf16.mxu1 %vm6284_vm1, %v7793_v15  ;;  %5771 = vmatprep.mubr.msk.bf16.mxu0 %vm6284_vm1, %v7793_v15 }
 0x402   : > { %v6114_v33 = vpop.eup %6113  ;;  %v2925_v25 = vmul.f32 %v6112_v43, %v7186_v35  ;;  %5775 = vmatprep.subr.bf16.mxu1 %v7793_v15  ;;  %5781 = vmatprep.subr.bf16.mxu0 %v7793_v15 }
 0x403   : > { %v2924_v45 = vmul.f32 %v6114_v33, %v7191_v12 }
 0x404   : > { %v2957_v46 = vpack.c.bf16 %v2925_v25, %v2925_v25 }
 0x405   : > { %v2956_v41 = vpack.c.bf16 %v2924_v45, %v2924_v45 }
 0x406   : > { %5772 = vmatmul.mubr.msk.bf16.vlgmr.msra.gmra.mrb[124].mxu0 %vm2586_vm3, %v2957_v46 }
 0x407   : > { %5766 = vmatmul.mubr.msk.bf16.vlgmr.msra.gmra.mrb[120].mxu1 %vm2586_vm3, %v2956_v41  ;;  %5782 = vmatpush3.bf16.msra.mxu0 %v6984_v56  ;;  %v7795_v56 = vld [vmem:[#allocation12_spill] sm:$0xff] }
 0x408   : > { %5776 = vmatpush3.bf16.msra.mxu1 %v7794_v1  ;;  %5777 = vmatprep.mubr.msk.bf16.mxu1 %vm6284_vm1, %v7793_v15 }
 0x409   : > { %5787 = vmatprep.subr.bf16.mxu1 %v7793_v15  ;;  %5783 = vmatprep.mubr.msk.bf16.mxu0 %vm6284_vm1, %v7793_v15 }
 0x40a   : > { %v6116_v35 = vpop.eup %6115  ;;  %1101 = vrot.lane.b32.xlu0 %v6677_v3, %s6287_s13  ;;  %5793 = vmatprep.subr.bf16.mxu0 %v7793_v15 }
 0x40b   : > { %v2926_v12 = vmul.f32 %v6116_v35, %v7203_v14 }
 0x40d   : > { %v2958_v16 = vpack.c.bf16 %v2926_v12, %v2926_v12 }
 0x40f   : > { %5778 = vmatmul.mubr.msk.bf16.vlgmr.msra.gmra.mrb[124].mxu1 %vm2586_vm3, %v2958_v16 }
 0x410   : > { %5788 = vmatpush3.bf16.msra.mxu1 %v7795_v56  ;;  %5789 = vmatprep.mubr.msk.bf16.mxu1 %vm6284_vm1, %v7793_v15 }
 0x411   : > { %5799 = vmatprep.subr.bf16.mxu1 %v7793_v15 }
 0x426   : > { %v7381_v2 = vpop.f32.mrb[88].mxu0 }
 0x427   : > { %v5665_v50 = vpop.f32.mrb[89].mxu0 }
 0x428   : > { %v3011_v58 = vpop.f32.mrb[90].mxu0 }
 0x429   : > { %v5666_v59 = vpop.f32.mrb[91].mxu0 }
 0x42e   : > { %v7383_v3 = vpop.f32.mrb[88].mxu1 }
 0x42f   : > { %v2841_v17 = vpop.xlane.xlu1 %2840  ;;  %v5671_v21 = vpop.f32.mrb[89].mxu1 }
 0x430   : > { %6117 = vrcp.f32 %v2841_v17  ;;  %v3054_v14 = vpop.f32.mrb[90].mxu1 }
 0x431   : > { %v5672_v52 = vpop.f32.mrb[91].mxu1 }
 0x434   : > { %v2844_v27 = vpop.xlane.xlu0 %2843 }
 0x435   : > { %6119 = vrcp.f32 %v2844_v27 }
 0x437   : > { %v2847_v9 = vpop.xlane.xlu1 %2846 }
 0x438   : > { %6121 = vrcp.f32 %v2847_v9 }
 0x439   : > { %v7385_v39 = vpop.f32.mrb[92].mxu0 }
 0x43a   : > { %v6118_v53 = vpop.eup %6117  ;;  %v5677_v63 = vpop.f32.mrb[93].mxu0 }
 0x43b   : > { %v2927_v34 = vmul.f32 %v6118_v53, %v7219_v36  ;;  %v3097_v18 = vpop.f32.mrb[94].mxu0  ;;  %v2853_v28 = vpop.xlane.xlu1 %2852 }
 0x43c   : > { %v5678_v24 = vpop.f32.mrb[95].mxu0  ;;  %6123 = vrcp.f32 %v2853_v28  ;;  %v2850_v20 = vpop.xlane.xlu0 %2849 }
 0x43d   : > { %6125 = vrcp.f32 %v2850_v20  ;;  %v2959_v4 = vpack.c.bf16 %v2927_v34, %v2927_v34 }
 0x43f   : > { %v6120_v26 = vpop.eup %6119  ;;  %5784 = vmatmul.mubr.msk.bf16.vlgmr.msra.gmra.mrb[128].mxu0 %vm2586_vm3, %v2959_v4 }
 0x440   : > { %v2928_v32 = vmul.f32 %v6120_v26, %v7225_v5  ;;  %5794 = vmatpush3.bf16.msra.mxu0 %v7796_v22  ;;  %v2856_v30 = vpop.xlane.xlu0 %2855  ;;  %5795 = vmatprep.mubr.msk.bf16.mxu0 %vm6284_vm1, %v7793_v15  ;;  %v7797_v5 = vld [vmem:[#allocation13_spill] sm:$0xff] }
 0x441   : > { %6127 = vrcp.f32 %v2856_v30  ;;  %v7393_v36 = vpop.f32.mrb[92].mxu1  ;;  %5805 = vmatprep.subr.bf16.mxu0 %v7793_v15 }
 0x442   : > { %v6122_v49 = vpop.eup %6121  ;;  %v5683_v44 = vpop.f32.mrb[93].mxu1  ;;  %v2960_v37 = vpack.c.bf16 %v2928_v32, %v2928_v32 }
 0x443   : > { %v2929_v6 = vmul.f32 %v6122_v49, %v7233_v10  ;;  %v3140_v31 = vpop.f32.mrb[94].mxu1  ;;  %v2859_v61 = vpop.xlane.xlu1 %2858 }
 0x444   : > { %v5684_v23 = vpop.f32.mrb[95].mxu1  ;;  %6129 = vrcp.f32 %v2859_v61  ;;  %5790 = vmatmul.mubr.msk.bf16.vlgmr.msra.gmra.mrb[128].mxu1 %vm2586_vm3, %v2960_v37 }
 0x445   : > { %5800 = vmatpush3.bf16.msra.mxu1 %v7797_v5  ;;  %v2961_v11 = vpack.c.bf16 %v2929_v6, %v2929_v6  ;;  %5801 = vmatprep.mubr.msk.bf16.mxu1 %vm6284_vm1, %v7793_v15 }
 0x446   : > { %v6124_v13 = vpop.eup %6123  ;;  %5811 = vmatprep.subr.bf16.mxu1 %v7793_v15 }
 0x447   : > { %v6126_v48 = vpop.eup %6125  ;;  %5796 = vmatmul.mubr.msk.bf16.vlgmr.msra.gmra.mrb[132].mxu0 %vm2586_vm3, %v2961_v11  ;;  %v2931_v38 = vmul.f32 %v6124_v13, %v7242_v55  ;;  %v1100_v1 = vpop.permute.xlu1 %1099 }
 0x448   : > { %v2930_v10 = vmul.f32 %v6126_v48, %v7249_v54  ;;  %5806 = vmatpush3.bf16.msra.mxu0 %v7798_v8  ;;  %v2862_v19 = vpop.xlane.xlu0 %2861  ;;  %5807 = vmatprep.mubr.msk.bf16.mxu0 %vm6284_vm1, %v7793_v15 }
 0x449   : > { %6131 = vrcp.f32 %v2862_v19  ;;  %5817 = vmatprep.subr.bf16.mxu0 %v7793_v15  ;;  %v2963_v25 = vpack.c.bf16 %v2931_v38, %v2931_v38 }
 0x44a   : > { %v2962_v43 = vpack.c.bf16 %v2930_v10, %v2930_v10 }
 0x44b   : > { %v6128_v33 = vpop.eup %6127 }
 0x44c   : > { %5802 = vmatmul.mubr.msk.bf16.vlgmr.msra.gmra.mrb[132].mxu1 %vm2586_vm3, %v2962_v43  ;;  %v2932_v45 = vmul.f32 %v6128_v33, %v7257_v60 }
 0x44d   : > { %5812 = vmatpush3.bf16.msra.mxu1 %v7212_v29  ;;  %5813 = vmatprep.mubr.msk.bf16.mxu1 %vm6284_vm1, %v7793_v15 }
 0x44e   : > { %v6130_v54 = vpop.eup %6129  ;;  %5823 = vmatprep.subr.bf16.mxu1 %v7793_v15  ;;  %v2964_v29 = vpack.c.bf16 %v2932_v45, %v2932_v45 }
 0x44f   : > { %5808 = vmatmul.mubr.msk.bf16.vlgmr.msra.gmra.mrb[136].mxu0 %vm2586_vm3, %v2963_v25  ;;  %v2933_v55 = vmul.f32 %v6130_v54, %v7263_v7 }
 0x450   : > { %5818 = vmatpush3.bf16.msra.mxu0 %v7208_v51  ;;  %5819 = vmatprep.mubr.msk.bf16.mxu0 %vm6284_vm1, %v7793_v15  ;;  %v1098_v51 = vpop.permute.xlu0 %1097 }
 0x451   : > { %5829 = vmatprep.subr.bf16.mxu0 %v7793_v15  ;;  %v2965_v60 = vpack.c.bf16 %v2933_v55, %v2933_v55 }
 0x453   : > { %v6132_v46 = vpop.eup %6131 }
 0x454   : > { %5814 = vmatmul.mubr.msk.bf16.vlgmr.msra.gmra.mrb[136].mxu1 %vm2586_vm3, %v2964_v29  ;;  %v2934_v41 = vmul.f32 %v6132_v46, %v7275_v0 }
 0x455   : > { %5824 = vmatpush3.bf16.msra.mxu1 %v7210_v57  ;;  %5825 = vmatprep.mubr.msk.bf16.mxu1 %vm6284_vm1, %v7793_v15 }
 0x456   : > { %5835 = vmatprep.subr.bf16.mxu1 %v7793_v15  ;;  %v2966_v7 = vpack.c.bf16 %v2934_v41, %v2934_v41 }
 0x457   : > { %5820 = vmatmul.mubr.msk.bf16.vlgmr.msra.gmra.mrb[140].mxu0 %vm2586_vm3, %v2965_v60 }
 0x458   : > { %5830 = vmatpush3.bf16.msra.mxu0 %v1098_v51  ;;  %5831 = vmatprep.mubr.msk.bf16.mxu0 %vm6284_vm1, %v7793_v15 }
 0x459   : > { %5841 = vmatprep.subr.bf16.mxu0 %v7793_v15 }
 0x45c   : > { %5826 = vmatmul.mubr.msk.bf16.vlgmr.msra.gmra.mrb[140].mxu1 %vm2586_vm3, %v2966_v7 }
 0x45d   : > { %5836 = vmatpush3.bf16.msra.mxu1 %v1100_v1  ;;  %5837 = vmatprep.mubr.msk.bf16.mxu1 %vm6284_vm1, %v7793_v15 }
 0x45e   : > { %5847 = vmatprep.subr.bf16.mxu1 %v7793_v15 }
 0x478   : > { %v2865_v57 = vpop.xlane.xlu1 %2864 }
 0x479   : > { %v7435_v0 = vpop.f32.mrb[96].mxu0  ;;  %6133 = vrcp.f32 %v2865_v57 }
 0x47a   : > { %v5689_v35 = vpop.f32.mrb[97].mxu0 }
 0x47b   : > { %v3183_v12 = vpop.f32.mrb[98].mxu0 }
 0x47c   : > { %v5690_v16 = vpop.f32.mrb[99].mxu0  ;;  %v2871_v56 = vpop.xlane.xlu1 %2870 }
 0x47d   : > { %6135 = vrcp.f32 %v2871_v56  ;;  %v2868_v50 = vpop.xlane.xlu0 %2867 }
 0x47e   : > { %6137 = vrcp.f32 %v2868_v50  ;;  %v7437_v58 = vpop.f32.mrb[96].mxu1 }
 0x47f   : > { %v5695_v59 = vpop.f32.mrb[97].mxu1 }
 0x480   : > { %v3226_v17 = vpop.f32.mrb[98].mxu1  ;;  %v1104_v44 = vpop.permute.xlu1 %1103 }
 0x481   : > { %v5696_v21 = vpop.f32.mrb[99].mxu1  ;;  %v2874_v14 = vpop.xlane.xlu0 %2873 }
 0x482   : > { %6139 = vrcp.f32 %v2874_v14 }
 0x483   : > { %v6134_v52 = vpop.eup %6133 }
 0x484   : > { %v2935_v27 = vmul.f32 %v6134_v52, %v7315_v40 }
 0x485   : > { %v1102_v28 = vpop.permute.xlu0 %1101 }
 0x486   : > { %v7440_v9 = vpop.f32.mrb[100].mxu0  ;;  %v2967_v53 = vpack.c.bf16 %v2935_v27, %v2935_v27 }
 0x487   : > { %v6136_v63 = vpop.eup %6135  ;;  %v5701_v34 = vpop.f32.mrb[101].mxu0 }
 0x488   : > { %v6138_v18 = vpop.eup %6137  ;;  %v3269_v24 = vpop.f32.mrb[102].mxu0  ;;  %5832 = vmatmul.mubr.msk.bf16.vlgmr.msra.gmra.mrb[144].mxu0 %vm2586_vm3, %v2967_v53  ;;  %v2937_v26 = vmul.f32 %v6136_v63, %v7324_v42 }
 0x489   : > { %v2936_v20 = vmul.f32 %v6138_v18, %v7326_v62  ;;  %v5702_v4 = vpop.f32.mrb[103].mxu0  ;;  %5842 = vmatpush3.bf16.msra.mxu0 %v1102_v28  ;;  %5843 = vmatprep.mubr.msk.bf16.mxu0 %vm6284_vm1, %v7793_v15 }
 0x48a   : > { %v7447_v40 = vpop.f32.mrb[100].mxu1  ;;  %v2969_v6 = vpack.c.bf16 %v2937_v26, %v2937_v26 }
 0x48b   : > { %v5707_v32 = vpop.f32.mrb[101].mxu1  ;;  %v2968_v22 = vpack.c.bf16 %v2936_v20, %v2936_v20 }
 0x48c   : > { %v6140_v30 = vpop.eup %6139  ;;  %v3312_v49 = vpop.f32.mrb[102].mxu1 }
 0x48d   : > { %v5708_v37 = vpop.f32.mrb[103].mxu1  ;;  %5838 = vmatmul.mubr.msk.bf16.vlgmr.msra.gmra.mrb[144].mxu1 %vm2586_vm3, %v2968_v22  ;;  %v2938_v62 = vmul.f32 %v6140_v30, %v7334_v47 }
 0x48e   : > { %5848 = vmatpush3.bf16.msra.mxu1 %v1104_v44  ;;  %5849 = vmatprep.mubr.msk.bf16.mxu1 %vm6284_vm1, %v7793_v15 }
 0x48f   : > { %v2970_v42 = vpack.c.bf16 %v2938_v62, %v2938_v62 }
 0x490   : > { %5844 = vmatmul.mubr.msk.bf16.vlgmr.msra.gmra.mrb[148].mxu0 %vm2586_vm3, %v2969_v6 }
 0x495   : > { %5850 = vmatmul.mubr.msk.bf16.vlgmr.msra.gmra.mrb[148].mxu1 %vm2586_vm3, %v2970_v42 }
 0x499   : > { %v3352_v31 = vpop.f32.mrb[104].mxu0 }
 0x49a   : > { %v5713_v61 = vpop.f32.mrb[105].mxu0  ;;  %4355 = vrot.lane.b32.xlu0 %v3352_v31, %s6287_s13 }
 0x49b   : > { %v3355_v23 = vpop.f32.mrb[106].mxu0 }
 0x49c   : > { %v5714_v5 = vpop.f32.mrb[107].mxu0 }
 0x4a1   : > { %v3395_v11 = vpop.f32.mrb[104].mxu1 }
 0x4a2   : > { %4357 = vrot.lane.b32.xlu1 %v3395_v11, %s6287_s13  ;;  %v5719_v13 = vpop.f32.mrb[105].mxu1 }
 0x4a3   : > { %v3398_v48 = vpop.f32.mrb[106].mxu1 }
 0x4a4   : > { %v5720_v10 = vpop.f32.mrb[107].mxu1 }
 0x4a9   : > { %v3438_v15 = vpop.f32.mrb[108].mxu0 }
 0x4aa   : > { %v5725_v8 = vpop.f32.mrb[109].mxu0  ;;  %4359 = vrot.lane.b32.xlu0 %v3438_v15, %s6287_s13 }
 0x4ab   : > { %v3441_v47 = vpop.f32.mrb[110].mxu0 }
 0x4ac   : > { %v5726_v19 = vpop.f32.mrb[111].mxu0 }
 0x4b1   : > { %v3481_v38 = vpop.f32.mrb[108].mxu1 }
 0x4b2   : > { %4361 = vrot.lane.b32.xlu1 %v3481_v38, %s6287_s13  ;;  %v5731_v43 = vpop.f32.mrb[109].mxu1 }
 0x4b3   : > { %v3484_v33 = vpop.f32.mrb[110].mxu1 }
 0x4b4   : > { %v5732_v25 = vpop.f32.mrb[111].mxu1 }
 0x4b9   : > { %v3524_v54 = vpop.f32.mrb[112].mxu0 }
 0x4ba   : > { %v5737_v45 = vpop.f32.mrb[113].mxu0  ;;  %4363 = vrot.lane.b32.xlu0 %v3524_v54, %s6287_s13 }
 0x4bb   : > { %v3527_v55 = vpop.f32.mrb[114].mxu0 }
 0x4bc   : > { %v5738_v29 = vpop.f32.mrb[115].mxu0 }
 0x4c1   : > { %v3567_v46 = vpop.f32.mrb[112].mxu1 }
 0x4c2   : > { %4365 = vrot.lane.b32.xlu1 %v3567_v46, %s6287_s13  ;;  %v5743_v60 = vpop.f32.mrb[113].mxu1 }
 0x4c3   : > { %v3570_v41 = vpop.f32.mrb[114].mxu1 }
 0x4c4   : > { %v5744_v51 = vpop.f32.mrb[115].mxu1 }
 0x4c9   : > { %v3610_v7 = vpop.f32.mrb[116].mxu0 }
 0x4ca   : > { %v5749_v1 = vpop.f32.mrb[117].mxu0  ;;  %4367 = vrot.lane.b32.xlu0 %v3610_v7, %s6287_s13 }
 0x4cb   : > { %v3613_v57 = vpop.f32.mrb[118].mxu0 }
 0x4cc   : > { %v5750_v35 = vpop.f32.mrb[119].mxu0 }
 0x4d1   : > { %v3696_v12 = vpop.f32.mrb[120].mxu0 }
 0x4d2   : > { %v3653_v16 = vpop.f32.mrb[116].mxu1  ;;  %v5761_v56 = vpop.f32.mrb[121].mxu0  ;;  %4387 = vrot.lane.b32.xlu0 %v3696_v12, %s6286_s19 }
 0x4d3   : > { %4369 = vrot.lane.b32.xlu1 %v3653_v16, %s6287_s13  ;;  %v5755_v50 = vpop.f32.mrb[117].mxu1  ;;  %v3699_v59 = vpop.f32.mrb[122].mxu0  ;;  %s5019_s13 = scalar_lea.sflag [#allocation4], %s6454_s22 }
 0x4d4   : > { %v3656_v17 = vpop.f32.mrb[118].mxu1  ;;  %v5762_v21 = vpop.f32.mrb[123].mxu0 }
 0x4d5   : > { %v5756_v14 = vpop.f32.mrb[119].mxu1 }
 0x4d9   : > { %v3782_v52 = vpop.f32.mrb[124].mxu0 }
 0x4da   : > { %v3739_v27 = vpop.f32.mrb[120].mxu1  ;;  %v5773_v53 = vpop.f32.mrb[125].mxu0  ;;  %4391 = vrot.lane.b32.xlu0 %v3782_v52, %s6286_s19 }
 0x4db   : > { %4389 = vrot.lane.b32.xlu1 %v3739_v27, %s6286_s19  ;;  %v5767_v63 = vpop.f32.mrb[121].mxu1  ;;  %v3785_v34 = vpop.f32.mrb[126].mxu0 }
 0x4dc   : > { %v3742_v18 = vpop.f32.mrb[122].mxu1  ;;  %v5774_v28 = vpop.f32.mrb[127].mxu0 }
 0x4dd   : > { %v5768_v24 = vpop.f32.mrb[123].mxu1 }
 0x4e2   : > { %v3825_v20 = vpop.f32.mrb[124].mxu1 }
 0x4e3   : > { %4393 = vrot.lane.b32.xlu1 %v3825_v20, %s6286_s19  ;;  %v5779_v4 = vpop.f32.mrb[125].mxu1 }
 0x4e4   : > { %v3828_v26 = vpop.f32.mrb[126].mxu1 }
 0x4e5   : > { %v5780_v32 = vpop.f32.mrb[127].mxu1 }
 0x50c   : > { %v7472_v47 = vpop.permute.xlu0 %4355 }
 0x512   : > { %v3868_v22 = vpop.f32.mrb[128].mxu0 }
 0x513   : > { %v5785_v30 = vpop.f32.mrb[129].mxu0  ;;  %4395 = vrot.lane.b32.xlu0 %v3868_v22, %s6286_s19 }
 0x514   : > { %v3871_v49 = vpop.f32.mrb[130].mxu0  ;;  %v4358_v29 = vpop.permute.xlu1 %4357 }
 0x515   : > { %v5786_v44 = vpop.f32.mrb[131].mxu0 }
 0x517   : > { %v3911_v37 = vpop.f32.mrb[128].mxu1 }
 0x518   : > { %4397 = vrot.lane.b32.xlu1 %v3911_v37, %s6286_s19  ;;  %v5791_v6 = vpop.f32.mrb[129].mxu1 }
 0x519   : > { %v3914_v62 = vpop.f32.mrb[130].mxu1 }
 0x51a   : > { %v5792_v42 = vpop.f32.mrb[131].mxu1  ;;  %v3954_v31 = vpop.f32.mrb[132].mxu0 }
 0x51b   : > { %v5797_v61 = vpop.f32.mrb[133].mxu0  ;;  %4399 = vrot.lane.b32.xlu0 %v3954_v31, %s6286_s19 }
 0x51c   : > { %v3957_v23 = vpop.f32.mrb[134].mxu0  ;;  %v7474_v33 = vpop.permute.xlu0 %4359 }
 0x51d   : > { %v5798_v5 = vpop.f32.mrb[135].mxu0 }
 0x51f   : > { %v3997_v11 = vpop.f32.mrb[132].mxu1 }
 0x520   : > { %4401 = vrot.lane.b32.xlu1 %v3997_v11, %s6286_s19  ;;  %v5803_v13 = vpop.f32.mrb[133].mxu1  ;;  %v4443_v11 = vsel %vm1113_vm2, %v7381_v2, %v7472_v47  ;;  %v4445_v2 = vsel %vm1113_vm2, %v7385_v39, %v7474_v33  ;;  %v6174_v47 = vld [vmem:[%s6460_s27 + $0x8] sm:$0xff]  ;;  %s7713_s19 = scalar_lea.hbm %s7771_s11, %s5268_s15 }
 0x521   : > { %v4000_v48 = vpop.f32.mrb[134].mxu1 }
 0x522   : > { %v5804_v10 = vpop.f32.mrb[135].mxu1  ;;  %v4040_v15 = vpop.f32.mrb[136].mxu0 }
 0x523   : > { %v5809_v8 = vpop.f32.mrb[137].mxu0  ;;  %4419 = vrot.lane.b32.xlu0 %v4040_v15, %s6285_s14  ;;  %v6173_v15 = vld [vmem:[%s6460_s27] sm:$0xff] }
 0x524   : > { %v4043_v19 = vpop.f32.mrb[138].mxu0  ;;  %v7480_v57 = vpop.permute.xlu1 %4361 }
 0x525   : > { %v5810_v38 = vpop.f32.mrb[139].mxu0  ;;  %v4444_v19 = vsel %vm1113_vm2, %v7383_v3, %v4358_v29  ;;  %v6175_v3 = vld [vmem:[%s6460_s27 + $0x10] sm:$0xff] }
 0x527   : > { %v4083_v43 = vpop.f32.mrb[136].mxu1 }
 0x528   : > { %4421 = vrot.lane.b32.xlu1 %v4083_v43, %s6285_s14  ;;  %v5815_v25 = vpop.f32.mrb[137].mxu1 }
 0x529   : > { %v4086_v54 = vpop.f32.mrb[138].mxu1 }
 0x52a   : > { %v5816_v45 = vpop.f32.mrb[139].mxu1  ;;  %v4126_v55 = vpop.f32.mrb[140].mxu0 }
 0x52b   : > { %v5821_v46 = vpop.f32.mrb[141].mxu0  ;;  %4423 = vrot.lane.b32.xlu0 %v4126_v55, %s6285_s14 }
 0x52c   : > { %v4129_v60 = vpop.f32.mrb[142].mxu0  ;;  %v4364_v41 = vpop.permute.xlu0 %4363 }
 0x52d   : > { %v4447_v51 = vsel %vm1113_vm2, %v7435_v0, %v4364_v41  ;;  %v5822_v7 = vpop.f32.mrb[143].mxu0  ;;  %v4446_v60 = vsel %vm1113_vm2, %v7393_v36, %v7480_v57 }
 0x52f   : > { %v4169_v1 = vpop.f32.mrb[140].mxu1 }
 0x530   : > { %4425 = vrot.lane.b32.xlu1 %v4169_v1, %s6285_s14  ;;  %v5827_v35 = vpop.f32.mrb[141].mxu1 }
 0x531   : > { %v4172_v12 = vpop.f32.mrb[142].mxu1 }
 0x532   : > { %v5828_v16 = vpop.f32.mrb[143].mxu1  ;;  %v6177_v12 = vld [vmem:[%s6460_s27 + $0x20] sm:$0xff] }
 0x534   : > { %v4366_v56 = vpop.permute.xlu1 %4365 }
 0x535   : > { %v4448_v50 = vsel %vm1113_vm2, %v7437_v58, %v4366_v56  ;;  %v6178_v56 = vld [vmem:[%s6460_s27 + $0x28] sm:$0xff] }
 0x53c   : > { %v4368_v59 = vpop.permute.xlu0 %4367 }
 0x53d   : > { %v4449_v17 = vsel %vm1113_vm2, %v7440_v9, %v4368_v59 }
 0x544   : > { %v4388_v22 = vpop.permute.xlu0 %4387 }
 0x545   : > { %v4370_v21 = vpop.permute.xlu1 %4369  ;;  %v4452_v13 = vsel %vm4451_vm4, %v4443_v11, %v4388_v22 }
 0x546   : > { %v4450_v0 = vsel %vm1113_vm2, %v7447_v40, %v4370_v21  ;;  %v6179_v21 = vld [vmem:[%s6460_s27 + $0x30] sm:$0xff] }
 0x54c   : > { %v4392_v30 = vpop.permute.xlu0 %4391 }
 0x54d   : > { %v4390_v49 = vpop.permute.xlu1 %4389  ;;  %v4454_v45 = vsel %vm4451_vm4, %v4445_v2, %v4392_v30 }
 0x54e   : > { %v4453_v38 = vsel %vm4451_vm4, %v4444_v19, %v4390_v49 }
 0x555   : > { %v4394_v37 = vpop.permute.xlu1 %4393 }
 0x556   : > { %v4455_v41 = vsel %vm4451_vm4, %v4446_v60, %v4394_v37  ;;  %v5997_v37 = vld [vmem:[%s7765_s5] sm:$0xff]   ;;  %v6007_v60 = vld [vmem:[%s7767_s7 + $0x10] sm:$0xff]  }
 0x557   : > { %5853 = vmatprep.subr.bf16.mxu0 %v5997_v37 }
 0x558   : > { %5854 = vmatpush3.bf16.msra.mxu0 %v5997_v37 }
 0x55b   : > { %v4212_v14 = vpop.f32.mrb[144].mxu0 }
 0x55c   : > { %4427 = vrot.lane.b32.xlu0 %v4212_v14, %s6285_s14  ;;  %v5833_v52 = vpop.f32.mrb[145].mxu0 }
 0x55d   : > { %v4215_v27 = vpop.f32.mrb[146].mxu0 }
 0x55e   : > { %v5834_v53 = vpop.f32.mrb[147].mxu0  ;;  %v6180_v27 = vld [vmem:[%s6460_s27 + $0x38] sm:$0xff] }
 0x560   : > { %v4255_v63 = vpop.f32.mrb[144].mxu1 }
 0x561   : > { %4429 = vrot.lane.b32.xlu1 %v4255_v63, %s6285_s14  ;;  %v5839_v34 = vpop.f32.mrb[145].mxu1 }
 0x562   : > { %v4258_v18 = vpop.f32.mrb[146].mxu1 }
 0x563   : > { %v5840_v58 = vpop.f32.mrb[147].mxu1  ;;  %v4298_v28 = vpop.f32.mrb[148].mxu0 }
 0x564   : > { %4431 = vrot.lane.b32.xlu0 %v4298_v28, %s6285_s14  ;;  %v5845_v9 = vpop.f32.mrb[149].mxu0 }
 0x565   : > { %v4301_v24 = vpop.f32.mrb[150].mxu0 }
 0x566   : > { %v5846_v20 = vpop.f32.mrb[151].mxu0 }
 0x568   : > { %v4341_v4 = vpop.f32.mrb[148].mxu1 }
 0x569   : > { %4433 = vrot.lane.b32.xlu1 %v4341_v4, %s6285_s14  ;;  %v5851_v40 = vpop.f32.mrb[149].mxu1 }
 0x56a   : > { %v4344_v26 = vpop.f32.mrb[150].mxu1 }
 0x56b   : > { %v5852_v32 = vpop.f32.mrb[151].mxu1 }
 0x585   : > { %v4396_v44 = vpop.permute.xlu0 %4395 }
 0x586   : > { %v4456_v6 = vsel %vm4451_vm4, %v4447_v51, %v4396_v44  ;;  %v6176_v51 = vld [vmem:[%s6460_s27 + $0x18] sm:$0xff]  ;;  %s6211_s27 = scalar_lea.vmem %s7715_s28, 1024 }
 0x587   : > { %p6212_p6 = scmp.ne.s32.totalorder %s7715_s28, %s6211_s27  ;;  %p6219_p13 = scmp.lt.s32.totalorder %s6217_s0, %s6211_s27 }
 0x589   : > { %p6213_p12 = pnand %p6212_p6, %p7800_p11  ;;  %p6220_p1 = por %p6219_p13, %p6218_p9 }
 0x58a   : > { %v4398_v62 = vpop.permute.xlu1 %4397 }
 0x58b   : > { %v4457_v42 = vsel %vm4451_vm4, %v4448_v50, %v4398_v62  ;;  %v5999_v62 = vld [vmem:[%s7765_s5 + $0x10] sm:$0xff]   ;;  %p6214_p8 = pneg %p6213_p12 }
 0x58d   : > { %v4400_v31 = vpop.permute.xlu0 %4399  ;;  %p6221_p3 = pnand %p6220_p1, %p6214_p8 }
 0x58e   : > { %v4458_v61 = vsel %vm4451_vm4, %v4449_v17, %v4400_v31  ;;  %v6001_v31 = vld [vmem:[%s7765_s5 + $0x20] sm:$0xff]  }
 0x592   : > { %v4402_v23 = vpop.permute.xlu1 %4401 }
 0x593   : > { %v4459_v5 = vsel %vm4451_vm4, %v4450_v0, %v4402_v23  ;;  %v6003_v23 = vld [vmem:[%s7765_s5 + $0x30] sm:$0xff]  }
 0x595   : > { %v4420_v48 = vpop.permute.xlu0 %4419 }
 0x596   : > { %v4461_v10 = vsel %vm4460_vm5, %v4452_v13, %v4420_v48 }
 0x597   : > { %v4469_v8 = vadd.f32 %v6173_v15, %v4461_v10 }
 0x599   : > { %4479 = vadd.xlane.f32.xlu0 %v4469_v8 }
 0x59a   : > { %v4422_v43 = vpop.permute.xlu1 %4421 }
 0x59b   : > { %v4462_v25 = vsel %vm4460_vm5, %v4453_v38, %v4422_v43 }
 0x59c   : > { %v4470_v54 = vadd.f32 %v6174_v47, %v4462_v25 }
 0x59d   : > { %v4424_v55 = vpop.permute.xlu0 %4423 }
 0x59e   : > { %v4463_v46 = vsel %vm4460_vm5, %v4454_v45, %v4424_v55  ;;  %4481 = vadd.xlane.f32.xlu1 %v4470_v54 }
 0x59f   : > { %v4471_v29 = vadd.f32 %v6175_v3, %v4463_v46  ;;  %v6005_v3 = vld [vmem:[%s7767_s7] sm:$0xff]  }
 0x5a0   : > { %5877 = vmatprep.subr.bf16.mxu1 %v6005_v3 }
 0x5a1   : > { %4483 = vadd.xlane.f32.xlu0 %v4471_v29  ;;  %5878 = vmatpush3.bf16.msra.mxu1 %v6005_v3 }
 0x5a2   : > { %v4426_v39 = vpop.permute.xlu1 %4425 }
 0x5a3   : > { %v4464_v33 = vsel %vm4460_vm5, %v4455_v41, %v4426_v39  ;;  %v6008_v41 = vld [vmem:[%s7767_s7 + $0x18] sm:$0xff]   ;;  %v6009_v39 = vld [vmem:[%s7767_s7 + $0x20] sm:$0xff]  }
 0x5a4   : > { %v4472_v7 = vadd.f32 %v6176_v51, %v4464_v33  ;;  %v6010_v33 = vld [vmem:[%s7767_s7 + $0x28] sm:$0xff]  }
 0x5a6   : > { %4485 = vadd.xlane.f32.xlu0 %v4472_v7 }
 0x5ce   : > { %v4428_v1 = vpop.permute.xlu0 %4427 }
 0x5cf   : > { %v4465_v35 = vsel %vm4460_vm5, %v4456_v6, %v4428_v1  ;;  %v5998_v6 = vld [vmem:[%s7765_s5 + $0x8] sm:$0xff]  }
 0x5d0   : > { %v7522_v16 = vadd.f32 %v6177_v12, %v4465_v35  ;;  %5855 = vmatprep.subr.bf16.mxu0 %v5998_v6 }
 0x5d1   : > { %5856 = vmatpush3.bf16.msra.mxu0 %v5998_v6 }
 0x5d2   : > { %4487 = vadd.xlane.f32.xlu1 %v7522_v16  ;;  %5857 = vmatprep.subr.bf16.mxu0 %v5999_v62 }
 0x5d3   : > { %v4430_v36 = vpop.permute.xlu1 %4429 }
 0x5d4   : > { %v4466_v57 = vsel %vm4460_vm5, %v4457_v42, %v4430_v36  ;;  %v6000_v42 = vld [vmem:[%s7765_s5 + $0x18] sm:$0xff]  }
 0x5d5   : > { %v7527_v50 = vadd.f32 %v6178_v56, %v4466_v57  ;;  %5858 = vmatpush3.bf16.msra.mxu0 %v5999_v62 }
 0x5d6   : > { %v4432_v59 = vpop.permute.xlu0 %4431  ;;  %5859 = vmatprep.subr.bf16.mxu0 %v6000_v42 }
 0x5d7   : > { %v4467_v17 = vsel %vm4460_vm5, %v4458_v61, %v4432_v59  ;;  %4489 = vadd.xlane.f32.xlu0 %v7527_v50  ;;  %v6002_v61 = vld [vmem:[%s7765_s5 + $0x28] sm:$0xff]  }
 0x5d8   : > { %v4475_v0 = vadd.f32 %v6179_v21, %v4467_v17 }
 0x5d9   : > { %5860 = vmatpush3.bf16.msra.mxu0 %v6000_v42 }
 0x5da   : > { %4491 = vadd.xlane.f32.xlu1 %v4475_v0  ;;  %5861 = vmatprep.subr.bf16.mxu0 %v6001_v31 }
 0x5db   : > { %v4434_v14 = vpop.permute.xlu1 %4433 }
 0x5dc   : > { %v4468_v52 = vsel %vm4460_vm5, %v4459_v5, %v4434_v14  ;;  %v6004_v5 = vld [vmem:[%s7765_s5 + $0x38] sm:$0xff]   ;;  %v5232_v14 = vld [vmem:[%s7763_s3] ss:$0 sm:$0xff] }
 0x5dd   : > { %v7534_v53 = vadd.f32 %v6180_v27, %v4468_v52  ;;  %5862 = vmatpush3.bf16.msra.mxu0 %v6001_v31 }
 0x5de   : > { %5863 = vmatprep.subr.bf16.mxu0 %v6002_v61 }
 0x5df   : > { %4493 = vadd.xlane.f32.xlu0 %v7534_v53 }
 0x5e1   : > { %5864 = vmatpush3.bf16.msra.mxu0 %v6002_v61 }
 0x5e2   : > { %5865 = vmatprep.subr.bf16.mxu0 %v6003_v23 }
 0x5e5   : > { %5866 = vmatpush3.bf16.msra.mxu0 %v6003_v23 }
 0x5e6   : > { %5867 = vmatprep.subr.bf16.mxu0 %v6004_v5 }
 0x5e9   : > { %5868 = vmatpush3.bf16.msra.mxu0 %v6004_v5 }
 0x626   : > { %v4480_v63 = vpop.xlane.xlu0 %4479 }
 0x627   : > { %v4496_v34 = vmul.f32 0.0078125, %v4480_v63  ;;  %v5233_v63 = vld [vmem:[%s7764_s4] ss:$0 sm:$0xff] }
 0x629   : > { %v7537_v18 = vsub.f32 %v4469_v8, %v4496_v34 }
 0x62b   : > { %v4482_v58 = vpop.xlane.xlu1 %4481  ;;  %v4512_v28 = vmul.f32 %v7537_v18, %v7537_v18 }
 0x62c   : > { %v4497_v9 = vmul.f32 0.0078125, %v4482_v58 }
 0x62d   : > { %4520 = vadd.xlane.f32.xlu1 %v4512_v28 }
 0x62e   : > { %v7541_v24 = vsub.f32 %v4470_v54, %v4497_v9  ;;  %v4484_v20 = vpop.xlane.xlu0 %4483 }
 0x62f   : > { %v4498_v4 = vmul.f32 0.0078125, %v4484_v20 }
 0x630   : > { %v4513_v40 = vmul.f32 %v7541_v24, %v7541_v24 }
 0x631   : > { %v7545_v26 = vsub.f32 %v4471_v29, %v4498_v4  ;;  %v6006_v29 = vld [vmem:[%s7767_s7 + $0x8] sm:$0xff]  }
 0x632   : > { %4522 = vadd.xlane.f32.xlu0 %v4513_v40  ;;  %5879 = vmatprep.subr.bf16.mxu1 %v6006_v29 }
 0x633   : > { %v4486_v32 = vpop.xlane.xlu0 %4485  ;;  %v4514_v22 = vmul.f32 %v7545_v26, %v7545_v26  ;;  %5880 = vmatpush3.bf16.msra.mxu1 %v6006_v29 }
 0x634   : > { %v4499_v30 = vmul.f32 0.0078125, %v4486_v32  ;;  %5881 = vmatprep.subr.bf16.mxu1 %v6007_v60 }
 0x635   : > { %4524 = vadd.xlane.f32.xlu1 %v4514_v22 }
 0x636   : > { %v7549_v49 = vsub.f32 %v4472_v7, %v4499_v30 }
 0x637   : > { %5882 = vmatpush3.bf16.msra.mxu1 %v6007_v60 }
 0x638   : > { %v4515_v44 = vmul.f32 %v7549_v49, %v7549_v49  ;;  %5883 = vmatprep.subr.bf16.mxu1 %v6008_v41 }
 0x63a   : > { %4526 = vadd.xlane.f32.xlu0 %v4515_v44 }
 0x63b   : > { %5884 = vmatpush3.bf16.msra.mxu1 %v6008_v41 }
 0x63c   : > { %5885 = vmatprep.subr.bf16.mxu1 %v6009_v39 }
 0x63f   : > { %5886 = vmatpush3.bf16.msra.mxu1 %v6009_v39 }
 0x640   : > { %5887 = vmatprep.subr.bf16.mxu1 %v6010_v33 }
 0x643   : > { %5888 = vmatpush3.bf16.msra.mxu1 %v6010_v33 }
 0x65f   : > { %v4488_v11 = vpop.xlane.xlu1 %4487 }
 0x660   : > { %v4500_v13 = vmul.f32 0.0078125, %v4488_v11 }
 0x662   : > { %v7578_v48 = vsub.f32 %v7522_v16, %v4500_v13 }
 0x664   : > { %v4490_v10 = vpop.xlane.xlu0 %4489  ;;  %v4516_v15 = vmul.f32 %v7578_v48, %v7578_v48 }
 0x665   : > { %v4501_v8 = vmul.f32 0.0078125, %v4490_v10 }
 0x666   : > { %4528 = vadd.xlane.f32.xlu1 %v4516_v15 }
 0x667   : > { %v7583_v19 = vsub.f32 %v7527_v50, %v4501_v8  ;;  %v4492_v38 = vpop.xlane.xlu1 %4491 }
 0x668   : > { %v4502_v43 = vmul.f32 0.0078125, %v4492_v38 }
 0x669   : > { %v4517_v25 = vmul.f32 %v7583_v19, %v7583_v19 }
 0x66a   : > { %v7587_v2 = vsub.f32 %v4475_v0, %v4502_v43 }
 0x66b   : > { %4530 = vadd.xlane.f32.xlu0 %v4517_v25 }
 0x66c   : > { %v4494_v47 = vpop.xlane.xlu0 %4493  ;;  %v4518_v54 = vmul.f32 %v7587_v2, %v7587_v2 }
 0x66d   : > { %v4503_v45 = vmul.f32 0.0078125, %v4494_v47 }
 0x66e   : > { %4532 = vadd.xlane.f32.xlu1 %v4518_v54 }
 0x66f   : > { %v7592_v55 = vsub.f32 %v7534_v53, %v4503_v45 }
 0x671   : > { %v4519_v46 = vmul.f32 %v7592_v55, %v7592_v55 }
 0x673   : > { %4534 = vadd.xlane.f32.xlu0 %v4519_v46 }
 0x6ba   : > { %v4521_v51 = vpop.xlane.xlu1 %4520 }
 0x6bb   : > { %v4536_v7 = vmul.f32 0.0078125, %v4521_v51  ;;  %v5234_v51 = vld [vmem:[%s7766_s6] ss:$0 sm:$0xff] }
 0x6bd   : > { %v4544_v1 = vadd.f32 1e-05, %v4536_v7 }
 0x6bf   : > { %6141 = vrsqrt.f32 %v4544_v1  ;;  %v4523_v35 = vpop.xlane.xlu0 %4522 }
 0x6c0   : > { %v4537_v12 = vmul.f32 0.0078125, %v4523_v35 }
 0x6c2   : > { %v4545_v16 = vadd.f32 1e-05, %v4537_v12  ;;  %v4525_v36 = vpop.xlane.xlu1 %4524 }
 0x6c3   : > { %v4538_v57 = vmul.f32 0.0078125, %v4525_v36 }
 0x6c4   : > { %6143 = vrsqrt.f32 %v4545_v16 }
 0x6c5   : > { %v4546_v56 = vadd.f32 1e-05, %v4538_v57 }
 0x6c7   : > { %6145 = vrsqrt.f32 %v4546_v56  ;;  %v4527_v50 = vpop.xlane.xlu0 %4526 }
 0x6c8   : > { %v4539_v59 = vmul.f32 0.0078125, %v4527_v50 }
 0x6c9   : > { %v6142_v17 = vpop.eup %6141 }
 0x6ca   : > { %v4547_v21 = vadd.f32 1e-05, %v4539_v59  ;;  %v4560_v0 = vmul.f32 %v6142_v17, %v7537_v18 }
 0x6cc   : > { %6147 = vrsqrt.f32 %v4547_v21  ;;  %v4574_v53 = vmul.f32 %v5232_v14, %v4560_v0 }
 0x6ce   : > { %v6144_v52 = vpop.eup %6143  ;;  %v7623_v9 = vadd.f32 %v5233_v63, %v4574_v53 }
 0x6cf   : > { %v4561_v27 = vmul.f32 %v6144_v52, %v7541_v24 }
 0x6d1   : > { %v6146_v34 = vpop.eup %6145  ;;  %v4575_v58 = vmul.f32 %v5232_v14, %v4561_v27 }
 0x6d2   : > { %v4562_v28 = vmul.f32 %v6146_v34, %v7545_v26 }
 0x6d3   : > { %v7625_v18 = vadd.f32 %v5233_v63, %v4575_v58 }
 0x6d4   : > { %v4576_v24 = vmul.f32 %v5232_v14, %v4562_v28 }
 0x6d5   : > { %v4596_v20 = vpack.c.bf16 %v7625_v18, %v7623_v9 }
 0x6d6   : > { %v6148_v4 = vpop.eup %6147  ;;  %v7630_v22 = vadd.f32 %v5233_v63, %v4576_v24 }
 0x6d7   : > { %v4563_v40 = vmul.f32 %v6148_v4, %v7549_v49  ;;  %5869 = vmatprep.mubr.bf16.mxu0 %v4596_v20 }
 0x6d9   : > { %v4577_v32 = vmul.f32 %v5232_v14, %v4563_v40 }
 0x6db   : > { %v7632_v30 = vadd.f32 %v5233_v63, %v4577_v32 }
 0x6dd   : > { %v4597_v26 = vpack.c.bf16 %v7632_v30, %v7630_v22 }
 0x6df   : > { %5870 = vmatmul.mubr.bf16.vlgmr.msra.gmra.mrb[152].mxu0 %v4597_v26 }
 0x6f3   : > { %v4529_v44 = vpop.xlane.xlu1 %4528 }
 0x6f4   : > { %v4540_v37 = vmul.f32 0.0078125, %v4529_v44 }
 0x6f6   : > { %v4548_v6 = vadd.f32 1e-05, %v4540_v37  ;;  %v5243_v37 = vld [vmem:[%s7768_s8] ss:$0 sm:$0xff] }
 0x6f8   : > { %6149 = vrsqrt.f32 %v4548_v6  ;;  %v4531_v62 = vpop.xlane.xlu0 %4530 }
 0x6f9   : > { %v4541_v42 = vmul.f32 0.0078125, %v4531_v62 }
 0x6fb   : > { %v4549_v31 = vadd.f32 1e-05, %v4541_v42  ;;  %v4533_v61 = vpop.xlane.xlu1 %4532 }
 0x6fc   : > { %v4542_v49 = vmul.f32 0.0078125, %v4533_v61 }
 0x6fd   : > { %6151 = vrsqrt.f32 %v4549_v31 }
 0x6fe   : > { %v4550_v23 = vadd.f32 1e-05, %v4542_v49 }
 0x700   : > { %6153 = vrsqrt.f32 %v4550_v23  ;;  %v4535_v5 = vpop.xlane.xlu0 %4534 }
 0x701   : > { %v4543_v11 = vmul.f32 0.0078125, %v4535_v5 }
 0x702   : > { %v6150_v13 = vpop.eup %6149 }
 0x703   : > { %v4551_v10 = vadd.f32 1e-05, %v4543_v11  ;;  %v4564_v15 = vmul.f32 %v6150_v13, %v7578_v48 }
 0x705   : > { %6155 = vrsqrt.f32 %v4551_v10  ;;  %v4578_v43 = vmul.f32 %v5232_v14, %v4564_v15 }
 0x707   : > { %v6152_v8 = vpop.eup %6151  ;;  %v7638_v54 = vadd.f32 %v5233_v63, %v4578_v43 }
 0x708   : > { %v4565_v38 = vmul.f32 %v6152_v8, %v7583_v19 }
 0x70a   : > { %v6154_v25 = vpop.eup %6153  ;;  %v4579_v47 = vmul.f32 %v5232_v14, %v4565_v38 }
 0x70b   : > { %v4566_v46 = vmul.f32 %v6154_v25, %v7587_v2  ;;  %v6011_v2 = vld [vmem:[%s7767_s7 + $0x30] sm:$0xff]  }
 0x70c   : > { %v7640_v45 = vadd.f32 %v5233_v63, %v4579_v47  ;;  %5889 = vmatprep.subr.bf16.mxu1 %v6011_v2 }
 0x70d   : > { %v4580_v60 = vmul.f32 %v5232_v14, %v4566_v46  ;;  %5890 = vmatpush3.bf16.msra.mxu1 %v6011_v2 }
 0x70e   : > { %v4598_v3 = vpack.c.bf16 %v7640_v45, %v7638_v54 }
 0x70f   : > { %v6156_v29 = vpop.eup %6155  ;;  %v7646_v39 = vadd.f32 %v5233_v63, %v4580_v60 }
 0x710   : > { %5873 = vmatprep.mubr.bf16.mxu0 %v4598_v3  ;;  %v4567_v48 = vmul.f32 %v6156_v29, %v7592_v55  ;;  %v6012_v55 = vld [vmem:[%s7767_s7 + $0x38] sm:$0xff]  }
 0x711   : > { %5891 = vmatprep.subr.bf16.mxu1 %v6012_v55 }
 0x712   : > { %v4581_v41 = vmul.f32 %v5232_v14, %v4567_v48  ;;  %5892 = vmatpush3.bf16.msra.mxu1 %v6012_v55 }
 0x714   : > { %v7648_v19 = vadd.f32 %v5233_v63, %v4581_v41 }
 0x716   : > { %v4599_v33 = vpack.c.bf16 %v7648_v19, %v7646_v39 }
 0x718   : > { %5874 = vmatmul.mubr.bf16.gmra.mrb[156].mxu0 %v4599_v33 }
 0x7b2   : > { %v5871_v7 = vpop.f32.mrb[152].mxu0 }
 0x7b3   : > { %v4714_v1 = vadd.f32 %v5871_v7, %v5234_v51  ;;  %v4705_v35 = vpop.f32.mrb[153].mxu0 }
 0x7b4   : > { %v4706_v12 = vadd.f32 %v5234_v51, %v4705_v35  ;;  %v5872_v16 = vpop.f32.mrb[154].mxu0 }
 0x7b5   : > { %v4717_v36 = vadd.f32 %v5872_v16, %v5234_v51  ;;  %v4708_v57 = vpop.f32.mrb[155].mxu0  ;;  %v4738_v50 = vmax.f32 %v4714_v1, 0.0 }
 0x7b6   : > { %v4709_v56 = vadd.f32 %v5234_v51, %v4708_v57  ;;  %v4736_v17 = vmax.f32 %v4706_v12, 0.0 }
 0x7b7   : > { %v4739_v59 = vmax.f32 %v4717_v36, 0.0 }
 0x7b8   : > { %v4737_v21 = vmax.f32 %v4709_v56, 0.0 }
 0x7b9   : > { %v4745_v0 = vpack.c.bf16 %v4739_v59, %v4738_v50 }
 0x7ba   : > { %v4744_v14 = vpack.c.bf16 %v4737_v21, %v4736_v17 }
 0x7bc   : > { %5893 = vmatprep.mubr.bf16.mxu1 %v4744_v14 }
 0x7bd   : > { %5894 = vmatmul.mubr.bf16.vlgmr.msra.gmra.mrb[152].mxu1 %v4745_v0 }
 0x7eb   : > { %v5875_v52 = vpop.f32.mrb[156].mxu0 }
 0x7ec   : > { %v4730_v27 = vadd.f32 %v5875_v52, %v5234_v51  ;;  %v4721_v53 = vpop.f32.mrb[157].mxu0 }
 0x7ed   : > { %v4722_v63 = vadd.f32 %v5234_v51, %v4721_v53  ;;  %v5876_v34 = vpop.f32.mrb[158].mxu0 }
 0x7ee   : > { %v4733_v58 = vadd.f32 %v5876_v34, %v5234_v51  ;;  %v4724_v28 = vpop.f32.mrb[159].mxu0  ;;  %v4742_v4 = vmax.f32 %v4730_v27, 0.0 }
 0x7ef   : > { %v4725_v20 = vadd.f32 %v5234_v51, %v4724_v28  ;;  %v4740_v24 = vmax.f32 %v4722_v63, 0.0 }
 0x7f0   : > { %v4743_v40 = vmax.f32 %v4733_v58, 0.0 }
 0x7f1   : > { %v4741_v32 = vmax.f32 %v4725_v20, 0.0 }
 0x7f2   : > { %v4747_v26 = vpack.c.bf16 %v4743_v40, %v4742_v4 }
 0x7f3   : > { %v4746_v44 = vpack.c.bf16 %v4741_v32, %v4740_v24 }
 0x7f5   : > { %5897 = vmatprep.mubr.bf16.mxu1 %v4746_v44 }
 0x7f6   : > { %5898 = vmatmul.mubr.bf16.gmra.mrb[156].mxu1 %v4747_v26 }
 0x890   : > { %v5895_v6 = vpop.f32.mrb[152].mxu1 }
 0x891   : > { %v4862_v62 = vadd.f32 %v5895_v6, %v5243_v37  ;;  %v4853_v42 = vpop.f32.mrb[153].mxu1 }
 0x892   : > { %v5896_v31 = vpop.f32.mrb[154].mxu1  ;;  %v4854_v49 = vadd.f32 %v5243_v37, %v4853_v42 }
 0x893   : > { %v4886_v61 = vadd.f32 %v4862_v62, %v7630_v22  ;;  %v4865_v23 = vadd.f32 %v5896_v31, %v5243_v37  ;;  %v4856_v5 = vpop.f32.mrb[155].mxu1 }
 0x894   : > { %v4857_v13 = vadd.f32 %v5243_v37, %v4856_v5  ;;  %v4884_v10 = vadd.f32 %v4854_v49, %v7623_v9  ;;  %v5252_v49 = vld [vmem:[%s7769_s9] ss:$0 sm:$0xff] }
 0x895   : > { %v4887_v11 = vadd.f32 %v4865_v23, %v7632_v30  ;;  %4898 = vadd.xlane.f32.xlu1 %v4886_v61 }
 0x896   : > { %v4885_v15 = vadd.f32 %v4857_v13, %v7625_v18 }
 0x897   : > { %4900 = vadd.xlane.f32.xlu0 %v4887_v11 }
 0x899   : > { %4894 = vadd.xlane.f32.xlu1 %v4884_v10 }
 0x89b   : > { %4896 = vadd.xlane.f32.xlu0 %v4885_v15 }
 0x8c9   : > { %v5899_v8 = vpop.f32.mrb[156].mxu1 }
 0x8ca   : > { %v4869_v38 = vpop.f32.mrb[157].mxu1  ;;  %v4878_v46 = vadd.f32 %v5899_v8, %v5243_v37 }
 0x8cb   : > { %v4870_v43 = vadd.f32 %v5243_v37, %v4869_v38  ;;  %v5900_v25 = vpop.f32.mrb[158].mxu1 }
 0x8cc   : > { %v4881_v47 = vadd.f32 %v5900_v25, %v5243_v37  ;;  %v4872_v22 = vpop.f32.mrb[159].mxu1  ;;  %v4890_v9 = vadd.f32 %v4878_v46, %v7646_v39 }
 0x8cd   : > { %v4888_v3 = vadd.f32 %v4870_v43, %v7638_v54  ;;  %v4873_v29 = vadd.f32 %v5243_v37, %v4872_v22 }
 0x8ce   : > { %v4891_v18 = vadd.f32 %v4881_v47, %v7648_v19 }
 0x8cf   : > { %v4889_v30 = vadd.f32 %v4873_v29, %v7640_v45  ;;  %4902 = vadd.xlane.f32.xlu1 %v4888_v3 }
 0x8d1   : > { %4904 = vadd.xlane.f32.xlu0 %v4889_v30 }
 0x8d3   : > { %4906 = vadd.xlane.f32.xlu1 %v4890_v9 }
 0x8d5   : > { %4908 = vadd.xlane.f32.xlu0 %v4891_v18 }
 0x922   : > { %v4899_v48 = vpop.xlane.xlu1 %4898 }
 0x923   : > { %v4912_v60 = vmul.f32 0.0078125, %v4899_v48 }
 0x924   : > { %v4901_v41 = vpop.xlane.xlu0 %4900 }
 0x925   : > { %v4920_v33 = vsub.f32 %v4886_v61, %v4912_v60  ;;  %v4913_v2 = vmul.f32 0.0078125, %v4901_v41 }
 0x926   : > { %v4895_v55 = vpop.xlane.xlu1 %4894 }
 0x927   : > { %v4921_v51 = vsub.f32 %v4887_v11, %v4913_v2  ;;  %v4910_v7 = vmul.f32 0.0078125, %v4895_v55  ;;  %v4928_v54 = vmul.f32 %v4920_v33, %v4920_v33  ;;  %v5253_v11 = vld [vmem:[%s7770_s10] ss:$0 sm:$0xff] }
 0x928   : > { %v4897_v1 = vpop.xlane.xlu0 %4896 }
 0x929   : > { %v4918_v35 = vsub.f32 %v4884_v10, %v4910_v7  ;;  %v4911_v45 = vmul.f32 0.0078125, %v4897_v1  ;;  %4938 = vadd.xlane.f32.xlu1 %v4928_v54  ;;  %v4929_v12 = vmul.f32 %v4921_v51, %v4921_v51 }
 0x92b   : > { %v4919_v39 = vsub.f32 %v4885_v15, %v4911_v45  ;;  %4940 = vadd.xlane.f32.xlu0 %v4929_v12  ;;  %v4926_v16 = vmul.f32 %v4918_v35, %v4918_v35 }
 0x92d   : > { %4934 = vadd.xlane.f32.xlu1 %v4926_v16  ;;  %v4927_v19 = vmul.f32 %v4919_v39, %v4919_v39 }
 0x92f   : > { %4936 = vadd.xlane.f32.xlu0 %v4927_v19 }
 0x95c   : > { %v4903_v36 = vpop.xlane.xlu1 %4902 }
 0x95d   : > { %v4914_v57 = vmul.f32 0.0078125, %v4903_v36 }
 0x95e   : > { %v4905_v56 = vpop.xlane.xlu0 %4904 }
 0x95f   : > { %v7672_v50 = vsub.f32 %v4888_v3, %v4914_v57  ;;  %v4915_v59 = vmul.f32 0.0078125, %v4905_v56 }
 0x960   : > { %v4907_v17 = vpop.xlane.xlu1 %4906 }
 0x961   : > { %v7674_v21 = vsub.f32 %v4889_v30, %v4915_v59  ;;  %v4916_v0 = vmul.f32 0.0078125, %v4907_v17  ;;  %v4930_v14 = vmul.f32 %v7672_v50, %v7672_v50 }
 0x962   : > { %v4909_v52 = vpop.xlane.xlu0 %4908 }
 0x963   : > { %v7678_v27 = vsub.f32 %v4890_v9, %v4916_v0  ;;  %v4917_v53 = vmul.f32 0.0078125, %v4909_v52  ;;  %4942 = vadd.xlane.f32.xlu1 %v4930_v14  ;;  %v4931_v63 = vmul.f32 %v7674_v21, %v7674_v21 }
 0x965   : > { %v7682_v34 = vsub.f32 %v4891_v18, %v4917_v53  ;;  %4944 = vadd.xlane.f32.xlu0 %v4931_v63  ;;  %v4932_v58 = vmul.f32 %v7678_v27, %v7678_v27 }
 0x967   : > { %4946 = vadd.xlane.f32.xlu1 %v4932_v58  ;;  %v4933_v28 = vmul.f32 %v7682_v34, %v7682_v34 }
 0x969   : > { %4948 = vadd.xlane.f32.xlu0 %v4933_v28 }
 0x9b6   : > { %v4939_v20 = vpop.xlane.xlu1 %4938 }
 0x9b7   : > { %v4952_v4 = vmul.f32 0.0078125, %v4939_v20 }
 0x9b8   : > { %v4941_v40 = vpop.xlane.xlu0 %4940 }
 0x9b9   : > { %v4960_v24 = vadd.f32 1e-05, %v4952_v4  ;;  %v4953_v32 = vmul.f32 0.0078125, %v4941_v40 }
 0x9ba   : > { %v4935_v26 = vpop.xlane.xlu1 %4934 }
 0x9bb   : > { %6157 = vrsqrt.f32 %v4960_v24  ;;  %v4961_v44 = vadd.f32 1e-05, %v4953_v32  ;;  %v4950_v37 = vmul.f32 0.0078125, %v4935_v26 }
 0x9bc   : > { %v4937_v6 = vpop.xlane.xlu0 %4936 }
 0x9bd   : > { %6159 = vrsqrt.f32 %v4961_v44  ;;  %v4958_v62 = vadd.f32 1e-05, %v4950_v37  ;;  %v4951_v42 = vmul.f32 0.0078125, %v4937_v6 }
 0x9bf   : > { %6161 = vrsqrt.f32 %v4958_v62  ;;  %v4959_v31 = vadd.f32 1e-05, %v4951_v42 }
 0x9c1   : > { %6163 = vrsqrt.f32 %v4959_v31 }
 0x9c5   : > { %v6158_v61 = vpop.eup %6157 }
 0x9c6   : > { %v4976_v23 = vmul.f32 %v6158_v61, %v4920_v33 }
 0x9c7   : > { %v6160_v5 = vpop.eup %6159 }
 0x9c8   : > { %v4990_v13 = vmul.f32 %v5252_v49, %v4976_v23  ;;  %v4977_v10 = vmul.f32 %v6160_v5, %v4921_v51 }
 0x9c9   : > { %v6162_v15 = vpop.eup %6161 }
 0x9ca   : > { %v5004_v8 = vadd.f32 %v5253_v11, %v4990_v13  ;;  %v4991_v38 = vmul.f32 %v5252_v49, %v4977_v10  ;;  %v4974_v43 = vmul.f32 %v6162_v15, %v4918_v35 }
 0x9cb   : > { %v6164_v25 = vpop.eup %6163 }
 0x9cc   : > { %5012 = vst [vmem:[%s7696_s16 + $0x10] sm:$0xff] %v5004_v8  ;;  %v5005_v47 = vadd.f32 %v5253_v11, %v4991_v38  ;;  %v4988_v22 = vmul.f32 %v5252_v49, %v4974_v43  ;;  %v4975_v46 = vmul.f32 %v6164_v25, %v4919_v39 }
 0x9ce   : > { %5013 = vst [vmem:[%s7696_s16 + $0x18] sm:$0xff] %v5005_v47  ;;  %v5002_v3 = vadd.f32 %v5253_v11, %v4988_v22  ;;  %v4989_v29 = vmul.f32 %v5252_v49, %v4975_v46 }
 0x9d0   : > { %5010 = vst [vmem:[%s7696_s16] sm:$0xff] %v5002_v3  ;;  %v5003_v30 = vadd.f32 %v5253_v11, %v4989_v29 }
 0x9d2   : > { %5011 = vst [vmem:[%s7696_s16 + $0x8] sm:$0xff] %v5003_v30 }
 0x9f0   : > { %v4943_v9 = vpop.xlane.xlu1 %4942 }
 0x9f1   : > { %v4954_v18 = vmul.f32 0.0078125, %v4943_v9 }
 0x9f2   : > { %v4945_v48 = vpop.xlane.xlu0 %4944 }
 0x9f3   : > { %v4962_v60 = vadd.f32 1e-05, %v4954_v18  ;;  %v4955_v41 = vmul.f32 0.0078125, %v4945_v48 }
 0x9f4   : > { %v4947_v33 = vpop.xlane.xlu1 %4946 }
 0x9f5   : > { %6165 = vrsqrt.f32 %v4962_v60  ;;  %v4963_v2 = vadd.f32 1e-05, %v4955_v41  ;;  %v4956_v55 = vmul.f32 0.0078125, %v4947_v33 }
 0x9f6   : > { %v4949_v51 = vpop.xlane.xlu0 %4948 }
 0x9f7   : > { %6167 = vrsqrt.f32 %v4963_v2  ;;  %v4964_v7 = vadd.f32 1e-05, %v4956_v55  ;;  %v4957_v54 = vmul.f32 0.0078125, %v4949_v51 }
 0x9f9   : > { %6169 = vrsqrt.f32 %v4964_v7  ;;  %v4965_v1 = vadd.f32 1e-05, %v4957_v54 }
 0x9fb   : > { %6171 = vrsqrt.f32 %v4965_v1 }
 0x9ff   : > { %v6166_v35 = vpop.eup %6165 }
 0xa00   : > { %v4978_v45 = vmul.f32 %v6166_v35, %v7672_v50 }
 0xa01   : > { %v6168_v12 = vpop.eup %6167 }
 0xa02   : > { %v4992_v39 = vmul.f32 %v5252_v49, %v4978_v45  ;;  %v4979_v16 = vmul.f32 %v6168_v12, %v7674_v21 }
 0xa03   : > { %v6170_v19 = vpop.eup %6169 }
 0xa04   : > { %v5006_v36 = vadd.f32 %v5253_v11, %v4992_v39  ;;  %v4993_v57 = vmul.f32 %v5252_v49, %v4979_v16  ;;  %v4980_v56 = vmul.f32 %v6170_v19, %v7678_v27 }
 0xa05   : > { %v6172_v59 = vpop.eup %6171 }
 0xa06   : > { %5014 = vst [vmem:[%s7696_s16 + $0x20] sm:$0xff] %v5006_v36  ;;  %v5007_v17 = vadd.f32 %v5253_v11, %v4993_v57  ;;  %v4994_v0 = vmul.f32 %v5252_v49, %v4980_v56  ;;  %v4981_v14 = vmul.f32 %v6172_v59, %v7682_v34 }
 0xa08   : > { %5015 = vst [vmem:[%s7696_s16 + $0x28] sm:$0xff] %v5007_v17  ;;  %v5008_v50 = vadd.f32 %v5253_v11, %v4994_v0  ;;  %v4995_v21 = vmul.f32 %v5252_v49, %v4981_v14 }
 0xa0a   : > { %5016 = vst [vmem:[%s7696_s16 + $0x30] sm:$0xff] %v5008_v50  ;;  %v5009_v52 = vadd.f32 %v5253_v11, %v4995_v21 }
 0xa0c   : > { %5017 = vst [vmem:[%s7696_s16 + $0x38] sm:$0xff] %v5009_v52 }
 0xa0d   : > { %6224 = shalt.err (!%p6221_p3)
}
 0xa0e   : > { %s6225_s18 = scalar_lea.hbm %s7713_s19, 1024  ;;  %s6229_s16 = scalar_lea.hbm %s7771_s11, 4096 }
 0xa0f   : > { %p6226_p4 = scmp.ne.s32.totalorder %s7713_s19, %s6225_s18  ;;  %p6230_p2 = scmp.lt.u32.totalorder %s7713_s19, %s7771_s11 }
 0xa10   : > { %p6231_p7 = scmp.lt.u32.totalorder %s6229_s16, %s6225_s18  ;;  %p6233_p6 = scmp.lt.u32.totalorder %s6225_s18, %s7713_s19 }
 0xa11   : > { %p6227_p5 = pnand %p6226_p4, %p7800_p11 }
 0xa12   : > { %p6232_p10 = por %p6231_p7, %p6230_p2 }
 0xa13   : > { %p6228_p0 = pneg %p6227_p5 }
 0xa14   : > { %p6234_p12 = por %p6233_p6, %p6232_p10 }
 0xa16   : > { %p6235_p8 = pnand %p6234_p12, %p6228_p0 }
 0xa18   : > { %6238 = shalt.err (!%p6235_p8)
}
 0xa19   : > { %s6289_s14 = smov 128   ;;  %s6290_s27 = smov 8  }
 0xa1a   : > { %5903 = dma.vmem_to_hbm [thread:$0]  (%p7800_p11), %s7715_s28, 1024, %s7713_s19, %s5019_s13, %s6289_s14, %s6289_s14, %s6290_s27  }
 0xa1b PF: > { %p5914_p9 = scmp.ge.s32.totalorder %s6277_s20, 2  ;;  %s5047_s21 = sand.u32 1, %s6265_s17  }
 0xa1c   : > { %p7801_p13 = scmp.ne.s32.totalorder %s7785_s30, 0  ;;  %s5048_s26 = scalar_lea.sflag [#allocation4], %s5047_s21 }
 0xa1e   : > { %p5910_p1 = pnand %p5914_p9, %p7801_p13 }
 0xa20   : > { %6260 = dma.done.wait (!%p5910_p1), %s5048_s26, 1024  }
 0xa21   : > { %6262 = vsyncadd (!%p5910_p1), %s5048_s26, 4294966272  ;;  %s7802_s17 = sld [smem:[#allocation8_spill]]  ;;  %s7803_s18 = sld [smem:[#allocation9_spill]] }
 0xa22   : > { %s7804_s19 = sld [smem:[#allocation10_spill]]  ;;  %p24_p3 = scmp.ge.s32.totalorder %s6376_s23, 6  }
 0xa23   : > { %s7805_s20 = smov %s6376_s23 }
 0xa24   :  { %26 = sbr.rel (!%p24_p3) target bundleno = 7 (0x7), region = 112 }
 0xa2b   :  { %5053 = vsyncpa [#allocation3], 1 }
 0xa2c   :  { %5055 = vsyncpa [#allocation3 + $0x1], 1 }
 0xa2d   :  { %5056 = vsyncpa [#allocation4], 1 }
 0xa2e   :  { %5058 = vsyncpa [#allocation4 + $0x1], 1 }

</bundles_post_ra>
